<compile_context>
chip_gen: v5e
topology: v5e:2x2
jax: 0.10.0
libtpu: 0.0.40
codegen_flags: <defaults>
</compile_context>

<pallas_src>
import functools

import jax
import jax.numpy as jnp
from jax.experimental import pallas as pl
from jax.experimental.pallas import tpu as pltpu

_INV_SQRT2 = 0.7071067811865476


def _gelu(x, approx=False):
    # Default matches torch.nn.GELU() (exact, erf-based).  approx=True uses the
    # tanh form (EUP slot, nearly free) when torch-exact parity is not required.
    if approx:
        return jax.nn.gelu(x, approximate=True)
    return 0.5 * x * (1.0 + jax.lax.erf(x * _INV_SQRT2))


# ----------------------------------------------------------------------------
# Kernels
# ----------------------------------------------------------------------------
def _mlp_fused_kernel(num_blocks, gelu_approx, x_ref, *refs):
    """refs = [w_emb, b_emb, (w_i, b_i) * num_blocks, w_out, b_out, out_ref]."""
    out_ref = refs[-1]
    p = refs[:-1]
    cdt = p[0].dtype  # matmul operand dtype (bf16 on the fast path)

    # embedding + GELU  (dropout == identity in eval mode)
    h = x_ref[...].astype(cdt)
    acc = jnp.dot(h, p[0][...], preferred_element_type=jnp.float32) + p[1][...]
    h = _gelu(acc, gelu_approx).astype(cdt)

    # hidden blocks
    for i in range(num_blocks):
        w = p[2 + 2 * i]
        b = p[3 + 2 * i]
        acc = jnp.dot(h, w[...], preferred_element_type=jnp.float32) + b[...]
        h = _gelu(acc, gelu_approx).astype(cdt)

    # output head (action dim already padded to a lane-dense multiple of 128)
    w_out, b_out = p[-2], p[-1]
    y = jnp.dot(h, w_out[...], preferred_element_type=jnp.float32) + b_out[...]
    out_ref[...] = y.astype(out_ref.dtype)


def _linear_kernel(apply_gelu, gelu_approx, x_ref, w_ref, b_ref, o_ref):
    """One (bias + optional GELU)-fused linear layer; used by the layered path."""
    acc = jnp.dot(x_ref[...].astype(w_ref.dtype), w_ref[...],
                  preferred_element_type=jnp.float32) + b_ref[...]
    if apply_gelu:
        acc = _gelu(acc, gelu_approx)
    o_ref[...] = acc.astype(o_ref.dtype)


# ----------------------------------------------------------------------------
# Tiling / budgeting helpers
# ----------------------------------------------------------------------------
def _vmem_budget_cap():
    """Generation-aware VMEM cap with compiler headroom (~54 MiB on v7x,
    ~108 MiB on v5e/v6e)."""
    try:
        cap = int(pltpu.get_tpu_info().vmem_capacity_bytes)
    except Exception:
        cap = 128 << 20  # assume v5e/v6e-class if the query is unavailable
    return max(int(cap * 0.85), 32 << 20)


def _pick_batch_tile(batch, use_bf16):
    """Largest tile that divides the batch, prefers >=2 (and even) grid steps."""
    min_tb = 16 if use_bf16 else 8
    candidates = [c for c in (1024, 512, 256, 128, 64, 32, 16, 8) if c >= min_tb]
    # 1) divides batch, >= 2 steps, even step count (both v7x cores get work)
    for c in candidates:
        if batch % c == 0 and batch // c >= 2 and (batch // c) % 2 == 0:
            return c
    # 2) divides batch, >= 2 steps
    for c in candidates:
        if batch % c == 0 and batch // c >= 2:
            return c
    # 3) divides batch (single step; tiny batches)
    for c in candidates:
        if batch % c == 0:
            return c
    # 4) fall back to padding the batch
    for c in candidates:
        if batch >= 2 * c:
            return c
    return min_tb


def _pick_n_tile(n):
    """Weight-column tile for the layered path (lane-dense multiples of 128)."""
    for t in (1024, 512, 256, 128):
        if n % t == 0:
            return t
    return n


# ----------------------------------------------------------------------------
# Layered fallback: one pallas_call per layer, weights tiled along N
# ----------------------------------------------------------------------------
def _linear_layer(x, w, b, *, apply_gelu, gelu_approx, out_dtype, tb, vmem_cap):
    Bp, K = x.shape
    N = w.shape[1]
    tn = _pick_n_tile(N)
    grid = (Bp // tb, N // tn)

    out_itemsize = jnp.dtype(out_dtype).itemsize
    flops = 2 * Bp * K * N
    bytes_accessed = (int(x.size) * x.dtype.itemsize
                      + int(w.size) * w.dtype.itemsize
                      + int(b.size) * b.dtype.itemsize
                      + Bp * N * out_itemsize)
    vmem_needed = (2 * (tb * K * x.dtype.itemsize
                        + K * tn * w.dtype.itemsize
                        + tn * b.dtype.itemsize
                        + tb * tn * out_itemsize)
                   + tb * tn * 4          # f32 accumulator
                   + (2 << 20))

    kernel = functools.partial(_linear_kernel, apply_gelu, gelu_approx)
    return pl.pallas_call(
        kernel,
        out_shape=jax.ShapeDtypeStruct((Bp, N), out_dtype),
        grid_spec=pltpu.PrefetchScalarGridSpec(
            num_scalar_prefetch=0,
            grid=grid,
            in_specs=[pl.BlockSpec((tb, K), lambda i, j: (i, 0)),
                      pl.BlockSpec((K, tn), lambda i, j: (0, j)),
                      pl.BlockSpec((1, tn), lambda i, j: (0, j))],
            out_specs=pl.BlockSpec((tb, tn), lambda i, j: (i, j)),
        ),
        compiler_params=pltpu.CompilerParams(
            dimension_semantics=("parallel", "parallel"),
            vmem_limit_bytes=int(min(max(vmem_needed, 32 << 20), vmem_cap)),
        ),
        cost_estimate=pl.CostEstimate(
            flops=flops,
            transcendentals=(Bp * N if apply_gelu else 0),
            bytes_accessed=bytes_accessed,
        ),
    )(x, w, b)


# ----------------------------------------------------------------------------
# Public forward
# ----------------------------------------------------------------------------
def mlp_forward(x, params, *, num_blocks, batch_tile=None, use_bf16=True,
                gelu_approx=False, force_layered=False):
    """params: dict with w_emb, b_emb, w_blocks (list), b_blocks (list), w_out, b_out.

    Weights are stored as (in_dim, out_dim) (transposed vs. PyTorch nn.Linear)."""
    B, obs = x.shape
    hidden = params["w_emb"].shape[1]
    action = params["w_out"].shape[1]
    out_dtype = x.dtype

    # ---- batch tiling: prefer divisors of B (no wrapper-side pad), even steps ----
    tb = batch_tile if batch_tile is not None else _pick_batch_tile(B, use_bf16)
    n_steps = pl.cdiv(B, tb)
    Bp = tb * n_steps
    x_p = jnp.pad(x, ((0, Bp - B), (0, 0))) if Bp != B else x

    # ---- lane-dense output: pad action dim up to a multiple of 128 ----
    a_pad = 128 * pl.cdiv(action, 128)
    w_out = params["w_out"]
    b_out = params["b_out"].reshape(1, action)
    if a_pad != action:
        w_out = jnp.pad(w_out, ((0, 0), (0, a_pad - action)))
        b_out = jnp.pad(b_out, ((0, 0), (0, a_pad - action)))

    # bf16 operands into the MXU; biases stay f32 (added to the f32 accumulator).
    w_dtype = jnp.bfloat16 if use_bf16 else out_dtype
    weights = ([params["w_emb"].astype(w_dtype)]
               + [w.astype(w_dtype) for w in params["w_blocks"]]
               + [w_out.astype(w_dtype)])
    biases = ([params["b_emb"].reshape(1, hidden).astype(jnp.float32)]
              + [b.reshape(1, hidden).astype(jnp.float32) for b in params["b_blocks"]]
              + [b_out.astype(jnp.float32)])

    # ---- VMEM accounting (generation-aware cap) ----
    itemsize = jnp.dtype(out_dtype).itemsize
    param_bytes = (sum(int(w.size) * w.dtype.itemsize for w in weights)
                   + sum(int(b.size) * b.dtype.itemsize for b in biases))
    tile_bytes = 2 * (tb * obs * x_p.dtype.itemsize + tb * a_pad * itemsize)
    # live intermediates inside the fused body: f32 acc + bf16 h + temp, plus head acc
    act_bytes = tb * hidden * (4 + 2 + 4) + tb * a_pad * 4
    vmem_cap = _vmem_budget_cap()
    fused_need = param_bytes + tile_bytes + act_bytes + (2 << 20)

    use_fused = (not force_layered) and fused_need <= int(0.8 * vmem_cap)

    if not use_fused:
        # ---- layered fallback: bounded weight VMEM per step, h stays bf16 ----
        h_dtype = jnp.bfloat16 if use_bf16 else out_dtype
        h = _linear_layer(x_p, weights[0], biases[0], apply_gelu=True,
                          gelu_approx=gelu_approx, out_dtype=h_dtype,
                          tb=tb, vmem_cap=vmem_cap)
        for i in range(num_blocks):
            h = _linear_layer(h, weights[1 + i], biases[1 + i], apply_gelu=True,
                              gelu_approx=gelu_approx, out_dtype=h_dtype,
                              tb=tb, vmem_cap=vmem_cap)
        y = _linear_layer(h, weights[-1], biases[-1], apply_gelu=False,
                          gelu_approx=gelu_approx, out_dtype=out_dtype,
                          tb=tb, vmem_cap=vmem_cap)
        return y[:B, :action]

    # ---- fused single-kernel path ----
    flat_params = []
    for w, b in zip(weights, biases):
        flat_params += [w, b]

    # x / out tiled along batch (auto double-buffered); weights/biases are
    # constant-index, single-buffered (double-buffering a constant block buys
    # nothing and doubles resident VMEM).
    x_spec = pl.BlockSpec((tb, obs), lambda i: (i, 0))
    out_spec = pl.BlockSpec((tb, a_pad), lambda i: (i, 0))
    param_specs = [pl.BlockSpec(p.shape, lambda i: (0, 0),
                                pipeline_mode=pl.Buffered(1))
                   for p in flat_params]

    io_bytes = int(x_p.size) * x_p.dtype.itemsize + Bp * a_pad * itemsize
    flops = 2 * Bp * (obs * hidden + num_blocks * hidden * hidden + hidden * a_pad)
    transcendentals = (1 + num_blocks) * Bp * hidden  # one erf/tanh per GELU element
    vmem_budget = int(min(max(fused_need, 32 << 20), vmem_cap))

    kernel = functools.partial(_mlp_fused_kernel, num_blocks, gelu_approx)

    out_padded = pl.pallas_call(
        kernel,
        out_shape=jax.ShapeDtypeStruct((Bp, a_pad), out_dtype),
        grid_spec=pltpu.PrefetchScalarGridSpec(
            num_scalar_prefetch=0,
            grid=(n_steps,),
            in_specs=[x_spec] + param_specs,
            out_specs=out_spec,
        ),
        compiler_params=pltpu.CompilerParams(
            dimension_semantics=("parallel",),
            vmem_limit_bytes=vmem_budget,
        ),
        cost_estimate=pl.CostEstimate(
            flops=flops,
            transcendentals=transcendentals,
            bytes_accessed=param_bytes + io_bytes,
        ),
    )(x_p, *flat_params)

    return out_padded[:B, :action]


# ----------------------------------------------------------------------------
# Params / reference
# ----------------------------------------------------------------------------
def _orthogonal(key, rows, cols, dtype=jnp.float32):
    """Deterministic orthogonal init (QR of a Gaussian, sign-corrected)."""
    big, small = max(rows, cols), min(rows, cols)
    a = jax.random.normal(key, (big, small), dtype=jnp.float32)
    q, r = jnp.linalg.qr(a)
    q = q * jnp.sign(jnp.diag(r))[None, :]
    if rows < cols:
        q = q.T
    return q[:rows, :cols].astype(dtype)


def init_params(key, obs_shape, action_shape, hidden_dim, num_blocks, dtype=jnp.float32):
    keys = jax.random.split(key, num_blocks + 2)
    return {
        "w_emb": _orthogonal(keys[0], obs_shape, hidden_dim, dtype),
        "b_emb": jnp.zeros((hidden_dim,), dtype),
        "w_blocks": [
            _orthogonal(keys[1 + i], hidden_dim, hidden_dim, dtype)
            for i in range(num_blocks)
        ],
        "b_blocks": [jnp.zeros((hidden_dim,), dtype) for _ in range(num_blocks)],
        "w_out": _orthogonal(keys[num_blocks + 1], hidden_dim, action_shape, dtype),
        "b_out": jnp.zeros((action_shape,), dtype),
    }


def reference_forward(x, params, *, use_bf16=True, gelu_approx=False):
    """Pure-JAX reference of MLPModel.forward (eval mode), bf16-matmul matched."""
    w_dtype = jnp.bfloat16 if use_bf16 else x.dtype

    def dot(a, w):
        return jnp.dot(a.astype(w_dtype), w.astype(w_dtype),
                       preferred_element_type=jnp.float32)

    h = dot(x, params["w_emb"]) + params["b_emb"]
    h = _gelu(h, gelu_approx)
    for w, b in zip(params["w_blocks"], params["b_blocks"]):
        h = dot(h, w) + b
        h = _gelu(h, gelu_approx)
    return dot(h, params["w_out"]) + params["b_out"]


if __name__ == "__main__":
    # Small shapes consistent with the module's forward: x is (batch, obs_shape).
    # batch=256 with tb=128 -> a 2-step, evenly-split "parallel" grid.
    batch = 256
    obs_shape = 16
    hidden_dim = 128
    num_blocks = 4
    action_shape = 8

    key = jax.random.PRNGKey(0)
    k_x, k_p = jax.random.split(key)
    x = jax.random.normal(k_x, (batch, obs_shape), dtype=jnp.float32)
    params = init_params(k_p, obs_shape, action_shape, hidden_dim, num_blocks)

    ref = reference_forward(x, params)

    # Fast path: fused single-kernel, VMEM-resident single-buffered weights.
    out = jax.block_until_ready(mlp_forward(x, params, num_blocks=num_blocks))
    assert out.shape == (batch, action_shape)
    assert jnp.allclose(out, ref, atol=2e-2, rtol=2e-2), "fused path mismatch vs JAX reference"

    # Fallback path (large-hidden / v7x-VMEM case): per-layer, N-tiled weights.
    out_l = jax.block_until_ready(
        mlp_forward(x, params, num_blocks=num_blocks, force_layered=True))
    assert out_l.shape == (batch, action_shape)
    assert jnp.allclose(out_l, ref, atol=2e-2, rtol=2e-2), "layered path mismatch vs JAX reference"

    print("KERNEL_OK")
</pallas_src>

<mosaic_0001>
module attributes {stable_mosaic.version = 11 : i64} {
  func.func @_mlp_fused_kernel(%arg0: i32, %arg1: memref<128x16xf32, #tpu.memory_space<vmem>>, %arg2: memref<16x128xbf16, #tpu.memory_space<vmem>>, %arg3: memref<1x128xf32, #tpu.memory_space<vmem>>, %arg4: memref<128x128xbf16, #tpu.memory_space<vmem>>, %arg5: memref<1x128xf32, #tpu.memory_space<vmem>>, %arg6: memref<128x128xbf16, #tpu.memory_space<vmem>>, %arg7: memref<1x128xf32, #tpu.memory_space<vmem>>, %arg8: memref<128x128xbf16, #tpu.memory_space<vmem>>, %arg9: memref<1x128xf32, #tpu.memory_space<vmem>>, %arg10: memref<128x128xbf16, #tpu.memory_space<vmem>>, %arg11: memref<1x128xf32, #tpu.memory_space<vmem>>, %arg12: memref<128x128xbf16, #tpu.memory_space<vmem>>, %arg13: memref<1x128xf32, #tpu.memory_space<vmem>>, %arg14: memref<128x128xf32, #tpu.memory_space<vmem>>) attributes {dimension_semantics = [#tpu.dimension_semantics<parallel>], iteration_bounds = array<i64: 2>, scalar_prefetch = 0 : i64, scratch_operands = 0 : i64, tpu.core_type = #tpu.core_type<tc>, window_params = [{transform_indices = @transform_0, window_bounds = array<i64: 128, 16>}, {pipeline_mode = #tpu.pipeline_mode<synchronous>, transform_indices = @transform_1, window_bounds = array<i64: 16, 128>}, {pipeline_mode = #tpu.pipeline_mode<synchronous>, transform_indices = @transform_2, window_bounds = array<i64: 1, 128>}, {pipeline_mode = #tpu.pipeline_mode<synchronous>, transform_indices = @transform_3, window_bounds = array<i64: 128, 128>}, {pipeline_mode = #tpu.pipeline_mode<synchronous>, transform_indices = @transform_4, window_bounds = array<i64: 1, 128>}, {pipeline_mode = #tpu.pipeline_mode<synchronous>, transform_indices = @transform_5, window_bounds = array<i64: 128, 128>}, {pipeline_mode = #tpu.pipeline_mode<synchronous>, transform_indices = @transform_6, window_bounds = array<i64: 1, 128>}, {pipeline_mode = #tpu.pipeline_mode<synchronous>, transform_indices = @transform_7, window_bounds = array<i64: 128, 128>}, {pipeline_mode = #tpu.pipeline_mode<synchronous>, transform_indices = @transform_8, window_bounds = array<i64: 1, 128>}, {pipeline_mode = #tpu.pipeline_mode<synchronous>, transform_indices = @transform_9, window_bounds = array<i64: 128, 128>}, {pipeline_mode = #tpu.pipeline_mode<synchronous>, transform_indices = @transform_10, window_bounds = array<i64: 1, 128>}, {pipeline_mode = #tpu.pipeline_mode<synchronous>, transform_indices = @transform_11, window_bounds = array<i64: 128, 128>}, {pipeline_mode = #tpu.pipeline_mode<synchronous>, transform_indices = @transform_12, window_bounds = array<i64: 1, 128>}, {transform_indices = @transform_13, window_bounds = array<i64: 128, 128>}]} {
    %c0 = arith.constant 0 : index
    %c0_0 = arith.constant 0 : index
    %0 = vector.load %arg1[%c0, %c0_0] : memref<128x16xf32, #tpu.memory_space<vmem>>, vector<128x16xf32>
    %1 = arith.truncf %0 : vector<128x16xf32> to vector<128x16xbf16>
    %c0_1 = arith.constant 0 : index
    %c0_2 = arith.constant 0 : index
    %2 = vector.load %arg2[%c0_1, %c0_2] : memref<16x128xbf16, #tpu.memory_space<vmem>>, vector<16x128xbf16>
    %cst = arith.constant dense<0.000000e+00> : vector<128x128xf32>
    %3 = tpu.matmul %1, %2, %cst {dimension_numbers = #tpu.dot_dimension_numbers<[1], [0], [0], [1], [0, 0, 1, 1], [], []>} : vector<128x16xbf16>, vector<16x128xbf16>, vector<128x128xf32> -> vector<128x128xf32>
    %c0_3 = arith.constant 0 : index
    %c0_4 = arith.constant 0 : index
    %4 = vector.load %arg3[%c0_3, %c0_4] : memref<1x128xf32, #tpu.memory_space<vmem>>, vector<1x128xf32>
    %5 = vector.broadcast %4 : vector<1x128xf32> to vector<128x128xf32>
    %6 = arith.addf %3, %5 : vector<128x128xf32>
    %cst_5 = arith.constant 5.000000e-01 : f32
    %7 = vector.broadcast %cst_5 : f32 to vector<128x128xf32>
    %8 = arith.mulf %7, %6 : vector<128x128xf32>
    %cst_6 = arith.constant 0.707106769 : f32
    %9 = vector.broadcast %cst_6 : f32 to vector<128x128xf32>
    %10 = arith.mulf %6, %9 : vector<128x128xf32>
    %11 = math.erf %10 : vector<128x128xf32>
    %cst_7 = arith.constant 1.000000e+00 : f32
    %12 = vector.broadcast %cst_7 : f32 to vector<128x128xf32>
    %13 = arith.addf %12, %11 : vector<128x128xf32>
    %14 = arith.mulf %8, %13 : vector<128x128xf32>
    %15 = arith.truncf %14 : vector<128x128xf32> to vector<128x128xbf16>
    %c0_8 = arith.constant 0 : index
    %c0_9 = arith.constant 0 : index
    %16 = vector.load %arg4[%c0_8, %c0_9] : memref<128x128xbf16, #tpu.memory_space<vmem>>, vector<128x128xbf16>
    %cst_10 = arith.constant dense<0.000000e+00> : vector<128x128xf32>
    %17 = tpu.matmul %15, %16, %cst_10 {dimension_numbers = #tpu.dot_dimension_numbers<[1], [0], [0], [1], [0, 0, 1, 1], [], []>} : vector<128x128xbf16>, vector<128x128xbf16>, vector<128x128xf32> -> vector<128x128xf32>
    %c0_11 = arith.constant 0 : index
    %c0_12 = arith.constant 0 : index
    %18 = vector.load %arg5[%c0_11, %c0_12] : memref<1x128xf32, #tpu.memory_space<vmem>>, vector<1x128xf32>
    %19 = vector.broadcast %18 : vector<1x128xf32> to vector<128x128xf32>
    %20 = arith.addf %17, %19 : vector<128x128xf32>
    %cst_13 = arith.constant 5.000000e-01 : f32
    %21 = vector.broadcast %cst_13 : f32 to vector<128x128xf32>
    %22 = arith.mulf %21, %20 : vector<128x128xf32>
    %cst_14 = arith.constant 0.707106769 : f32
    %23 = vector.broadcast %cst_14 : f32 to vector<128x128xf32>
    %24 = arith.mulf %20, %23 : vector<128x128xf32>
    %25 = math.erf %24 : vector<128x128xf32>
    %cst_15 = arith.constant 1.000000e+00 : f32
    %26 = vector.broadcast %cst_15 : f32 to vector<128x128xf32>
    %27 = arith.addf %26, %25 : vector<128x128xf32>
    %28 = arith.mulf %22, %27 : vector<128x128xf32>
    %29 = arith.truncf %28 : vector<128x128xf32> to vector<128x128xbf16>
    %c0_16 = arith.constant 0 : index
    %c0_17 = arith.constant 0 : index
    %30 = vector.load %arg6[%c0_16, %c0_17] : memref<128x128xbf16, #tpu.memory_space<vmem>>, vector<128x128xbf16>
    %cst_18 = arith.constant dense<0.000000e+00> : vector<128x128xf32>
    %31 = tpu.matmul %29, %30, %cst_18 {dimension_numbers = #tpu.dot_dimension_numbers<[1], [0], [0], [1], [0, 0, 1, 1], [], []>} : vector<128x128xbf16>, vector<128x128xbf16>, vector<128x128xf32> -> vector<128x128xf32>
    %c0_19 = arith.constant 0 : index
    %c0_20 = arith.constant 0 : index
    %32 = vector.load %arg7[%c0_19, %c0_20] : memref<1x128xf32, #tpu.memory_space<vmem>>, vector<1x128xf32>
    %33 = vector.broadcast %32 : vector<1x128xf32> to vector<128x128xf32>
    %34 = arith.addf %31, %33 : vector<128x128xf32>
    %cst_21 = arith.constant 5.000000e-01 : f32
    %35 = vector.broadcast %cst_21 : f32 to vector<128x128xf32>
    %36 = arith.mulf %35, %34 : vector<128x128xf32>
    %cst_22 = arith.constant 0.707106769 : f32
    %37 = vector.broadcast %cst_22 : f32 to vector<128x128xf32>
    %38 = arith.mulf %34, %37 : vector<128x128xf32>
    %39 = math.erf %38 : vector<128x128xf32>
    %cst_23 = arith.constant 1.000000e+00 : f32
    %40 = vector.broadcast %cst_23 : f32 to vector<128x128xf32>
    %41 = arith.addf %40, %39 : vector<128x128xf32>
    %42 = arith.mulf %36, %41 : vector<128x128xf32>
    %43 = arith.truncf %42 : vector<128x128xf32> to vector<128x128xbf16>
    %c0_24 = arith.constant 0 : index
    %c0_25 = arith.constant 0 : index
    %44 = vector.load %arg8[%c0_24, %c0_25] : memref<128x128xbf16, #tpu.memory_space<vmem>>, vector<128x128xbf16>
    %cst_26 = arith.constant dense<0.000000e+00> : vector<128x128xf32>
    %45 = tpu.matmul %43, %44, %cst_26 {dimension_numbers = #tpu.dot_dimension_numbers<[1], [0], [0], [1], [0, 0, 1, 1], [], []>} : vector<128x128xbf16>, vector<128x128xbf16>, vector<128x128xf32> -> vector<128x128xf32>
    %c0_27 = arith.constant 0 : index
    %c0_28 = arith.constant 0 : index
    %46 = vector.load %arg9[%c0_27, %c0_28] : memref<1x128xf32, #tpu.memory_space<vmem>>, vector<1x128xf32>
    %47 = vector.broadcast %46 : vector<1x128xf32> to vector<128x128xf32>
    %48 = arith.addf %45, %47 : vector<128x128xf32>
    %cst_29 = arith.constant 5.000000e-01 : f32
    %49 = vector.broadcast %cst_29 : f32 to vector<128x128xf32>
    %50 = arith.mulf %49, %48 : vector<128x128xf32>
    %cst_30 = arith.constant 0.707106769 : f32
    %51 = vector.broadcast %cst_30 : f32 to vector<128x128xf32>
    %52 = arith.mulf %48, %51 : vector<128x128xf32>
    %53 = math.erf %52 : vector<128x128xf32>
    %cst_31 = arith.constant 1.000000e+00 : f32
    %54 = vector.broadcast %cst_31 : f32 to vector<128x128xf32>
    %55 = arith.addf %54, %53 : vector<128x128xf32>
    %56 = arith.mulf %50, %55 : vector<128x128xf32>
    %57 = arith.truncf %56 : vector<128x128xf32> to vector<128x128xbf16>
    %c0_32 = arith.constant 0 : index
    %c0_33 = arith.constant 0 : index
    %58 = vector.load %arg10[%c0_32, %c0_33] : memref<128x128xbf16, #tpu.memory_space<vmem>>, vector<128x128xbf16>
    %cst_34 = arith.constant dense<0.000000e+00> : vector<128x128xf32>
    %59 = tpu.matmul %57, %58, %cst_34 {dimension_numbers = #tpu.dot_dimension_numbers<[1], [0], [0], [1], [0, 0, 1, 1], [], []>} : vector<128x128xbf16>, vector<128x128xbf16>, vector<128x128xf32> -> vector<128x128xf32>
    %c0_35 = arith.constant 0 : index
    %c0_36 = arith.constant 0 : index
    %60 = vector.load %arg11[%c0_35, %c0_36] : memref<1x128xf32, #tpu.memory_space<vmem>>, vector<1x128xf32>
    %61 = vector.broadcast %60 : vector<1x128xf32> to vector<128x128xf32>
    %62 = arith.addf %59, %61 : vector<128x128xf32>
    %cst_37 = arith.constant 5.000000e-01 : f32
    %63 = vector.broadcast %cst_37 : f32 to vector<128x128xf32>
    %64 = arith.mulf %63, %62 : vector<128x128xf32>
    %cst_38 = arith.constant 0.707106769 : f32
    %65 = vector.broadcast %cst_38 : f32 to vector<128x128xf32>
    %66 = arith.mulf %62, %65 : vector<128x128xf32>
    %67 = math.erf %66 : vector<128x128xf32>
    %cst_39 = arith.constant 1.000000e+00 : f32
    %68 = vector.broadcast %cst_39 : f32 to vector<128x128xf32>
    %69 = arith.addf %68, %67 : vector<128x128xf32>
    %70 = arith.mulf %64, %69 : vector<128x128xf32>
    %71 = arith.truncf %70 : vector<128x128xf32> to vector<128x128xbf16>
    %c0_40 = arith.constant 0 : index
    %c0_41 = arith.constant 0 : index
    %72 = vector.load %arg12[%c0_40, %c0_41] : memref<128x128xbf16, #tpu.memory_space<vmem>>, vector<128x128xbf16>
    %cst_42 = arith.constant dense<0.000000e+00> : vector<128x128xf32>
    %73 = tpu.matmul %71, %72, %cst_42 {dimension_numbers = #tpu.dot_dimension_numbers<[1], [0], [0], [1], [0, 0, 1, 1], [], []>} : vector<128x128xbf16>, vector<128x128xbf16>, vector<128x128xf32> -> vector<128x128xf32>
    %c0_43 = arith.constant 0 : index
    %c0_44 = arith.constant 0 : index
    %74 = vector.load %arg13[%c0_43, %c0_44] : memref<1x128xf32, #tpu.memory_space<vmem>>, vector<1x128xf32>
    %75 = vector.broadcast %74 : vector<1x128xf32> to vector<128x128xf32>
    %76 = arith.addf %73, %75 : vector<128x128xf32>
    %c0_45 = arith.constant 0 : index
    %c0_46 = arith.constant 0 : index
    %77 = vector.load %arg14[%c0_45, %c0_46] : memref<128x128xf32, #tpu.memory_space<vmem>>, vector<128x128xf32>
    tpu.vector_store %arg14[%c0_45, %c0_46], %76 {strides = array<i32>} : memref<128x128xf32, #tpu.memory_space<vmem>>, vector<128x128xf32>,
    return
  }
  func.func @transform_0(%arg0: i32) -> (i32, i32) {
    %c0_i32 = arith.constant 0 : i32
    %c0_i32_0 = arith.constant 0 : i32
    return %arg0, %c0_i32 : i32, i32
  }
  func.func @transform_1(%arg0: i32) -> (i32, i32) {
    %c0_i32 = arith.constant 0 : i32
    %c0_i32_0 = arith.constant 0 : i32
    %c0_i32_1 = arith.constant 0 : i32
    return %c0_i32, %c0_i32_0 : i32, i32
  }
  func.func @transform_2(%arg0: i32) -> (i32, i32) {
    %c0_i32 = arith.constant 0 : i32
    %c0_i32_0 = arith.constant 0 : i32
    %c0_i32_1 = arith.constant 0 : i32
    return %c0_i32, %c0_i32_0 : i32, i32
  }
  func.func @transform_3(%arg0: i32) -> (i32, i32) {
    %c0_i32 = arith.constant 0 : i32
    %c0_i32_0 = arith.constant 0 : i32
    %c0_i32_1 = arith.constant 0 : i32
    return %c0_i32, %c0_i32_0 : i32, i32
  }
  func.func @transform_4(%arg0: i32) -> (i32, i32) {
    %c0_i32 = arith.constant 0 : i32
    %c0_i32_0 = arith.constant 0 : i32
    %c0_i32_1 = arith.constant 0 : i32
    return %c0_i32, %c0_i32_0 : i32, i32
  }
  func.func @transform_5(%arg0: i32) -> (i32, i32) {
    %c0_i32 = arith.constant 0 : i32
    %c0_i32_0 = arith.constant 0 : i32
    %c0_i32_1 = arith.constant 0 : i32
    return %c0_i32, %c0_i32_0 : i32, i32
  }
  func.func @transform_6(%arg0: i32) -> (i32, i32) {
    %c0_i32 = arith.constant 0 : i32
    %c0_i32_0 = arith.constant 0 : i32
    %c0_i32_1 = arith.constant 0 : i32
    return %c0_i32, %c0_i32_0 : i32, i32
  }
  func.func @transform_7(%arg0: i32) -> (i32, i32) {
    %c0_i32 = arith.constant 0 : i32
    %c0_i32_0 = arith.constant 0 : i32
    %c0_i32_1 = arith.constant 0 : i32
    return %c0_i32, %c0_i32_0 : i32, i32
  }
  func.func @transform_8(%arg0: i32) -> (i32, i32) {
    %c0_i32 = arith.constant 0 : i32
    %c0_i32_0 = arith.constant 0 : i32
    %c0_i32_1 = arith.constant 0 : i32
    return %c0_i32, %c0_i32_0 : i32, i32
  }
  func.func @transform_9(%arg0: i32) -> (i32, i32) {
    %c0_i32 = arith.constant 0 : i32
    %c0_i32_0 = arith.constant 0 : i32
    %c0_i32_1 = arith.constant 0 : i32
    return %c0_i32, %c0_i32_0 : i32, i32
  }
  func.func @transform_10(%arg0: i32) -> (i32, i32) {
    %c0_i32 = arith.constant 0 : i32
    %c0_i32_0 = arith.constant 0 : i32
    %c0_i32_1 = arith.constant 0 : i32
    return %c0_i32, %c0_i32_0 : i32, i32
  }
  func.func @transform_11(%arg0: i32) -> (i32, i32) {
    %c0_i32 = arith.constant 0 : i32
    %c0_i32_0 = arith.constant 0 : i32
    %c0_i32_1 = arith.constant 0 : i32
    return %c0_i32, %c0_i32_0 : i32, i32
  }
  func.func @transform_12(%arg0: i32) -> (i32, i32) {
    %c0_i32 = arith.constant 0 : i32
    %c0_i32_0 = arith.constant 0 : i32
    %c0_i32_1 = arith.constant 0 : i32
    return %c0_i32, %c0_i32_0 : i32, i32
  }
  func.func @transform_13(%arg0: i32) -> (i32, i32) {
    %c0_i32 = arith.constant 0 : i32
    %c0_i32_0 = arith.constant 0 : i32
    return %arg0, %c0_i32 : i32, i32
  }
}

</mosaic_0001>

<bundles_post_ra>
// kernel: tpu_custom_call.1
= control target key start
LH: loop header
LB: loop body
LE: loop exit
PB: predicated region body
PF: predicated region fallthrough
CT: control target
= control target key end

     0   :  { %s8646_s0 = inlined_call_operand.vmem [shape: f32[256,16], index: 0, kind: input, shape index: {}]   ;;  %s8647_s1 = inlined_call_operand.vmem [shape: bf16[16,128], index: 1, kind: input, shape index: {}]   ;;  %s8648_s2 = inlined_call_operand.vmem [shape: f32[1,128], index: 2, kind: input, shape index: {}]   ;;  %s8649_s3 = inlined_call_operand.vmem [shape: bf16[128,128], index: 3, kind: input, shape index: {}]   ;;  %s8650_s4 = inlined_call_operand.vmem [shape: f32[1,128], index: 4, kind: input, shape index: {}]   ;;  %s8651_s5 = inlined_call_operand.vmem [shape: bf16[128,128], index: 5, kind: input, shape index: {}]   ;;  %s8652_s6 = inlined_call_operand.vmem [shape: f32[1,128], index: 6, kind: input, shape index: {}]   ;;  %s8653_s7 = inlined_call_operand.vmem [shape: bf16[128,128], index: 7, kind: input, shape index: {}]   ;;  %s8654_s8 = inlined_call_operand.vmem [shape: f32[1,128], index: 8, kind: input, shape index: {}]   ;;  %s8655_s9 = inlined_call_operand.vmem [shape: bf16[128,128], index: 9, kind: input, shape index: {}]   ;;  %s8656_s10 = inlined_call_operand.vmem [shape: f32[1,128], index: 10, kind: input, shape index: {}]   ;;  %s8657_s11 = inlined_call_operand.hbm [shape: bf16[128,128], index: 11, kind: input, shape index: {}]   ;;  %s8658_s12 = inlined_call_operand.vmem [shape: f32[1,128], index: 12, kind: input, shape index: {}]   ;;  %s8659_s13 = inlined_call_operand.hbm [shape: f32[256,128], index: 13, kind: output, shape index: {}]  }
   0x1   :  { %8673 = sst [smem:[#allocation20_spill]] %s8657_s11 }
   0x2   :  { %18 = vsyncpa [#allocation3], 0 }
   0x3   :  { %19 = vsyncpa [#allocation4], 0 }
   0x4   :  { %21 = vsyncpa [#allocation4 + $0x1], 0  ;;  %s5541_s25 = smov 0   ;;  %s5543_s26 = smov 0  }
   0x5   :  { %s5545_s27 = smov 0   ;;  %s5547_s28 = smov 0  }
   0x6 LB: > { %8674 = sst [smem:[#allocation8_spill]] %s5460_s27  ;;  %s5562_s29 = sadd.s32 4294967295, %s5464_s28   ;;  %s5464_s28 = sphi %s5547_s28, %s8785_s28   ;;  %s5460_s27 = sphi %s5545_s27, %s8782_s27   ;;  %s5456_s26 = sphi %s5543_s26, %s8784_s26   ;;  %s5452_s25 = sphi %s5541_s25, %s8783_s25  }
   0x7   : > { %s4821_s30 = sadd.s32 4294967294, %s5464_s28   ;;  %s5566_s14 = sadd.s32 1, %s5464_s28  }
   0x8   : > { %s312_s15 = sadd.s32 1, %s5460_s27  ;;  %s309_s16 = ssub.s32 %s5464_s28, %s5566_s14 }
   0x9   : > { %p322_p0 = scmp.ne.s32.totalorder %s5460_s27, %s5456_s26  ;;  %p310_p1 = scmp.eq.s32.totalorder %s309_s16, 0 }
   0xa   : > { %p323_p2 = scmp.eq.s32.totalorder %s5562_s29, 1  ;;  %p328_p3 = scmp.ne.s32.totalorder %s5456_s26, %s5452_s25 }
   0xb   : > { %p329_p4 = scmp.eq.s32.totalorder %s4821_s30, 1  ;;  %p4822_p7 = scmp.ge.s32.totalorder %s5464_s28, 1 }
   0xc   : > { %s5577_s17 = scalar_select %p310_p1, %s5460_s27, %s312_s15  }
   0xd   : > { %p5579_p5 = por %p323_p2, %p322_p0  ;;  %p5583_p6 = por %p329_p4, %p328_p3 }
   0xe   : > { %8675 = sst [smem:[#allocation9_spill]] %s5577_s17  ;;  %p336_p8 = scmp.lt.s32.totalorder %s5464_s28, 3 }
   0xf   : > { %p5160_p9 = scmp.eq.s32.totalorder %s5562_s29, 0  ;;  %s8678_s11 = sld [smem:[#allocation20_spill]] }
  0x10   : > { %p337_p10 = pnand %p4822_p7, %p336_p8  ;;  %s5466_s23 = smov [#allocation2]  }
  0x11   : > { %s379_s24 = sshll.u32 %s5466_s23, 4  ;;  %s5467_s30 = smov 64   ;;  %s380_s24 = int_to_ptr.vmem [resolvable:$true] %s379_s24 }
  0x12   : > { %p5152_p11 = pneg %p337_p10  ;;  %s5468_s15 = smov 4  }
  0x13   : > { %407 = sbr.rel (%p337_p10) target bundleno = 1411 (0x583), region = 72 }
  0x14   : > { %p5153_p12 = pnand %p5160_p9, %p5152_p11 }
  0x15   : > { %s377_s22 = sshll.u32 %s8678_s11, 4  ;;  %s378_s22 = int_to_ptr.hbm [resolvable:$true] %s377_s22 }
  0x16   : > { %5155 = dma.hbm_to_vmem [thread:$0]  (!%p5153_p12), %s378_s22, 1024, %s380_s24, [#allocation3], %s5467_s30, %s5467_s30, %s5468_s15  }
  0x18   : > { %5443 = dma.done.wait (%p5160_p9), [#allocation3], 1024  }
  0x19   : > { %5445 = vsyncadd (%p5160_p9), [#allocation3], 4294966272  ;;  %s4828_s16 = sshll.u32 %s5562_s29, 4  ;;  %v5087_v0 = vld [vmem:[%s8647_s1] sm:$0xff]  ;;  %vm496_vm0 = vcmask 130048   ;;  %v5095_v39 = vld [vmem:[%s8649_s3 + $0x38] sm:$0xff] }
  0x1a   : > { %p453_p13 = scmp.lt.s32.totalorder %s4828_s16, 31  ;;  %528 = vmatpush.bf16.msra.mxu0 %v5087_v0  ;;  %5129 = vmatpush.bf16.msra.mxu3 %v5087_v0  ;;  %v5635_v25 = vld [vmem:[%s8648_s2] ss:$0 sm:$0xff]  ;;  %v5094_v47 = vld [vmem:[%s8649_s3 + $0x30] sm:$0xff]  ;;  %v5093_v57 = vld [vmem:[%s8649_s3 + $0x28] sm:$0xff]  ;;  %s449_s17 = sand.u32 1, %s5456_s26  }
  0x1b   : > { %1350 = vmatpush.bf16.msra.mxu1 %v5095_v39  ;;  %5130 = vmatpush.bf16.msra.mxu2 %v5095_v39  ;;  %s5128_s15 = sshll.u32 %s5562_s29, 7 }
  0x1c   : > { %s8787_s16 = smov (!%p453_p13, %s4828_s16), 31  ;;  %s4743_s21 = scalar_lea.hbm %s8659_s13, %s5128_s15 }
  0x1d   : > { %s4829_s20 = sshll.u32 %s8787_s16, 3  ;;  %s4746_s27 = sshll.u32 %s4743_s21, 4  ;;  %s4747_s27 = int_to_ptr.hbm [resolvable:$true] %s4746_s27 }
  0x1e   : > { %s5603_s11 = scalar_lea.vmem %s8646_s0, %s4829_s20  ;;  %5131 = vmatpush.bf16.msrb.mxu3 %v5095_v39  ;;  %s5412_s29 = sshra.s32 %s4747_s27, 4  ;;  %s5413_s29 = int_to_ptr.hbm [resolvable:$true] %s5412_s29 }
  0x1f   : > { %v460_v1 = vld [vmem:[%s5603_s11] sm:$0xff]  ;;  %v461_v2 = vld [vmem:[%s5603_s11 + $0x8] sm:$0xff]  ;;  %v470_v4 = vld [vmem:[%s5603_s11 + $0x50] sm:$0xff]  ;;  %1351 = vmatpush.bf16.msra.mxu1 %v5094_v47  ;;  %5132 = vmatpush.bf16.msra.mxu2 %v5094_v47  ;;  %s5414_s22 = scalar_lea.hbm %s5413_s29, 128  ;;  %s5418_s16 = scalar_lea.hbm %s8659_s13, 256 }
  0x20   : > { %v476_v3 = vpack.c.bf16 %v461_v2, %v460_v1  ;;  %v471_v5 = vld [vmem:[%s5603_s11 + $0x58] sm:$0xff]  ;;  %v462_v7 = vld [vmem:[%s5603_s11 + $0x10] sm:$0xff]  ;;  %v472_v9 = vld [vmem:[%s5603_s11 + $0x60] sm:$0xff]  ;;  %p5415_p0 = scmp.ne.s32.totalorder %s5413_s29, %s5414_s22  ;;  %p5419_p3 = scmp.lt.s32.totalorder %s5413_s29, %s8659_s13 }
  0x21   : > { %v481_v6 = vpack.c.bf16 %v471_v5, %v470_v4  ;;  %v463_v8 = vld [vmem:[%s5603_s11 + $0x18] sm:$0xff]  ;;  %v473_v10 = vld [vmem:[%s5603_s11 + $0x68] sm:$0xff]  ;;  %v464_v13 = vld [vmem:[%s5603_s11 + $0x20] sm:$0xff]  ;;  %p5420_p4 = scmp.lt.s32.totalorder %s5418_s16, %s5414_s22 }
  0x22   : > { %4834 = vmatmul.msk.bf16.vlgmr.msra.gmra.mxu0 %vm496_vm0, %v476_v3  ;;  %v477_v11 = vpack.c.bf16 %v463_v8, %v462_v7  ;;  %v482_v12 = vpack.c.bf16 %v473_v10, %v472_v9  ;;  %v465_v14 = vld [vmem:[%s5603_s11 + $0x28] sm:$0xff]  ;;  %v474_v15 = vld [vmem:[%s5603_s11 + $0x70] sm:$0xff]  ;;  %v475_v16 = vld [vmem:[%s5603_s11 + $0x78] sm:$0xff]  ;;  %5133 = vmatpush.bf16.msrb.mxu3 %v5094_v47  ;;  %p5416_p1 = pnand %p5415_p0, %p5579_p5 }
  0x23   : > { %4839 = vmatmul.msk.bf16.vlgmr.msra.gmra.mxu3 %vm496_vm0, %v481_v6  ;;  %v478_v17 = vpack.c.bf16 %v465_v14, %v464_v13  ;;  %v483_v18 = vpack.c.bf16 %v475_v16, %v474_v15  ;;  %v466_v19 = vld [vmem:[%s5603_s11 + $0x30] sm:$0xff]  ;;  %v467_v20 = vld [vmem:[%s5603_s11 + $0x38] sm:$0xff]  ;;  %v468_v22 = vld [vmem:[%s5603_s11 + $0x40] sm:$0xff]  ;;  %1352 = vmatpush.bf16.msra.mxu1 %v5093_v57  ;;  %p5421_p7 = por %p5420_p4, %p5419_p3 }
  0x24   : > { %v479_v21 = vpack.c.bf16 %v467_v20, %v466_v19  ;;  %v469_v23 = vld [vmem:[%s5603_s11 + $0x48] sm:$0xff]  ;;  %5134 = vmatpush.bf16.msra.mxu2 %v5093_v57  ;;  %v5092_v4 = vld [vmem:[%s8649_s3 + $0x20] sm:$0xff]  ;;  %v5091_v16 = vld [vmem:[%s8649_s3 + $0x18] sm:$0xff]  ;;  %s4827_s11 = sshll.u32 %s449_s17, 7  ;;  %p5417_p2 = pneg %p5416_p1 }
  0x25   : > { %v480_v24 = vpack.c.bf16 %v469_v23, %v468_v22  ;;  %s8564_s30 = scalar_lea.vmem [#allocation5], %s4827_s11  ;;  %s4732_s11 = scalar_lea.sflag [#allocation4], %s449_s17 }
  0x26   : > { %5135 = vmatpush.bf16.msrb.mxu3 %v5093_v57  ;;  %s4744_s23 = sshll.u32 %s8564_s30, 4  ;;  %p5422_p8 = pnand %p5421_p7, %p5417_p2  ;;  %s4745_s23 = int_to_ptr.vmem [resolvable:$true] %s4744_s23 }
  0x27   : > { %1353 = vmatpush.bf16.msra.mxu1 %v5092_v4 }
  0x28   : > { %5136 = vmatpush.bf16.msra.mxu2 %v5092_v4 }
  0x2a   : > { %5137 = vmatpush.bf16.msrb.mxu3 %v5092_v4 }
  0x2b   : > { %1354 = vmatpush.bf16.msra.mxu1 %v5091_v16 }
  0x2c   : > { %5138 = vmatpush.bf16.msra.mxu2 %v5091_v16 }
  0x2e   : > { %5139 = vmatpush.bf16.msrb.mxu3 %v5091_v16 }
  0x32   : > { %4835 = vmatmul.msk.bf16.gmra.mxu0 %vm496_vm0, %v477_v11 }
  0x33   : > { %4840 = vmatmul.msk.bf16.gmra.mxu3 %vm496_vm0, %v482_v12 }
  0x42   : > { %4836 = vmatmul.msk.bf16.gmra.mxu0 %vm496_vm0, %v478_v17 }
  0x43   : > { %4841 = vmatmul.msk.bf16.gmra.mxu3 %vm496_vm0, %v483_v18 }
  0x52   : > { %4837 = vmatmul.msk.bf16.gmra.mxu0 %vm496_vm0, %v479_v21 }
  0x62   : > { %4838 = vmatmul.msk.bf16.gmra.mxu0 %vm496_vm0, %v480_v24 }
  0x9f   : > { %v530_v26 = vpop.f32.mrf.mxu0 }
  0xa0   : > { %v531_v27 = vadd.f32 %v5635_v25, %v530_v26 }
  0xa2   : > { %v5638_v28 = vmul.f32 0.70710677, %v531_v27  ;;  %v5717_v14 = vmul.f32 0.5, %v531_v27 }
  0xa4   : > { %v602_v29 = vmul.f32 %v5638_v28, %v5638_v28 }
  0xa6   : > { %v555_v30 = vpop.f32.mrf.mxu3  ;;  %v5642_v31 = vmin.f32 %v602_v29, 16.0 }
  0xa7   : > { %v5645_v32 = vadd.f32 %v5635_v25, %v555_v30  ;;  %v532_v33 = vpop.f32.mrf.mxu0 }
  0xa8   : > { %v5648_v34 = vadd.f32 %v5635_v25, %v532_v33  ;;  %v604_v35 = vmul.f32 2.1237322e-06, %v5642_v31  ;;  %v615_v40 = vmul.f32 3.8918573e-05, %v5642_v31 }
  0xa9   : > { %8679 = vst [vmem:[#allocation10_spill] sm:$0xff] %v5645_v32  ;;  %v5652_v36 = vmul.f32 0.70710677, %v5645_v32 }
  0xaa   : > { %v5655_v37 = vmul.f32 0.70710677, %v5648_v34  ;;  %v605_v42 = vadd.f32 0.00028619796, %v604_v35  ;;  %v616_v48 = vadd.f32 0.001143296, %v615_v40 }
  0xab   : > { %8680 = vst [vmem:[#allocation11_spill] sm:$0xff] %v5652_v36  ;;  %v1002_v43 = vmul.f32 %v5652_v36, %v5652_v36  ;;  %v5090_v40 = vld [vmem:[%s8649_s3 + $0x10] sm:$0xff] }
  0xac   : > { %v642_v38 = vmul.f32 %v5655_v37, %v5655_v37  ;;  %v606_v52 = vmul.f32 %v605_v42, %v5642_v31  ;;  %v617_v58 = vmul.f32 %v616_v48, %v5642_v31  ;;  %v5747_v48 = vmul.f32 0.5, %v5648_v34  ;;  %1355 = vmatpush.bf16.msra.mxu1 %v5090_v40  ;;  %5141 = vmatpush.bf16.msrb.mxu3 %v5090_v40 }
  0xad   : > { %v5681_v53 = vmin.f32 %v1002_v43, 16.0  ;;  %5140 = vmatpush.bf16.msra.mxu2 %v5090_v40 }
  0xae   : > { %v557_v41 = vpop.f32.mrf.mxu3  ;;  %v5665_v44 = vmin.f32 %v642_v38, 16.0  ;;  %v607_v62 = vadd.f32 0.0036580483, %v606_v52  ;;  %v618_v5 = vadd.f32 0.014752088, %v617_v58 }
  0xaf   : > { %v5668_v45 = vadd.f32 %v5635_v25, %v557_v41  ;;  %v535_v46 = vpop.f32.mrf.mxu0  ;;  %v1004_v55 = vmul.f32 2.1237322e-06, %v5681_v53 }
  0xb0   : > { %v644_v49 = vmul.f32 2.1237322e-06, %v5665_v44  ;;  %v5678_v51 = vadd.f32 %v5635_v25, %v535_v46  ;;  %v608_v10 = vmul.f32 %v607_v62, %v5642_v31  ;;  %v619_v17 = vmul.f32 %v618_v5, %v5642_v31  ;;  %v5089_v62 = vld [vmem:[%s8649_s3 + $0x8] sm:$0xff] }
  0xb1   : > { %8681 = vst [vmem:[#allocation12_spill] sm:$0xff] %v5668_v45  ;;  %v5675_v50 = vmul.f32 0.70710677, %v5668_v45  ;;  %v1005_v2 = vadd.f32 0.00028619796, %v1004_v55  ;;  %1356 = vmatpush.bf16.msra.mxu1 %v5089_v62  ;;  %5143 = vmatpush.bf16.msrb.mxu3 %v5089_v62 }
  0xb2   : > { %v5684_v54 = vmul.f32 0.70710677, %v5678_v51  ;;  %v645_v59 = vadd.f32 0.00028619796, %v644_v49  ;;  %v609_v23 = vadd.f32 0.05243302, %v608_v10  ;;  %5142 = vmatpush.bf16.msra.mxu2 %v5089_v62 }
  0xb3   : > { %8682 = vst [vmem:[#allocation13_spill] sm:$0xff] %v5675_v50  ;;  %v1042_v56 = vmul.f32 %v5675_v50, %v5675_v50  ;;  %v1006_v18 = vmul.f32 %v1005_v2, %v5681_v53  ;;  %v620_v41 = vadd.f32 0.112945676, %v619_v17  ;;  %v5758_v34 = vmul.f32 0.5, %v5678_v51 }
  0xb4   : > { %v682_v60 = vmul.f32 %v5684_v54, %v5684_v54  ;;  %v646_v6 = vmul.f32 %v645_v59, %v5665_v44 }
  0xb5   : > { %v5700_v3 = vmin.f32 %v1042_v56, 16.0  ;;  %v1007_v42 = vadd.f32 0.0036580483, %v1006_v18  ;;  %v610_v56 = vmul.f32 %v609_v23, %v5642_v31 }
  0xb6   : > { %v560_v61 = vpop.f32.mrf.mxu3  ;;  %v5698_v0 = vmin.f32 %v682_v60, 16.0  ;;  %v647_v19 = vadd.f32 0.0036580483, %v646_v6 }
  0xb7   : > { %v5696_v63 = vadd.f32 %v5635_v25, %v560_v61  ;;  %v537_v1 = vpop.f32.mrf.mxu0  ;;  %v1044_v11 = vmul.f32 2.1237322e-06, %v5700_v3  ;;  %v1008_v2 = vmul.f32 %v1007_v42, %v5681_v53 }
  0xb8   : > { %v684_v7 = vmul.f32 2.1237322e-06, %v5698_v0  ;;  %v5711_v9 = vadd.f32 %v5635_v25, %v537_v1  ;;  %v648_v43 = vmul.f32 %v647_v19, %v5665_v44  ;;  %v621_v1 = vmul.f32 %v620_v41, %v5642_v31 }
  0xb9   : > { %v5708_v8 = vmul.f32 0.70710677, %v5696_v63  ;;  %v1045_v24 = vadd.f32 0.00028619796, %v1044_v11  ;;  %v1009_v23 = vadd.f32 0.05243302, %v1008_v2 }
  0xba   : > { %v685_v12 = vadd.f32 0.00028619796, %v684_v7  ;;  %v5720_v15 = vmul.f32 0.70710677, %v5711_v9  ;;  %v649_v4 = vadd.f32 0.05243302, %v648_v43 }
  0xbb   : > { %v1082_v13 = vmul.f32 %v5708_v8, %v5708_v8  ;;  %v1046_v49 = vmul.f32 %v1045_v24, %v5700_v3  ;;  %v5088_v43 = vld [vmem:[%s8649_s3] sm:$0xff] }
  0xbc   : > { %v686_v20 = vmul.f32 %v685_v12, %v5698_v0  ;;  %v722_v26 = vmul.f32 %v5720_v15, %v5720_v15  ;;  %v611_v12 = vadd.f32 0.18741608, %v610_v56  ;;  %1357 = vmatpush.bf16.msra.mxu1 %v5088_v43  ;;  %5145 = vmatpush.bf16.msrb.mxu3 %v5088_v43 }
  0xbd   : > { %v5728_v21 = vmin.f32 %v1082_v13, 16.0  ;;  %v1047_v7 = vadd.f32 0.0036580483, %v1046_v49  ;;  %5144 = vmatpush.bf16.msra.mxu2 %v5088_v43 }
  0xbe   : > { %v562_v22 = vpop.f32.mrf.mxu3  ;;  %v687_v29 = vadd.f32 0.0036580483, %v686_v20  ;;  %v5737_v38 = vmin.f32 %v722_v26, 16.0 }
  0xbf   : > { %v5733_v27 = vadd.f32 %v5635_v25, %v562_v22  ;;  %v1084_v30 = vmul.f32 2.1237322e-06, %v5728_v21  ;;  %v1095_v33 = vmul.f32 3.8918573e-05, %v5728_v21  ;;  %v540_v35 = vpop.f32.mrf.mxu0  ;;  %v1048_v40 = vmul.f32 %v1047_v7, %v5700_v3 }
  0xc0   : > { %v724_v52 = vmul.f32 2.1237322e-06, %v5737_v38  ;;  %v688_v57 = vmul.f32 %v687_v29, %v5698_v0  ;;  %v5773_v26 = vadd.f32 %v5635_v25, %v540_v35 }
  0xc1   : > { %v5740_v39 = vmul.f32 0.70710677, %v5733_v27  ;;  %v1085_v46 = vadd.f32 0.00028619796, %v1084_v30  ;;  %v1096_v47 = vadd.f32 0.001143296, %v1095_v33  ;;  %v650_v33 = vmul.f32 %v649_v4, %v5665_v44 }
  0xc2   : > { %v725_v60 = vadd.f32 0.00028619796, %v724_v52  ;;  %v689_v13 = vadd.f32 0.05243302, %v688_v57  ;;  %v622_v30 = vadd.f32 0.4994258, %v621_v1 }
  0xc3   : > { %v1122_v55 = vmul.f32 %v5740_v39, %v5740_v39  ;;  %v1086_v58 = vmul.f32 %v1085_v46, %v5728_v21  ;;  %v1097_v59 = vmul.f32 %v1096_v47, %v5728_v21  ;;  %v612_v46 = vmul.f32 %v611_v12, %v5642_v31 }
  0xc4   : > { %v726_v10 = vmul.f32 %v725_v60, %v5737_v38  ;;  %v690_v35 = vmul.f32 %v689_v13, %v5698_v0  ;;  %v5788_v52 = vmul.f32 0.5, %v5696_v63  ;;  %v5794_v60 = vmul.f32 0.70710677, %v5773_v26 }
  0xc5   : > { %v5760_v61 = vmin.f32 %v1122_v55, 16.0  ;;  %v1087_v5 = vadd.f32 0.0036580483, %v1086_v58  ;;  %v1098_v6 = vadd.f32 0.014752088, %v1097_v59  ;;  %v1010_v58 = vmul.f32 %v1009_v23, %v5681_v53 }
  0xc6   : > { %v727_v19 = vadd.f32 0.0036580483, %v726_v10  ;;  %v565_v29 = vpop.f32.mrf.mxu3  ;;  %v651_v1 = vadd.f32 0.18741608, %v650_v33  ;;  %v1049_v63 = vadd.f32 0.05243302, %v1048_v40  ;;  %v762_v10 = vmul.f32 %v5794_v60, %v5794_v60 }
  0xc7   : > { %v1124_v51 = vmul.f32 2.1237322e-06, %v5760_v61  ;;  %v1135_v11 = vmul.f32 3.8918573e-05, %v5760_v61  ;;  %v1088_v16 = vmul.f32 %v1087_v5, %v5728_v21  ;;  %v1099_v17 = vmul.f32 %v1098_v6, %v5728_v21  ;;  %v542_v18 = vpop.f32.mrf.mxu0 }
  0xc8   : > { %v5779_v42 = vadd.f32 %v5635_v25, %v565_v29  ;;  %v728_v55 = vmul.f32 %v727_v19, %v5737_v38  ;;  %v5797_v62 = vadd.f32 %v5635_v25, %v542_v18  ;;  %v691_v5 = vadd.f32 0.18741608, %v690_v35 }
  0xc9   : > { %v1125_v20 = vadd.f32 0.00028619796, %v1124_v51  ;;  %v1136_v22 = vadd.f32 0.001143296, %v1135_v11  ;;  %v1100_v24 = vadd.f32 0.112945676, %v1099_v17  ;;  %v652_v23 = vmul.f32 %v651_v1, %v5665_v44 }
  0xca   : > { %v1089_v47 = vadd.f32 0.05243302, %v1088_v16  ;;  %v5801_v4 = vmul.f32 0.70710677, %v5779_v42  ;;  %v729_v11 = vadd.f32 0.05243302, %v728_v55  ;;  %v692_v40 = vmul.f32 %v691_v5, %v5698_v0 }
  0xcb   : > { %v1137_v41 = vmul.f32 %v1136_v22, %v5760_v61  ;;  %v1101_v49 = vmul.f32 %v1100_v24, %v5728_v21  ;;  %v1126_v56 = vmul.f32 %v1125_v20, %v5760_v61  ;;  %v5811_v18 = vmin.f32 %v762_v10, 16.0 }
  0xcc   : > { %v1090_v6 = vmul.f32 %v1089_v47, %v5728_v21  ;;  %v1162_v16 = vmul.f32 %v5801_v4, %v5801_v4  ;;  %v5814_v19 = vmul.f32 0.70710677, %v5797_v62  ;;  %v623_v20 = vmul.f32 %v622_v30, %v5642_v31 }
  0xcd   : > { %v1138_v57 = vadd.f32 0.014752088, %v1137_v41  ;;  %v1102_v59 = vadd.f32 0.4994258, %v1101_v49  ;;  %v1127_v12 = vadd.f32 0.0036580483, %v1126_v56  ;;  %v1050_v24 = vmul.f32 %v1049_v63, %v5700_v3 }
  0xce   : > { %v613_v22 = vadd.f32 1.1283791, %v612_v46  ;;  %v5820_v33 = vadd.f32 0.18741608, %v1010_v58  ;;  %v5825_v41 = vmul.f32 0.5, %v5711_v9  ;;  %v730_v35 = vmul.f32 %v729_v11, %v5737_v38 }
  0xcf   : > { %v1139_v2 = vmul.f32 %v1138_v57, %v5760_v61  ;;  %v1103_v7 = vmul.f32 %v1102_v59, %v5728_v21  ;;  %v545_v51 = vpop.f32.mrf.mxu0  ;;  %v1091_v43 = vadd.f32 0.18741608, %v1090_v6  ;;  %v1128_v31 = vmul.f32 %v1127_v12, %v5760_v61  ;;  %v567_v59 = vpop.f32.mrf.mxu3 }
  0xd0   : > { %8683 = vst [vmem:[#allocation14_spill] sm:$0xff] %v5820_v33  ;;  %v5829_v30 = vmin.f32 %v1162_v16, 16.0  ;;  %v764_v47 = vmul.f32 2.1237322e-06, %v5811_v18  ;;  %v802_v49 = vmul.f32 %v5814_v19, %v5814_v19  ;;  %v5834_v55 = vadd.f32 1.0, %v623_v20 }
  0xd1   : > { %v1140_v13 = vadd.f32 0.112945676, %v1139_v2  ;;  %v5809_v17 = vadd.f32 1.0, %v1103_v7  ;;  %v5837_v56 = vmul.f32 %v613_v22, %v5638_v28  ;;  %v653_v9 = vadd.f32 1.1283791, %v652_v23 }
  0xd2   : > { %v5839_v57 = vadd.f32 0.18741608, %v1050_v24  ;;  %v1164_v58 = vmul.f32 2.1237322e-06, %v5829_v30  ;;  %v5842_v1 = vadd.f32 1.1283791, %v692_v40  ;;  %v1092_v6 = vmul.f32 %v1091_v43, %v5728_v21 }
  0xd3   : > { %v1141_v29 = vmul.f32 %v1140_v13, %v5760_v61  ;;  %5206 = vrcp.f32 %v5809_v17  ;;  %v765_v2 = vadd.f32 0.00028619796, %v764_v47  ;;  %v5845_v5 = vmin.f32 %v802_v49, 16.0 }
  0xd4   : > { %8684 = vst [vmem:[#allocation15_spill] sm:$0xff] %v5839_v57  ;;  %v731_v7 = vadd.f32 0.18741608, %v730_v35  ;;  %v1129_v10 = vadd.f32 0.05243302, %v1128_v31  ;;  %v5853_v22 = vadd.f32 %v5635_v25, %v567_v59  ;;  %vm1110_vm1 = vweird.f32 %v5809_v17 }
  0xd5   : > { %v1142_v46 = vadd.f32 0.4994258, %v1141_v29  ;;  %v1165_v11 = vadd.f32 0.00028619796, %v1164_v58  ;;  %v766_v16 = vmul.f32 %v765_v2, %v5811_v18  ;;  %v804_v20 = vmul.f32 2.1237322e-06, %v5845_v5 }
  0xd6   : > { %v5859_v24 = vadd.f32 %v5635_v25, %v545_v51  ;;  %v1114_v29 = vand.u32 2147483647, %v5809_v17  ;;  %v1116_v40 = vand.u32 2147483648, %v5809_v17  ;;  %v5868_v47 = vmul.f32 %v653_v9, %v5655_v37 }
  0xd7   : > { %v1143_v63 = vmul.f32 %v1142_v46, %v5760_v61  ;;  %v547_v28 = vpop.f32.mrf.mxu0  ;;  %v1166_v21 = vmul.f32 %v1165_v11, %v5829_v30  ;;  %v767_v31 = vadd.f32 0.0036580483, %v766_v16  ;;  %v1093_v49 = vadd.f32 1.1283791, %v1092_v6 }
  0xd8   : > { %v5865_v43 = vadd.f32 %v5635_v25, %v547_v28  ;;  %v805_v58 = vadd.f32 0.00028619796, %v804_v20  ;;  %v5871_v51 = vmul.f32 0.70710677, %v5853_v22  ;;  %v5876_v11 = vmul.f32 0.70710677, %v5859_v24 }
  0xd9   : > { %v5207_v12 = vpop.eup %5206  ;;  %v5848_v13 = vadd.f32 1.0, %v1143_v63  ;;  %v1167_v46 = vadd.f32 0.0036580483, %v1166_v21  ;;  %v768_v63 = vmul.f32 %v767_v31, %v5811_v18  ;;  %v1117_v37 = vor.u32 1.1754944e-38, %v1116_v40 }
  0xda   : > { %v1106_v23 = vmul.f32 %v5207_v12, %v5809_v17  ;;  %vm1111_vm2 = vweird.f32 %v5207_v12  ;;  %v1130_v9 = vmul.f32 %v1129_v10, %v5760_v61  ;;  %v806_v6 = vmul.f32 %v805_v58, %v5845_v5 }
  0xdb   : > { %5208 = vrcp.f32 %v5848_v13  ;;  %v1168_v2 = vmul.f32 %v1167_v46, %v5829_v30  ;;  %vm5880_vm3 = vmor %vm1110_vm1, %vm1111_vm2  ;;  %v1202_v16 = vmul.f32 %v5871_v51, %v5871_v51  ;;  %vm1115_vm4 = vcmp.eq.f32.partialorder %v1114_v29, 8.507059e+37 }
  0xdc   : > { %v1107_v35 = vsub.f32 1.0, %v1106_v23  ;;  %v842_v23 = vmul.f32 %v5876_v11, %v5876_v11  ;;  %v5891_v21 = vmul.f32 0.70710677, %v5865_v43  ;;  %v769_v40 = vadd.f32 0.05243302, %v768_v63 }
  0xdd   : > { %v807_v10 = vadd.f32 0.0036580483, %v806_v6  ;;  %v5898_v31 = vmin.f32 %v1202_v16, 16.0  ;;  %v1094_v46 = vmul.f32 %v1093_v49, %v5708_v8  ;;  %v1131_v32 = vadd.f32 0.18741608, %v1130_v9 }
  0xde   : > { %v1108_v59 = vmul.f32 %v5207_v12, %v1107_v35  ;;  %v5896_v35 = vmul.f32 0.5, %v5773_v26  ;;  %v732_v63 = vmul.f32 %v731_v7, %v5737_v38  ;;  %v5908_v16 = vmin.f32 %v842_v23, 16.0 }
  0xdf   : > { %v808_v50 = vmul.f32 %v807_v10, %v5845_v5  ;;  %v1204_v26 = vmul.f32 2.1237322e-06, %v5898_v31  ;;  %v882_v8 = vmul.f32 %v5891_v21, %v5891_v21  ;;  %5210 = vrcp.f32 %v5834_v55  ;;  %v550_v7 = vpop.f32.mrf.mxu0 }
  0xe0   : > { %v1109_v20 = vadd.f32 %v5207_v12, %v1108_v59  ;;  %v1169_v59 = vadd.f32 0.05243302, %v1168_v2  ;;  %v1132_v23 = vmul.f32 %v1131_v32, %v5760_v61  ;;  %vm1150_vm5 = vweird.f32 %v5848_v13 }
  0xe1   : > { %v5893_v17 = vpop.eup %5208  ;;  %v809_v49 = vadd.f32 0.05243302, %v808_v50  ;;  %v1205_v28 = vadd.f32 0.00028619796, %v1204_v26  ;;  %v1154_v10 = vand.u32 2147483647, %v5848_v13  ;;  %v5930_v32 = vadd.f32 %v5635_v25, %v550_v7 }
  0xe2   : > { %v1113_v29 = vsel %vm5880_vm3, %v5207_v12, %v1109_v20  ;;  %v1146_v58 = vmul.f32 %v5893_v17, %v5848_v13  ;;  %v770_v12 = vmul.f32 %v769_v40, %v5811_v18  ;;  %v1170_v9 = vmul.f32 %v1169_v59, %v5829_v30 }
  0xe3   : > { %v1118_v45 = vsel %vm1115_vm4, %v1117_v37, %v1113_v29  ;;  %v844_v20 = vmul.f32 2.1237322e-06, %v5908_v16  ;;  %v810_v40 = vmul.f32 %v809_v49, %v5845_v5  ;;  %vm1151_vm6 = vweird.f32 %v5893_v17  ;;  %8687 = vst [vmem:[#allocation16_spill] sm:$0xff] %v5930_v32 }
  0xe4   : > { %v1147_v6 = vsub.f32 1.0, %v1146_v58  ;;  %v1119_v2 = vmul.f32 %v1118_v45, %v1094_v46  ;;  %v1206_v50 = vmul.f32 %v1205_v28, %v5898_v31  ;;  %v5923_v46 = vmin.f32 %v882_v8, 16.0  ;;  %vm5943_vm7 = vmor %vm1150_vm5, %vm1151_vm6 }
  0xe5   : > { %v845_v45 = vadd.f32 0.00028619796, %v844_v20  ;;  %v5926_v29 = vmul.f32 0.5, %v5733_v27  ;;  %v1156_v58 = vand.u32 2147483648, %v5848_v13  ;;  %v771_v59 = vadd.f32 0.18741608, %v770_v12  ;;  %v5937_v28 = vpop.eup %5210 }
  0xe6   : > { %v1148_v37 = vmul.f32 %v5893_v17, %v1147_v6  ;;  %v5934_v61 = vmul.f32 %v5842_v1, %v5684_v54  ;;  %v4854_v26 = vclamps-f32 %v1119_v2, 1.0  ;;  %v1171_v49 = vadd.f32 0.18741608, %v1170_v9 }
  0xe7   : > { %v733_v8 = vadd.f32 1.1283791, %v732_v63  ;;  %v1133_v20 = vadd.f32 1.1283791, %v1132_v23  ;;  %v811_v12 = vadd.f32 0.18741608, %v810_v40  ;;  %v846_v54 = vmul.f32 %v845_v45, %v5908_v16 }
  0xe8   : > { %v1149_v6 = vadd.f32 %v5893_v17, %v1148_v37  ;;  %vm5948_vm8 = vcmp.eq.f32.partialorder %v1154_v10, 8.507059e+37  ;;  %v5953_v2 = vmul.f32 0.5, %v5797_v62  ;;  %v1207_v63 = vadd.f32 0.0036580483, %v1206_v50 }
  0xe9   : > { %v884_v37 = vmul.f32 2.1237322e-06, %v5923_v46  ;;  %v1157_v9 = vor.u32 1.1754944e-38, %v1156_v58  ;;  %v772_v13 = vmul.f32 %v771_v59, %v5811_v18  ;;  %v5958_v7 = vmul.f32 0.70710677, %v5930_v32 }
  0xea   : > { %v626_v23 = vmul.f32 %v5937_v28, %v5834_v55  ;;  %v1254_v40 = vadd.f32 1.0, %v4854_v26  ;;  %v1153_v10 = vsel %vm5943_vm7, %v5893_v17, %v1149_v6  ;;  %v1172_v62 = vmul.f32 %v1171_v49, %v5829_v30 }
  0xeb   : > { %v885_v45 = vadd.f32 0.00028619796, %v884_v37  ;;  %v812_v50 = vmul.f32 %v811_v12, %v5845_v5  ;;  %v847_v36 = vadd.f32 0.0036580483, %v846_v54  ;;  %v922_v58 = vmul.f32 %v5958_v7, %v5958_v7 }
  0xec   : > { %v627_v59 = vsub.f32 1.0, %v626_v23  ;;  %v5970_v32 = vmul.f32 %v733_v8, %v5720_v15  ;;  %v1134_v57 = vmul.f32 %v1133_v20, %v5740_v39  ;;  %v5974_v26 = vmul.f32 0.5, %v5779_v42 }
  0xed   : > { %v1208_v17 = vmul.f32 %v1207_v63, %v5898_v31  ;;  %v1158_v6 = vsel %vm5948_vm8, %v1157_v9, %v1153_v10  ;;  %v5980_v49 = vmul.f32 0.5, %v5853_v22  ;;  %v886_v27 = vmul.f32 %v885_v45, %v5923_v46 }
  0xee   : > { %v628_v12 = vmul.f32 %v5937_v28, %v627_v59  ;;  %v773_v54 = vadd.f32 1.1283791, %v772_v13  ;;  %v1173_v15 = vadd.f32 1.1283791, %v1172_v62  ;;  %v5985_v8 = vmul.f32 0.5, %v5859_v24 }
  0xef   : > { %v5987_v39 = vmin.f32 %v922_v58, 16.0  ;;  %v5990_v42 = vmul.f32 %v1254_v40, %v5788_v52  ;;  %v5992_v20 = vadd.f32 1.1283791, %v812_v50  ;;  %v848_v1 = vmul.f32 %v847_v36, %v5908_v16 }
  0xf0   : > { %8692 = vst [vmem:[#allocation17_spill] sm:$0xff] %v5985_v8  ;;  %vm630_vm9 = vweird.f32 %v5834_v55  ;;  %v1159_v22 = vmul.f32 %v1158_v6, %v1134_v57  ;;  %v1209_v63 = vadd.f32 0.05243302, %v1208_v17  ;;  %v655_v37 = vmul.f32 3.8918573e-05, %v5665_v44 }
  0xf1   : > { %v695_v9 = vmul.f32 3.8918573e-05, %v5698_v0  ;;  %v887_v13 = vadd.f32 0.0036580483, %v886_v27  ;;  %v629_v24 = vadd.f32 %v5937_v28, %v628_v12  ;;  %vm631_vm10 = vweird.f32 %v5937_v28 }
  0xf2   : > { %v735_v52 = vmul.f32 3.8918573e-05, %v5737_v38  ;;  %v6002_v23 = vmul.f32 %v773_v54, %v5794_v60  ;;  %v924_v36 = vmul.f32 2.1237322e-06, %v5987_v39  ;;  %v636_v40 = vand.u32 2147483648, %v5834_v55  ;;  %vm6013_vm11 = vmor %vm630_vm9, %vm631_vm10 }
  0xf3   : > { %v656_v57 = vadd.f32 0.001143296, %v655_v37  ;;  %v6007_v10 = vmul.f32 %v1173_v15, %v5801_v4  ;;  %v849_v62 = vadd.f32 0.05243302, %v848_v1  ;;  %v634_v45 = vand.u32 2147483647, %v5834_v55 }
  0xf4   : > { %v696_v50 = vadd.f32 0.001143296, %v695_v9  ;;  %v4855_v58 = vclamps-f32 %v1159_v22, 1.0  ;;  %v1210_v59 = vmul.f32 %v1209_v63, %v5898_v31  ;;  %v736_v6 = vadd.f32 0.001143296, %v735_v52 }
  0xf5   : > { %v657_v17 = vmul.f32 %v656_v57, %v5665_v44  ;;  %v888_v27 = vmul.f32 %v887_v13, %v5923_v46  ;;  %v633_v4 = vsel %vm6013_vm11, %v5937_v28, %v629_v24  ;;  %v775_v54 = vmul.f32 3.8918573e-05, %v5811_v18 }
  0xf6   : > { %v697_v12 = vmul.f32 %v696_v50, %v5698_v0  ;;  %v925_v15 = vadd.f32 0.00028619796, %v924_v36  ;;  %v637_v1 = vor.u32 1.1754944e-38, %v636_v40  ;;  %v737_v22 = vmul.f32 %v736_v6, %v5737_v38 }
  0xf7   : > { %v658_v55 = vadd.f32 0.014752088, %v657_v17  ;;  %v850_v63 = vmul.f32 %v849_v62, %v5908_v16  ;;  %vm635_vm12 = vcmp.eq.f32.partialorder %v634_v45, 8.507059e+37  ;;  %v776_v9 = vadd.f32 0.001143296, %v775_v54 }
  0xf8   : > { %v698_v37 = vadd.f32 0.014752088, %v697_v12  ;;  %v638_v52 = vsel %vm635_vm12, %v637_v1, %v633_v4  ;;  %v738_v57 = vadd.f32 0.014752088, %v737_v22  ;;  %v815_v28 = vmul.f32 3.8918573e-05, %v5845_v5 }
  0xf9   : > { %v659_v13 = vmul.f32 %v658_v55, %v5665_v44  ;;  %v1255_v24 = vadd.f32 1.0, %v4855_v58  ;;  %v889_v50 = vadd.f32 0.05243302, %v888_v27  ;;  %v777_v36 = vmul.f32 %v776_v9, %v5811_v18 }
  0xfa   : > { %v699_v60 = vmul.f32 %v698_v37, %v5698_v0  ;;  %v926_v40 = vmul.f32 %v925_v15, %v5987_v39  ;;  %v739_v62 = vmul.f32 %v738_v57, %v5737_v38  ;;  %v816_v45 = vadd.f32 0.001143296, %v815_v28  ;;  %v552_v28 = vpop.f32.mrf.mxu0 }
  0xfb   : > { %v660_v17 = vadd.f32 0.112945676, %v659_v13  ;;  %v1211_v6 = vadd.f32 0.18741608, %v1210_v59  ;;  %v639_v4 = vmul.f32 %v638_v52, %v5837_v56  ;;  %v778_v54 = vadd.f32 0.014752088, %v777_v36 }
  0xfc   : > { %v700_v12 = vadd.f32 0.112945676, %v699_v60  ;;  %v851_v1 = vadd.f32 0.18741608, %v850_v63  ;;  %v740_v58 = vadd.f32 0.112945676, %v739_v62  ;;  %v817_v27 = vmul.f32 %v816_v45, %v5845_v5 }
  0xfd   : > { %v661_v55 = vmul.f32 %v660_v17, %v5665_v44  ;;  %v890_v22 = vmul.f32 %v889_v50, %v5923_v46  ;;  %v779_v15 = vmul.f32 %v778_v54, %v5811_v18  ;;  %v1175_v9 = vmul.f32 3.8918573e-05, %v5829_v30 }
  0xfe   : > { %v701_v37 = vmul.f32 %v700_v12, %v5698_v0  ;;  %v927_v13 = vadd.f32 0.0036580483, %v926_v40  ;;  %v741_v56 = vmul.f32 %v740_v58, %v5737_v38  ;;  %v818_v52 = vadd.f32 0.014752088, %v817_v27 }
  0xff   : > { %v662_v59 = vadd.f32 0.4994258, %v661_v55  ;;  %v1212_v63 = vmul.f32 %v1211_v6, %v5898_v31  ;;  %v4842_v57 = vclamps-f32 %v639_v4, 1.0  ;;  %v780_v36 = vadd.f32 0.112945676, %v779_v15 }
 0x100   : > { %v702_v60 = vadd.f32 0.4994258, %v701_v37  ;;  %v6043_v50 = vadd.f32 %v5635_v25, %v552_v28  ;;  %v742_v62 = vadd.f32 0.4994258, %v741_v56  ;;  %v819_v45 = vmul.f32 %v818_v52, %v5845_v5 }
 0x101   : > { %v663_v17 = vmul.f32 %v662_v59, %v5665_v44  ;;  %v891_v12 = vadd.f32 0.18741608, %v890_v22  ;;  %v781_v54 = vmul.f32 %v780_v36, %v5811_v18  ;;  %v1176_v55 = vadd.f32 0.001143296, %v1175_v9 }
 0x102   : > { %8695 = vst [vmem:[#allocation18_spill] sm:$0xff] %v6043_v50  ;;  %v703_v40 = vmul.f32 %v702_v60, %v5698_v0  ;;  %v852_v6 = vmul.f32 %v851_v1, %v5908_v16  ;;  %v6052_v58 = vmul.f32 0.70710677, %v6043_v50  ;;  %v743_v44 = vmul.f32 %v742_v62, %v5737_v38 }
 0x103   : > { %v6049_v4 = vadd.f32 1.0, %v663_v17  ;;  %v6057_v25 = vmul.f32 %v5992_v20, %v5814_v19  ;;  %v782_v22 = vadd.f32 0.4994258, %v781_v54  ;;  %v820_v0 = vadd.f32 0.112945676, %v819_v45 }
 0x104   : > { %8696 = vst [vmem:[#allocation19_spill] sm:$0xff] %v6052_v58  ;;  %v6059_v27 = vadd.f32 1.0, %v703_v40  ;;  %v6061_v37 = vadd.f32 1.1283791, %v1212_v63  ;;  %v928_v15 = vmul.f32 %v927_v13, %v5987_v39  ;;  %v1242_v1 = vadd.f32 1.0, %v4842_v57 }
 0x105   : > { %5212 = vrcp.f32 %v6049_v4  ;;  %v892_v9 = vmul.f32 %v891_v12, %v5923_v46  ;;  %v962_v38 = vmul.f32 %v6052_v58, %v6052_v58  ;;  %v1177_v19 = vmul.f32 %v1176_v55, %v5829_v30 }
 0x106   : > { %5214 = vrcp.f32 %v6059_v27  ;;  %v1271_v20 = vmul.f32 %v1255_v24, %v5926_v29  ;;  %v6071_v59 = vadd.f32 1.1283791, %v852_v6  ;;  %v674_v56 = vand.u32 2147483647, %v6049_v4 }
 0x107   : > { %v6074_v52 = vadd.f32 1.0, %v743_v44  ;;  %v676_v13 = vand.u32 2147483648, %v6049_v4  ;;  %v6077_v63 = vmin.f32 %v962_v38, 16.0  ;;  %v783_v57 = vmul.f32 %v782_v22, %v5811_v18 }
 0x108   : > { %v821_v28 = vmul.f32 %v820_v0, %v5845_v5  ;;  %v6081_v60 = vadd.f32 0.05243302, %v928_v15  ;;  %v6084_v36 = vmul.f32 %v1242_v1, %v5717_v14  ;;  %v714_v29 = vand.u32 2147483647, %v6059_v27 }
 0x109   : > { %5216 = vrcp.f32 %v6074_v52  ;;  %v6088_v24 = vadd.f32 1.1283791, %v892_v9  ;;  %v716_v17 = vand.u32 2147483648, %v6059_v27  ;;  %v6091_v62 = vadd.f32 1.0, %v783_v57 }
 0x10a   : > { %v1178_v45 = vadd.f32 0.014752088, %v1177_v19  ;;  %vm670_vm13 = vweird.f32 %v6049_v4  ;;  %v964_v18 = vmul.f32 2.1237322e-06, %v6077_v63  ;;  %v822_v40 = vadd.f32 0.4994258, %v821_v28 }
 0x10b   : > { %v5213_v12 = vpop.eup %5212  ;;  %v1215_v14 = vmul.f32 3.8918573e-05, %v5898_v31  ;;  %vm6097_vm14 = vcmp.eq.f32.partialorder %v674_v56, 8.507059e+37  ;;  %v677_v44 = vor.u32 1.1754944e-38, %v676_v13  ;;  %vm710_vm15 = vweird.f32 %v6059_v27 }
 0x10c   : > { %v5215_v54 = vpop.eup %5214  ;;  %v666_v55 = vmul.f32 %v5213_v12, %v6049_v4  ;;  %vm6103_vm0 = vcmp.eq.f32.partialorder %v714_v29, 8.507059e+37  ;;  %v754_v15 = vand.u32 2147483647, %v6074_v52  ;;  %5218 = vrcp.f32 %v6091_v62 }
 0x10d   : > { %v706_v22 = vmul.f32 %v5215_v54, %v6059_v27  ;;  %v717_v9 = vor.u32 1.1754944e-38, %v716_v17  ;;  %v756_v38 = vand.u32 2147483648, %v6074_v52  ;;  %v1179_v19 = vmul.f32 %v1178_v45, %v5829_v30 }
 0x10e   : > { %v667_v1 = vsub.f32 1.0, %v666_v55  ;;  %v965_v13 = vadd.f32 0.00028619796, %v964_v18  ;;  %v823_v28 = vmul.f32 %v822_v40, %v5845_v5  ;;  %v1216_v50 = vadd.f32 0.001143296, %v1215_v14 }
 0x10f   : > { %v5217_v56 = vpop.eup %5216  ;;  %v707_v57 = vsub.f32 1.0, %v706_v22  ;;  %vm671_vm1 = vweird.f32 %v5213_v12  ;;  %vm750_vm2 = vweird.f32 %v6074_v52  ;;  %vm711_vm3 = vweird.f32 %v5215_v54 }
 0x110   : > { %v668_v29 = vmul.f32 %v5213_v12, %v667_v1  ;;  %v746_v33 = vmul.f32 %v5217_v56, %v6074_v52  ;;  %vm6114_vm4 = vcmp.eq.f32.partialorder %v754_v15, 8.507059e+37  ;;  %v1280_v45 = vpack.c.bf16 %v1271_v20, %v5990_v42  ;;  %vm672_vm5 = vmor %vm670_vm13, %vm671_vm1 }
 0x111   : > { %v708_v58 = vmul.f32 %v5215_v54, %v707_v57  ;;  %v757_v22 = vor.u32 1.1754944e-38, %v756_v38  ;;  %v6119_v8 = vadd.f32 1.0, %v823_v28  ;;  %v966_v40 = vmul.f32 %v965_v13, %v6077_v63  ;;  %vm712_vm6 = vmor %vm710_vm15, %vm711_vm3 }
 0x112   : > { %v669_v55 = vadd.f32 %v5213_v12, %v668_v29  ;;  %v747_v18 = vsub.f32 1.0, %v746_v33  ;;  %v5219_v5 = vpop.eup %5218  ;;  %1388 = vmatmul.bf16.vlgmr.msrb.gmra.mxu3 %v1280_v45  ;;  %v1180_v1 = vadd.f32 0.112945676, %v1179_v19  ;;  %v1217_v15 = vmul.f32 %v1216_v50, %v5898_v31 }
 0x113   : > { %v709_v14 = vadd.f32 %v5215_v54, %v708_v58  ;;  %vm751_vm7 = vweird.f32 %v5217_v56  ;;  %v786_v42 = vmul.f32 %v5219_v5, %v6091_v62  ;;  %v794_v38 = vand.u32 2147483647, %v6091_v62 }
 0x114   : > { %v673_v57 = vsel %vm672_vm5, %v5213_v12, %v669_v55  ;;  %v748_v33 = vmul.f32 %v5217_v56, %v747_v18  ;;  %5220 = vrcp.f32 %v6119_v8  ;;  %v796_v27 = vand.u32 2147483648, %v6091_v62  ;;  %vm752_vm8 = vmor %vm750_vm2, %vm751_vm7 }
 0x115   : > { %v678_v4 = vsel %vm6097_vm14, %v677_v44, %v673_v57  ;;  %v713_v20 = vsel %vm712_vm6, %v5215_v54, %v709_v14  ;;  %v787_v6 = vsub.f32 1.0, %v786_v42  ;;  %v1181_v54 = vmul.f32 %v1180_v1, %v5829_v30 }
 0x116   : > { %v679_v58 = vmul.f32 %v678_v4, %v5868_v47  ;;  %v718_v50 = vsel %vm6103_vm0, %v717_v9, %v713_v20  ;;  %v749_v12 = vadd.f32 %v5217_v56, %v748_v33  ;;  %v1218_v44 = vadd.f32 0.014752088, %v1217_v15 }
 0x117   : > { %v719_v19 = vmul.f32 %v718_v50, %v5934_v61  ;;  %vm790_vm9 = vweird.f32 %v6091_v62  ;;  %v855_v47 = vmul.f32 3.8918573e-05, %v5908_v16  ;;  %v6143_v0 = vadd.f32 0.0036580483, %v966_v40 }
 0x118   : > { %v4843_v13 = vclamps-f32 %v679_v58, 1.0  ;;  %v753_v28 = vsel %vm752_vm8, %v5217_v56, %v749_v12  ;;  %v788_v29 = vmul.f32 %v5219_v5, %v787_v6  ;;  %vm791_vm10 = vweird.f32 %v5219_v5 }
 0x119   : > { %v758_v9 = vsel %vm6114_vm4, %v757_v22, %v753_v28  ;;  %v4844_v52 = vclamps-f32 %v719_v19, 1.0  ;;  %vm6148_vm11 = vcmp.eq.f32.partialorder %v794_v38, 8.507059e+37  ;;  %v797_v14 = vor.u32 1.1754944e-38, %v796_v27  ;;  %vm792_vm12 = vmor %vm790_vm9, %vm791_vm10 }
 0x11a   : > { %v1243_v61 = vadd.f32 1.0, %v4843_v13  ;;  %v759_v45 = vmul.f32 %v758_v9, %v5970_v32  ;;  %v5221_v56 = vpop.eup %5220  ;;  %v789_v18 = vadd.f32 %v5219_v5, %v788_v29  ;;  %v1182_v1 = vadd.f32 0.4994258, %v1181_v54 }
 0x11b   : > { %v1219_v40 = vmul.f32 %v1218_v44, %v5898_v31  ;;  %v826_v22 = vmul.f32 %v5221_v56, %v6119_v8  ;;  %v856_v57 = vadd.f32 0.001143296, %v855_v47  ;;  %v834_v33 = vand.u32 2147483647, %v6119_v8 }
 0x11c   : > { %v1259_v15 = vmul.f32 %v1243_v61, %v5747_v48  ;;  %v4845_v17 = vclamps-f32 %v759_v45, 1.0  ;;  %v793_v32 = vsel %vm792_vm12, %v5219_v5, %v789_v18  ;;  %v836_v42 = vand.u32 2147483648, %v6119_v8 }
 0x11d   : > { %v1183_v4 = vmul.f32 %v1182_v1, %v5829_v30  ;;  %v1244_v38 = vadd.f32 1.0, %v4844_v52  ;;  %v798_v48 = vsel %vm6148_vm11, %v797_v14, %v793_v32  ;;  %v827_v50 = vsub.f32 1.0, %v826_v22 }
 0x11e   : > { %v1274_v20 = vpack.c.bf16 %v1259_v15, %v6084_v36  ;;  %v1245_v58 = vadd.f32 1.0, %v4845_v17  ;;  %v799_v62 = vmul.f32 %v798_v48, %v6002_v23  ;;  %v1220_v27 = vadd.f32 0.112945676, %v1219_v40 }
 0x11f   : > { %v1184_v12 = vadd.f32 1.0, %v1183_v4  ;;  %v857_v19 = vmul.f32 %v856_v57, %v5908_v16  ;;  %v895_v30 = vmul.f32 3.8918573e-05, %v5923_v46  ;;  %v935_v36 = vmul.f32 3.8918573e-05, %v5987_v39 }
 0x120   : > { %1358 = vmatmul.bf16.vlgmr.msra.gmra.mxu1 %v1274_v20  ;;  %v6165_v5 = vmul.f32 %v1245_v58, %v5825_v41  ;;  %v828_v6 = vmul.f32 %v5221_v56, %v827_v50  ;;  %vm830_vm13 = vweird.f32 %v6119_v8  ;;  %vm831_vm14 = vweird.f32 %v5221_v56 }
 0x121   : > { %5222 = vrcp.f32 %v1184_v12  ;;  %v1260_v23 = vmul.f32 %v1244_v38, %v5758_v34  ;;  %vm6172_vm15 = vcmp.eq.f32.partialorder %v834_v33, 8.507059e+37  ;;  %v837_v44 = vor.u32 1.1754944e-38, %v836_v42  ;;  %vm832_vm0 = vmor %vm830_vm13, %vm831_vm14 }
 0x122   : > { %v1221_v41 = vmul.f32 %v1220_v27, %v5898_v31  ;;  %v4846_v13 = vclamps-f32 %v799_v62, 1.0  ;;  %v829_v28 = vadd.f32 %v5221_v56, %v828_v6  ;;  %v858_v47 = vadd.f32 0.014752088, %v857_v19 }
 0x123   : > { %v896_v9 = vadd.f32 0.001143296, %v895_v30  ;;  %v1275_v29 = vpack.c.bf16 %v6165_v5, %v1260_v23  ;;  %vm1190_vm1 = vweird.f32 %v1184_v12  ;;  %v936_v61 = vadd.f32 0.001143296, %v935_v36 }
 0x124   : > { %v1222_v8 = vadd.f32 0.4994258, %v1221_v41  ;;  %v833_v52 = vsel %vm832_vm0, %v5221_v56, %v829_v28  ;;  %v1194_v45 = vand.u32 2147483647, %v1184_v12  ;;  %v859_v34 = vmul.f32 %v858_v47, %v5908_v16 }
 0x125   : > { %v897_v55 = vmul.f32 %v896_v9, %v5923_v46  ;;  %v838_v18 = vsel %vm6172_vm15, %v837_v44, %v833_v52  ;;  %v937_v1 = vmul.f32 %v936_v61, %v5987_v39  ;;  %v975_v40 = vmul.f32 3.8918573e-05, %v6077_v63 }
 0x126   : > { %v1223_v14 = vmul.f32 %v1222_v8, %v5898_v31  ;;  %v839_v17 = vmul.f32 %v838_v18, %v6057_v25  ;;  %v1196_v22 = vand.u32 2147483648, %v1184_v12  ;;  %v860_v57 = vadd.f32 0.112945676, %v859_v34 }
 0x127   : > { %v5223_v15 = vpop.eup %5222  ;;  %v898_v56 = vadd.f32 0.014752088, %v897_v55  ;;  %v1246_v32 = vadd.f32 1.0, %v4846_v13  ;;  %v938_v4 = vadd.f32 0.014752088, %v937_v1  ;;  %vm6192_vm3 = vcmp.eq.f32.partialorder %v1194_v45, 8.507059e+37 }
 0x128   : > { %v1186_v33 = vmul.f32 %v5223_v15, %v1184_v12  ;;  %v6186_v42 = vadd.f32 1.0, %v1223_v14  ;;  %v4847_v20 = vclamps-f32 %v839_v17, 1.0  ;;  %v861_v38 = vmul.f32 %v860_v57, %v5908_v16 }
 0x129   : > { %v899_v31 = vmul.f32 %v898_v56, %v5923_v46  ;;  %v976_v58 = vadd.f32 0.001143296, %v975_v40  ;;  %vm1191_vm2 = vweird.f32 %v5223_v15  ;;  %v1015_v25 = vmul.f32 3.8918573e-05, %v5681_v53 }
 0x12a   : > { %v1187_v48 = vsub.f32 1.0, %v1186_v33  ;;  %5224 = vrcp.f32 %v6186_v42  ;;  %v1247_v62 = vadd.f32 1.0, %v4847_v20  ;;  %v862_v27 = vadd.f32 0.4994258, %v861_v38  ;;  %vm6201_vm4 = vmor %vm1190_vm1, %vm1191_vm2 }
 0x12b   : > { %v900_v5 = vadd.f32 0.112945676, %v899_v31  ;;  %v1197_v30 = vor.u32 1.1754944e-38, %v1196_v22  ;;  %v939_v36 = vmul.f32 %v938_v4, %v5987_v39  ;;  %v977_v6 = vmul.f32 %v976_v58, %v6077_v63 }
 0x12c   : > { %v1188_v19 = vmul.f32 %v5223_v15, %v1187_v48  ;;  %v1262_v23 = vmul.f32 %v1246_v32, %v5896_v35  ;;  %v1263_v54 = vmul.f32 %v1247_v62, %v5953_v2  ;;  %v863_v41 = vmul.f32 %v862_v27, %v5908_v16 }
 0x12d   : > { %v901_v13 = vmul.f32 %v900_v5, %v5923_v46  ;;  %v940_v47 = vadd.f32 0.112945676, %v939_v36  ;;  %v978_v9 = vadd.f32 0.014752088, %v977_v6  ;;  %v1016_v8 = vadd.f32 0.001143296, %v1015_v25 }
 0x12e   : > { %v1189_v28 = vadd.f32 %v5223_v15, %v1188_v19  ;;  %v968_v61 = vmul.f32 %v6143_v0, %v6077_v63  ;;  %v1276_v52 = vpack.c.bf16 %v1263_v54, %v1262_v23  ;;  %v6209_v35 = vadd.f32 1.0, %v863_v41 }
 0x12f   : > { %v902_v2 = vadd.f32 0.4994258, %v901_v13  ;;  %v941_v16 = vmul.f32 %v940_v47, %v5987_v39  ;;  %v979_v34 = vmul.f32 %v978_v9, %v6077_v63  ;;  %v1017_v55 = vmul.f32 %v1016_v8, %v5681_v53 }
 0x130   : > { %v5225_v12 = vpop.eup %5224  ;;  %1363 = vmatmul.bf16.gmra.mxu1 %v1275_v29  ;;  %v1193_v45 = vsel %vm6201_vm4, %v5223_v15, %v1189_v28  ;;  %1368 = vmatmul.bf16.vlgmr.msra.gmra.mxu2 %v1276_v52  ;;  %vm1230_vm5 = vweird.f32 %v6186_v42  ;;  %5226 = vrcp.f32 %v6209_v35  ;;  %v1234_v14 = vand.u32 2147483647, %v6186_v42 }
 0x131   : > { %v1198_v18 = vsel %vm6192_vm3, %v1197_v30, %v1193_v45  ;;  %v1226_v0 = vmul.f32 %v5225_v12, %v6186_v42  ;;  %vm1231_vm6 = vweird.f32 %v5225_v12  ;;  %v1236_v1 = vand.u32 2147483648, %v6186_v42 }
 0x132   : > { %v1199_v29 = vmul.f32 %v1198_v18, %v6007_v10  ;;  %v903_v15 = vmul.f32 %v902_v2, %v5923_v46  ;;  %v942_v17 = vadd.f32 0.4994258, %v941_v16  ;;  %v980_v22 = vadd.f32 0.112945676, %v979_v34  ;;  %vm6239_vm7 = vmor %vm1230_vm5, %vm1231_vm6 }
 0x133   : > { %v1227_v40 = vsub.f32 1.0, %v1226_v0  ;;  %v1214_v57 = vmul.f32 %v6061_v37, %v5871_v51  ;;  %v969_v56 = vadd.f32 0.05243302, %v968_v61  ;;  %v1018_v32 = vadd.f32 0.014752088, %v1017_v55 }
 0x134   : > { %v1055_v33 = vmul.f32 3.8918573e-05, %v5700_v3  ;;  %v6228_v20 = vadd.f32 1.0, %v903_v15  ;;  %v943_v10 = vmul.f32 %v942_v17, %v5987_v39  ;;  %v981_v38 = vmul.f32 %v980_v22, %v6077_v63 }
 0x135   : > { %v1228_v4 = vmul.f32 %v5225_v12, %v1227_v40  ;;  %v854_v31 = vmul.f32 %v6071_v59, %v5876_v11  ;;  %v930_v46 = vmul.f32 %v6081_v60, %v5987_v39  ;;  %v1237_v37 = vor.u32 1.1754944e-38, %v1236_v1 }
 0x136   : > { %v1019_v58 = vmul.f32 %v1018_v32, %v5681_v53  ;;  %v5227_v48 = vpop.eup %5226  ;;  %v4856_v25 = vclamps-f32 %v1199_v29, 1.0  ;;  %vm1235_vm8 = vcmp.eq.f32.partialorder %v1234_v14, 8.507059e+37  ;;  %5228 = vrcp.f32 %v6228_v20 }
 0x137   : > { %v1229_v62 = vadd.f32 %v5225_v12, %v1228_v4  ;;  %v6247_v11 = vmul.f32 %v6088_v24, %v5891_v21  ;;  %v970_v59 = vmul.f32 %v969_v56, %v6077_v63  ;;  %v866_v60 = vmul.f32 %v5227_v48, %v6209_v35 }
 0x138   : > { %v874_v42 = vand.u32 2147483647, %v6209_v35  ;;  %v6254_v27 = vadd.f32 1.0, %v943_v10  ;;  %v982_v5 = vadd.f32 0.4994258, %v981_v38  ;;  %v876_v6 = vand.u32 2147483648, %v6209_v35 }
 0x139   : > { %v1233_v50 = vsel %vm6239_vm7, %v5225_v12, %v1229_v62  ;;  %v1056_v19 = vadd.f32 0.001143296, %v1055_v33  ;;  %v867_v36 = vsub.f32 1.0, %v866_v60  ;;  %v1020_v23 = vadd.f32 0.112945676, %v1019_v58 }
 0x13a   : > { %v1238_v30 = vsel %vm1235_vm8, %v1237_v37, %v1233_v50  ;;  %v931_v21 = vadd.f32 0.18741608, %v930_v46  ;;  %v1256_v54 = vadd.f32 1.0, %v4856_v25  ;;  %5230 = vrcp.f32 %v6254_v27  ;;  %v8724_v50 = vld [vmem:[#allocation13_spill] sm:$0xff] }
 0x13b   : > { %v1239_v24 = vmul.f32 %v1238_v30, %v1214_v57  ;;  %v868_v44 = vmul.f32 %v5227_v48, %v867_v36  ;;  %vm871_vm9 = vweird.f32 %v5227_v48  ;;  %v983_v41 = vmul.f32 %v982_v5, %v6077_v63 }
 0x13c   : > { %v1021_v13 = vmul.f32 %v1020_v23, %v5681_v53  ;;  %v5229_v28 = vpop.eup %5228  ;;  %v971_v47 = vadd.f32 0.18741608, %v970_v59  ;;  %vm870_vm10 = vweird.f32 %v6209_v35  ;;  %v1057_v8 = vmul.f32 %v1056_v19, %v5700_v3 }
 0x13d   : > { %v4857_v9 = vclamps-f32 %v1239_v24, 1.0  ;;  %v869_v61 = vadd.f32 %v5227_v48, %v868_v44  ;;  %vm875_vm11 = vcmp.eq.f32.partialorder %v874_v42, 8.507059e+37  ;;  %v877_v52 = vor.u32 1.1754944e-38, %v876_v6  ;;  %vm872_vm12 = vmor %vm870_vm10, %vm871_vm9 }
 0x13e   : > { %v906_v2 = vmul.f32 %v5229_v28, %v6228_v20  ;;  %v1272_v45 = vmul.f32 %v1256_v54, %v5974_v26  ;;  %v6264_v16 = vadd.f32 1.0, %v983_v41  ;;  %v1022_v34 = vadd.f32 0.4994258, %v1021_v13 }
 0x13f   : > { %v1257_v12 = vadd.f32 1.0, %v4857_v9  ;;  %v873_v55 = vsel %vm872_vm12, %v5227_v48, %v869_v61  ;;  %v914_v0 = vand.u32 2147483647, %v6228_v20  ;;  %v1058_v29 = vadd.f32 0.014752088, %v1057_v8 }
 0x140   : > { %v907_v18 = vsub.f32 1.0, %v906_v2  ;;  %v5231_v35 = vpop.eup %5230  ;;  %v878_v1 = vsel %vm875_vm11, %v877_v52, %v873_v55  ;;  %v916_v40 = vand.u32 2147483648, %v6228_v20  ;;  %5232 = vrcp.f32 %v6264_v16  ;;  %v8716_v52 = vld [vmem:[#allocation19_spill] sm:$0xff] }
 0x141   : > { %v1273_v14 = vmul.f32 %v1257_v12, %v5980_v49  ;;  %v879_v15 = vmul.f32 %v878_v1, %v854_v31  ;;  %vm911_vm13 = vweird.f32 %v5229_v28  ;;  %v946_v26 = vmul.f32 %v5231_v35, %v6254_v27  ;;  %v8718_v1 = vld [vmem:[#allocation15_spill] sm:$0xff] }
 0x142   : > { %v908_v17 = vmul.f32 %v5229_v28, %v907_v18  ;;  %v932_v22 = vmul.f32 %v931_v21, %v5987_v39  ;;  %v972_v57 = vmul.f32 %v971_v47, %v6077_v63  ;;  %v1023_v32 = vmul.f32 %v1022_v34, %v5681_v53 }
 0x143   : > { %v1281_v56 = vpack.c.bf16 %v1273_v14, %v1272_v45  ;;  %vm910_vm14 = vweird.f32 %v6228_v20  ;;  %v947_v49 = vsub.f32 1.0, %v946_v26  ;;  %v1059_v4 = vmul.f32 %v1058_v29, %v5700_v3 }
 0x144   : > { %v909_v33 = vadd.f32 %v5229_v28, %v908_v17  ;;  %vm912_vm15 = vmor %vm910_vm14, %vm911_vm13  ;;  %vm915_vm0 = vcmp.eq.f32.partialorder %v914_v0, 8.507059e+37  ;;  %v917_v10 = vor.u32 1.1754944e-38, %v916_v40  ;;  %vm951_vm1 = vweird.f32 %v5231_v35 }
 0x145   : > { %1393 = vmatmul.bf16.gmra.mxu3 %v1281_v56  ;;  %v6276_v38 = vadd.f32 1.0, %v1023_v32  ;;  %v4848_v31 = vclamps-f32 %v879_v15, 1.0  ;;  %v948_v46 = vmul.f32 %v5231_v35, %v947_v49  ;;  %v1060_v63 = vadd.f32 0.112945676, %v1059_v4  ;;  %v8719_v4 = vld [vmem:[#allocation16_spill] sm:$0xff] }
 0x146   : > { %v913_v39 = vsel %vm912_vm15, %v5229_v28, %v909_v33  ;;  %v5233_v51 = vpop.eup %5232  ;;  %vm950_vm2 = vweird.f32 %v6254_v27  ;;  %v956_v20 = vand.u32 2147483648, %v6254_v27  ;;  %v954_v25 = vand.u32 2147483647, %v6254_v27  ;;  %v8715_v28 = vld [vmem:[#allocation17_spill] sm:$0xff] }
 0x147   : > { %v918_v37 = vsel %vm915_vm0, %v917_v10, %v913_v39  ;;  %5234 = vrcp.f32 %v6276_v38  ;;  %v949_v48 = vadd.f32 %v5231_v35, %v948_v46  ;;  %v986_v62 = vmul.f32 %v5233_v51, %v6264_v16  ;;  %vm6286_vm3 = vmor %vm950_vm2, %vm951_vm1 }
 0x148   : > { %v919_v58 = vmul.f32 %v918_v37, %v6247_v11  ;;  %v577_v59 = vmul.f32 0.5, %v5865_v43  ;;  %v933_v60 = vadd.f32 1.1283791, %v932_v22  ;;  %v973_v42 = vadd.f32 1.1283791, %v972_v57 }
 0x149   : > { %v1061_v5 = vmul.f32 %v1060_v63, %v5700_v3  ;;  %v1248_v30 = vadd.f32 1.0, %v4848_v31  ;;  %v953_v11 = vsel %vm6286_vm3, %v5231_v35, %v949_v48  ;;  %v987_v36 = vsub.f32 1.0, %v986_v62  ;;  %v8717_v35 = vld [vmem:[#allocation14_spill] sm:$0xff]  ;;  %v8723_v48 = vld [vmem:[#allocation11_spill] sm:$0xff] }
 0x14a   : > { %v4849_v19 = vclamps-f32 %v919_v58, 1.0  ;;  %v957_v27 = vor.u32 1.1754944e-38, %v956_v20  ;;  %v994_v6 = vand.u32 2147483647, %v6264_v16  ;;  %v996_v43 = vand.u32 2147483648, %v6264_v16 }
 0x14b   : > { %v1062_v23 = vadd.f32 0.4994258, %v1061_v5  ;;  %vm955_vm4 = vcmp.eq.f32.partialorder %v954_v25, 8.507059e+37  ;;  %v988_v24 = vmul.f32 %v5233_v51, %v987_v36  ;;  %vm991_vm5 = vweird.f32 %v5233_v51 }
 0x14c   : > { %v1249_v21 = vadd.f32 1.0, %v4849_v19  ;;  %v934_v44 = vmul.f32 %v933_v60, %v5958_v7  ;;  %v958_v41 = vsel %vm955_vm4, %v957_v27, %v953_v11  ;;  %vm990_vm6 = vweird.f32 %v6264_v16 }
 0x14d   : > { %v5235_v54 = vpop.eup %5234  ;;  %v1063_v13 = vmul.f32 %v1062_v23, %v5700_v3  ;;  %v1264_v47 = vmul.f32 %v1248_v30, %v8715_v28  ;;  %v989_v8 = vadd.f32 %v5233_v51, %v988_v24  ;;  %v974_v2 = vmul.f32 %v973_v42, %v8716_v52  ;;  %vm992_vm7 = vmor %vm990_vm6, %vm991_vm5 }
 0x14e   : > { %v1265_v9 = vmul.f32 %v1249_v21, %v577_v59  ;;  %v1026_v61 = vmul.f32 %v5235_v54, %v6276_v38  ;;  %vm995_vm8 = vcmp.eq.f32.partialorder %v994_v6, 8.507059e+37  ;;  %v997_v12 = vor.u32 1.1754944e-38, %v996_v43  ;;  %v8725_v21 = vld [vmem:[#allocation10_spill] sm:$0xff] }
 0x14f   : > { %v1064_v45 = vadd.f32 1.0, %v1063_v13  ;;  %v959_v55 = vmul.f32 %v958_v41, %v934_v44  ;;  %v993_v7 = vsel %vm992_vm7, %v5233_v51, %v989_v8  ;;  %v1012_v14 = vmul.f32 %v8717_v35, %v5681_v53  ;;  %v6323_v8 = vld [vmem:[%s8650_s4] ss:$0 sm:$0xff]  ;;  %v5103_v35 = vld [vmem:[%s8651_s5 + $0x38] sm:$0xff] }
 0x150   : > { %v1277_v34 = vpack.c.bf16 %v1265_v9, %v1264_v47  ;;  %v1027_v18 = vsub.f32 1.0, %v1026_v61  ;;  %v998_v0 = vsel %vm995_vm8, %v997_v12, %v993_v7  ;;  %v1052_v40 = vmul.f32 %v8718_v1, %v5700_v3  ;;  %v8722_v3 = vld [vmem:[#allocation18_spill] sm:$0xff]  ;;  %2179 = vmatpush.bf16.msrb.mxu2 %v5103_v35 }
 0x151   : > { %5236 = vrcp.f32 %v1064_v45  ;;  %v999_v16 = vmul.f32 %v998_v0, %v974_v2  ;;  %vm1030_vm9 = vweird.f32 %v6276_v38  ;;  %v4850_v15 = vclamps-f32 %v959_v55, 1.0 }
 0x152   : > { %1373 = vmatmul.bf16.gmra.mxu2 %v1277_v34  ;;  %v1028_v29 = vmul.f32 %v5235_v54, %v1027_v18  ;;  %vm1031_vm10 = vweird.f32 %v5235_v54  ;;  %v1034_v26 = vand.u32 2147483647, %v6276_v38  ;;  %v1036_v22 = vand.u32 2147483648, %v6276_v38 }
 0x153   : > { %v4851_v17 = vclamps-f32 %v999_v16, 1.0  ;;  %v1013_v33 = vadd.f32 1.1283791, %v1012_v14  ;;  %v1053_v49 = vadd.f32 1.1283791, %v1052_v40  ;;  %v578_v10 = vmul.f32 0.5, %v8719_v4  ;;  %vm6309_vm11 = vmor %vm1030_vm9, %vm1031_vm10 }
 0x154   : > { %v1029_v56 = vadd.f32 %v5235_v54, %v1028_v29  ;;  %v579_v31 = vmul.f32 0.5, %v8722_v3  ;;  %v1250_v39 = vadd.f32 1.0, %v4850_v15  ;;  %vm1035_vm12 = vcmp.eq.f32.partialorder %v1034_v26, 8.507059e+37 }
 0x155   : > { %v1251_v57 = vadd.f32 1.0, %v4851_v17  ;;  %v1037_v63 = vor.u32 1.1754944e-38, %v1036_v22  ;;  %vm1070_vm13 = vweird.f32 %v1064_v45  ;;  %v1074_v51 = vand.u32 2147483647, %v1064_v45 }
 0x156   : > { %v1076_v38 = vand.u32 2147483648, %v1064_v45  ;;  %v1033_v20 = vsel %vm6309_vm11, %v5235_v54, %v1029_v56  ;;  %v1014_v25 = vmul.f32 %v1013_v33, %v8723_v48  ;;  %v1266_v62 = vmul.f32 %v1250_v39, %v578_v10  ;;  %v8726_v54 = vld [vmem:[#allocation12_spill] sm:$0xff] }
 0x157   : > { %v5237_v32 = vpop.eup %5236  ;;  %v1267_v37 = vmul.f32 %v1251_v57, %v579_v31  ;;  %v1038_v60 = vsel %vm1035_vm12, %v1037_v63, %v1033_v20  ;;  %v1054_v5 = vmul.f32 %v1053_v49, %v8724_v50  ;;  %vm1075_vm0 = vcmp.eq.f32.partialorder %v1074_v51, 8.507059e+37  ;;  %v5102_v50 = vld [vmem:[%s8651_s5 + $0x30] sm:$0xff] }
 0x158   : > { %v1066_v46 = vmul.f32 %v5237_v32, %v1064_v45  ;;  %vm1071_vm14 = vweird.f32 %v5237_v32  ;;  %v1077_v42 = vor.u32 1.1754944e-38, %v1076_v38  ;;  %v1039_v11 = vmul.f32 %v1038_v60, %v1014_v25  ;;  %2180 = vmatpush.bf16.msrb.mxu2 %v5102_v50  ;;  %v5098_v50 = vld [vmem:[%s8651_s5 + $0x10] sm:$0xff] }
 0x159   : > { %vm1072_vm15 = vmor %vm1070_vm13, %vm1071_vm14  ;;  %v1278_v19 = vpack.c.bf16 %v1267_v37, %v1266_v62  ;;  %v580_v24 = vmul.f32 0.5, %v8725_v21  ;;  %v581_v44 = vmul.f32 0.5, %v8726_v54 }
 0x15a   : > { %v1067_v58 = vsub.f32 1.0, %v1066_v46  ;;  %v4852_v43 = vclamps-f32 %v1039_v11, 1.0 }
 0x15c   : > { %v1068_v59 = vmul.f32 %v5237_v32, %v1067_v58  ;;  %v1252_v41 = vadd.f32 1.0, %v4852_v43 }
 0x15e   : > { %v1069_v30 = vadd.f32 %v5237_v32, %v1068_v59  ;;  %v1268_v28 = vmul.f32 %v1252_v41, %v580_v24 }
 0x160   : > { %v1073_v36 = vsel %vm1072_vm15, %v5237_v32, %v1069_v30 }
 0x161   : > { %v1078_v27 = vsel %vm1075_vm0, %v1077_v42, %v1073_v36  ;;  %v5101_v36 = vld [vmem:[%s8651_s5 + $0x28] sm:$0xff] }
 0x162   : > { %1378 = vmatmul.bf16.gmra.mxu2 %v1278_v19  ;;  %v1079_v6 = vmul.f32 %v1078_v27, %v1054_v5 }
 0x163   : > { %2181 = vmatpush.bf16.msrb.mxu2 %v5101_v36 }
 0x164   : > { %v4853_v23 = vclamps-f32 %v1079_v6, 1.0 }
 0x166   : > { %v1253_v13 = vadd.f32 1.0, %v4853_v23 }
 0x168   : > { %v1269_v47 = vmul.f32 %v1253_v13, %v581_v44 }
 0x16a   : > { %v1279_v9 = vpack.c.bf16 %v1269_v47, %v1268_v28  ;;  %v5100_v28 = vld [vmem:[%s8651_s5 + $0x20] sm:$0xff] }
 0x16b   : > { %2182 = vmatpush.bf16.msrb.mxu2 %v5100_v28 }
 0x172   : > { %1383 = vmatmul.bf16.gmra.mxu2 %v1279_v9 }
 0x195   : > { %v1389_v11 = vpop.f32.mrf.mxu3 }
 0x196   : > { %v6393_v41 = vadd.f32 %v6323_v8, %v1389_v11 }
 0x198   : > { %8727 = vst [vmem:[#allocation17_spill] sm:$0xff] %v6393_v41 }
 0x19d   : > { %v1359_v61 = vpop.f32.mrf.mxu1 }
 0x19e   : > { %v6326_v52 = vadd.f32 %v6323_v8, %v1359_v61 }
 0x1a0   : > { %v6329_v2 = vmul.f32 0.70710677, %v6326_v52 }
 0x1a2   : > { %v1431_v12 = vmul.f32 %v6329_v2, %v6329_v2 }
 0x1a4   : > { %v6333_v45 = vmin.f32 %v1431_v12, 16.0 }
 0x1a5   : > { %v1361_v14 = vpop.f32.mrf.mxu1 }
 0x1a6   : > { %v1444_v34 = vmul.f32 3.8918573e-05, %v6333_v45  ;;  %v1433_v0 = vmul.f32 2.1237322e-06, %v6333_v45  ;;  %v6344_v15 = vadd.f32 %v6323_v8, %v1361_v14  ;;  %v1391_v14 = vpop.f32.mrf.mxu3 }
 0x1a8   : > { %v1445_v55 = vadd.f32 0.001143296, %v1444_v34  ;;  %v1434_v1 = vadd.f32 0.00028619796, %v1433_v0  ;;  %v6347_v26 = vmul.f32 0.70710677, %v6344_v15 }
 0x1aa   : > { %v1446_v7 = vmul.f32 %v1445_v55, %v6333_v45  ;;  %v1435_v22 = vmul.f32 %v1434_v1, %v6333_v45  ;;  %v1471_v56 = vmul.f32 %v6347_v26, %v6347_v26 }
 0x1ac   : > { %v1447_v18 = vadd.f32 0.014752088, %v1446_v7  ;;  %v6355_v33 = vmin.f32 %v1471_v56, 16.0  ;;  %v1436_v49 = vadd.f32 0.0036580483, %v1435_v22 }
 0x1ad   : > { %v1364_v51 = vpop.f32.mrf.mxu1 }
 0x1ae   : > { %v1448_v16 = vmul.f32 %v1447_v18, %v6333_v45  ;;  %v1473_v4 = vmul.f32 2.1237322e-06, %v6355_v33  ;;  %v1484_v10 = vmul.f32 3.8918573e-05, %v6355_v33  ;;  %v1437_v31 = vmul.f32 %v1436_v49, %v6333_v45 }
 0x1af   : > { %v6366_v58 = vadd.f32 %v6323_v8, %v1364_v51  ;;  %v6412_v18 = vmul.f32 0.70710677, %v6393_v41  ;;  %v6429_v49 = vadd.f32 %v6323_v8, %v1391_v14 }
 0x1b0   : > { %v1449_v29 = vadd.f32 0.112945676, %v1448_v16  ;;  %v1474_v53 = vadd.f32 0.00028619796, %v1473_v4  ;;  %v1485_v3 = vadd.f32 0.001143296, %v1484_v10 }
 0x1b1   : > { %v1438_v37 = vadd.f32 0.05243302, %v1437_v31  ;;  %v6372_v62 = vmul.f32 0.70710677, %v6366_v58 }
 0x1b2   : > { %v1450_v40 = vmul.f32 %v1449_v29, %v6333_v45  ;;  %v1475_v39 = vmul.f32 %v1474_v53, %v6355_v33  ;;  %v1486_v46 = vmul.f32 %v1485_v3, %v6355_v33 }
 0x1b3   : > { %v1439_v60 = vmul.f32 %v1438_v37, %v6333_v45  ;;  %v1511_v5 = vmul.f32 %v6372_v62, %v6372_v62  ;;  %v1369_v61 = vpop.f32.mrf.mxu2 }
 0x1b4   : > { %v1451_v17 = vadd.f32 0.4994258, %v1450_v40  ;;  %v1487_v38 = vadd.f32 0.014752088, %v1486_v46  ;;  %v1476_v20 = vadd.f32 0.0036580483, %v1475_v39  ;;  %v6416_v16 = vadd.f32 %v6323_v8, %v1369_v61 }
 0x1b5   : > { %v1366_v27 = vpop.f32.mrf.mxu1  ;;  %v6385_v43 = vmin.f32 %v1511_v5, 16.0  ;;  %v1440_v21 = vadd.f32 0.18741608, %v1439_v60 }
 0x1b6   : > { %v1452_v57 = vmul.f32 %v1451_v17, %v6333_v45  ;;  %v1488_v25 = vmul.f32 %v1487_v38, %v6355_v33  ;;  %v1477_v42 = vmul.f32 %v1476_v20, %v6355_v33  ;;  %v6388_v23 = vadd.f32 %v6323_v8, %v1366_v27 }
 0x1b7   : > { %v1513_v9 = vmul.f32 2.1237322e-06, %v6385_v43  ;;  %v1441_v12 = vmul.f32 %v1440_v21, %v6333_v45  ;;  %v5099_v45 = vld [vmem:[%s8651_s5 + $0x18] sm:$0xff]  ;;  %v6432_v4 = vmul.f32 0.70710677, %v6416_v16 }
 0x1b8   : > { %v6353_v32 = vadd.f32 1.0, %v1452_v57  ;;  %v1489_v59 = vadd.f32 0.112945676, %v1488_v25  ;;  %v1478_v24 = vadd.f32 0.05243302, %v1477_v42  ;;  %v1911_v57 = vmul.f32 %v6412_v18, %v6412_v18  ;;  %2183 = vmatpush.bf16.msrb.mxu2 %v5099_v45 }
 0x1b9   : > { %v6396_v13 = vmul.f32 0.70710677, %v6388_v23  ;;  %v1514_v35 = vadd.f32 0.00028619796, %v1513_v9  ;;  %v1442_v40 = vadd.f32 1.1283791, %v1441_v12  ;;  %v1591_v38 = vmul.f32 %v6432_v4, %v6432_v4 }
 0x1ba   : > { %5238 = vrcp.f32 %v6353_v32  ;;  %v1490_v30 = vmul.f32 %v1489_v59, %v6355_v33  ;;  %v1479_v34 = vmul.f32 %v1478_v24, %v6355_v33  ;;  %v1465_v0 = vand.u32 2147483648, %v6353_v32 }
 0x1bb   : > { %v1551_v7 = vmul.f32 %v6396_v13, %v6396_v13  ;;  %vm1459_vm2 = vweird.f32 %v6353_v32  ;;  %v1463_v29 = vand.u32 2147483647, %v6353_v32  ;;  %v1515_v10 = vmul.f32 %v1514_v35, %v6385_v43  ;;  %v1371_v53 = vpop.f32.mrf.mxu2 }
 0x1bc   : > { %v1491_v6 = vadd.f32 0.4994258, %v1490_v30  ;;  %v1480_v1 = vadd.f32 0.18741608, %v1479_v34  ;;  %v1466_v56 = vor.u32 1.1754944e-38, %v1465_v0  ;;  %v1443_v46 = vmul.f32 %v1442_v40, %v6329_v2  ;;  %2184 = vmatpush.bf16.msrb.mxu2 %v5098_v50 }
 0x1bd   : > { %v6424_v22 = vmin.f32 %v1551_v7, 16.0  ;;  %vm1464_vm4 = vcmp.eq.f32.partialorder %v1463_v29, 8.507059e+37  ;;  %v6439_v51 = vmin.f32 %v1911_v57, 16.0  ;;  %v6444_v20 = vmul.f32 0.70710677, %v6429_v49 }
 0x1be   : > { %v1492_v44 = vmul.f32 %v1491_v6, %v6355_v33  ;;  %v1481_v31 = vmul.f32 %v1480_v1, %v6355_v33  ;;  %v1516_v59 = vadd.f32 0.0036580483, %v1515_v10  ;;  %v6447_v33 = vmin.f32 %v1591_v38, 16.0 }
 0x1bf   : > { %v1951_v36 = vmul.f32 %v6444_v20, %v6444_v20  ;;  %v6459_v27 = vadd.f32 %v6323_v8, %v1371_v53  ;;  %v1400_v10 = vmul.f32 0.5, %v6344_v15  ;;  %v5096_v15 = vld [vmem:[%s8651_s5] sm:$0xff] }
 0x1c0   : > { %v6363_v63 = vpop.eup %5238  ;;  %v6401_v47 = vadd.f32 1.0, %v1492_v44  ;;  %v1482_v60 = vadd.f32 1.1283791, %v1481_v31  ;;  %v1593_v30 = vmul.f32 2.1237322e-06, %v6447_v33  ;;  %v1517_v21 = vmul.f32 %v1516_v59, %v6385_v43 }
 0x1c1   : > { %v1455_v48 = vmul.f32 %v6363_v63, %v6353_v32  ;;  %vm1460_vm1 = vweird.f32 %v6363_v63  ;;  %v6465_v0 = vmin.f32 %v1951_v36, 16.0  ;;  %v6468_v45 = vmul.f32 0.70710677, %v6459_v27 }
 0x1c2   : > { %5240 = vrcp.f32 %v6401_v47  ;;  %vm1461_vm3 = vmor %vm1459_vm2, %vm1460_vm1  ;;  %v1505_v25 = vand.u32 2147483648, %v6401_v47  ;;  %v1503_v2 = vand.u32 2147483647, %v6401_v47  ;;  %vm1499_vm6 = vweird.f32 %v6401_v47 }
 0x1c3   : > { %v1456_v19 = vsub.f32 1.0, %v1455_v48  ;;  %v1594_v24 = vadd.f32 0.00028619796, %v1593_v30  ;;  %v1483_v28 = vmul.f32 %v1482_v60, %v6347_v26  ;;  %v1518_v29 = vadd.f32 0.05243302, %v1517_v21 }
 0x1c4   : > { %v1506_v6 = vor.u32 1.1754944e-38, %v1505_v25  ;;  %vm1504_vm8 = vcmp.eq.f32.partialorder %v1503_v2, 8.507059e+37  ;;  %v1399_v26 = vmul.f32 0.5, %v6326_v52  ;;  %v1631_v40 = vmul.f32 %v6468_v45, %v6468_v45  ;;  %v5097_v52 = vld [vmem:[%s8651_s5 + $0x8] sm:$0xff] }
 0x1c5   : > { %v1457_v54 = vmul.f32 %v6363_v63, %v1456_v19  ;;  %v1913_v19 = vmul.f32 2.1237322e-06, %v6439_v51  ;;  %v1595_v35 = vmul.f32 %v1594_v24, %v6447_v33  ;;  %2185 = vmatpush.bf16.msrb.mxu2 %v5097_v52  ;;  %v6506_v24 = vmul.f32 0.5, %v6388_v23 }
 0x1c6   : > { %v6480_v31 = vmin.f32 %v1631_v40, 16.0 }
 0x1c7   : > { %v1458_v55 = vadd.f32 %v6363_v63, %v1457_v54  ;;  %v1914_v12 = vadd.f32 0.00028619796, %v1913_v19 }
 0x1c8   : > { %v5241_v32 = vpop.eup %5240  ;;  %v1394_v54 = vpop.f32.mrf.mxu3 }
 0x1c9   : > { %v1462_v17 = vsel %vm1461_vm3, %v6363_v63, %v1458_v55  ;;  %v1495_v39 = vmul.f32 %v5241_v32, %v6401_v47  ;;  %v1553_v63 = vmul.f32 2.1237322e-06, %v6424_v22  ;;  %vm1500_vm5 = vweird.f32 %v5241_v32  ;;  %2186 = vmatpush.bf16.msrb.mxu2 %v5096_v15 }
 0x1ca   : > { %v1467_v3 = vsel %vm1464_vm4, %v1466_v56, %v1462_v17  ;;  %vm1501_vm7 = vmor %vm1499_vm6, %vm1500_vm5  ;;  %v1524_v55 = vmul.f32 3.8918573e-05, %v6385_v43  ;;  %v1915_v57 = vmul.f32 %v1914_v12, %v6439_v51  ;;  %v6476_v56 = vadd.f32 %v6323_v8, %v1394_v54 }
 0x1cb   : > { %v1496_v37 = vsub.f32 1.0, %v1495_v39  ;;  %v1468_v48 = vmul.f32 %v1467_v3, %v1443_v46  ;;  %v1554_v5 = vadd.f32 0.00028619796, %v1553_v63  ;;  %v1953_v3 = vmul.f32 2.1237322e-06, %v6465_v0 }
 0x1cc   : > { %8728 = vst [vmem:[#allocation19_spill] sm:$0xff] %v6476_v56  ;;  %v1519_v39 = vmul.f32 %v1518_v29, %v6385_v43  ;;  %v1596_v46 = vadd.f32 0.0036580483, %v1595_v35  ;;  %v1916_v25 = vadd.f32 0.0036580483, %v1915_v57  ;;  %v6527_v29 = vmul.f32 0.5, %v6416_v16 }
 0x1cd   : > { %v1497_v42 = vmul.f32 %v5241_v32, %v1496_v37  ;;  %v4890_v44 = vclamps-f32 %v1468_v48, 1.0  ;;  %v1555_v47 = vmul.f32 %v1554_v5, %v6424_v22  ;;  %v1633_v37 = vmul.f32 2.1237322e-06, %v6480_v31 }
 0x1ce   : > { %v6492_v59 = vmul.f32 0.70710677, %v6476_v56  ;;  %v1954_v50 = vadd.f32 0.00028619796, %v1953_v3  ;;  %v1520_v36 = vadd.f32 0.18741608, %v1519_v39 }
 0x1cf   : > { %v1498_v11 = vadd.f32 %v5241_v32, %v1497_v42  ;;  %v2071_v14 = vadd.f32 1.0, %v4890_v44  ;;  %v1556_v17 = vadd.f32 0.0036580483, %v1555_v47  ;;  %v1634_v5 = vadd.f32 0.00028619796, %v1633_v37 }
 0x1d0   : > { %8729 = vst [vmem:[#allocation14_spill] sm:$0xff] %v6492_v59  ;;  %v1396_v60 = vpop.f32.mrf.mxu3  ;;  %v1564_v47 = vmul.f32 3.8918573e-05, %v6424_v22  ;;  %v1955_v23 = vmul.f32 %v1954_v50, %v6465_v0  ;;  %v1991_v12 = vmul.f32 %v6492_v59, %v6492_v59 }
 0x1d1   : > { %v1502_v9 = vsel %vm1501_vm7, %v5241_v32, %v1498_v11  ;;  %v1525_v32 = vadd.f32 0.001143296, %v1524_v55  ;;  %v2087_v63 = vmul.f32 %v2071_v14, %v1399_v26  ;;  %v1557_v48 = vmul.f32 %v1556_v17, %v6424_v22 }
 0x1d2   : > { %v1507_v61 = vsel %vm1504_vm8, %v1506_v6, %v1502_v9  ;;  %v6502_v11 = vmul.f32 0.5, %v6366_v58  ;;  %v1597_v6 = vmul.f32 %v1596_v46, %v6447_v33  ;;  %v1635_v54 = vmul.f32 %v1634_v5, %v6480_v31 }
 0x1d3   : > { %v1508_v7 = vmul.f32 %v1507_v61, %v1483_v28  ;;  %v1526_v30 = vmul.f32 %v1525_v32, %v6385_v43  ;;  %v6510_v44 = vadd.f32 %v6323_v8, %v1396_v60  ;;  %v1558_v9 = vadd.f32 0.05243302, %v1557_v48 }
 0x1d4   : > { %v1917_v58 = vmul.f32 %v1916_v25, %v6439_v51  ;;  %v1598_v35 = vadd.f32 0.05243302, %v1597_v6  ;;  %v1636_v14 = vadd.f32 0.0036580483, %v1635_v54  ;;  %v1956_v3 = vadd.f32 0.0036580483, %v1955_v23 }
 0x1d5   : > { %v1374_v34 = vpop.f32.mrf.mxu2  ;;  %v4891_v1 = vclamps-f32 %v1508_v7, 1.0  ;;  %8730 = vst [vmem:[#allocation15_spill] sm:$0xff] %v6510_v44  ;;  %v1527_v55 = vadd.f32 0.014752088, %v1526_v30  ;;  %v1521_v7 = vmul.f32 %v1520_v36, %v6385_v43  ;;  %v1559_v57 = vmul.f32 %v1558_v9, %v6424_v22 }
 0x1d6   : > { %v6495_v42 = vadd.f32 %v6323_v8, %v1374_v34  ;;  %v1918_v32 = vadd.f32 0.05243302, %v1917_v58  ;;  %v6540_v52 = vmin.f32 %v1991_v12, 16.0  ;;  %v1637_v25 = vmul.f32 %v1636_v14, %v6480_v31 }
 0x1d7   : > { %v2072_v53 = vadd.f32 1.0, %v4891_v1  ;;  %v6532_v1 = vmul.f32 0.70710677, %v6510_v44  ;;  %v1528_v17 = vmul.f32 %v1527_v55, %v6385_v43  ;;  %v1522_v48 = vadd.f32 1.1283791, %v1521_v7 }
 0x1d8   : > { %v6513_v28 = vmul.f32 0.70710677, %v6495_v42  ;;  %v1560_v50 = vadd.f32 0.18741608, %v1559_v57  ;;  %v1957_v6 = vmul.f32 %v1956_v3, %v6465_v0  ;;  %v1638_v55 = vadd.f32 0.05243302, %v1637_v25 }
 0x1d9   : > { %v2088_v38 = vmul.f32 %v2072_v53, %v1400_v10  ;;  %8731 = vst [vmem:[#allocation16_spill] sm:$0xff] %v6532_v1  ;;  %v1565_v53 = vadd.f32 0.001143296, %v1564_v47  ;;  %v1529_v37 = vadd.f32 0.112945676, %v1528_v17  ;;  %v2031_v60 = vmul.f32 %v6532_v1, %v6532_v1 }
 0x1da   : > { %v1671_v34 = vmul.f32 %v6513_v28, %v6513_v28  ;;  %v1639_v25 = vmul.f32 %v1638_v55, %v6480_v31 }
 0x1db   : > { %v2103_v21 = vpack.c.bf16 %v2088_v38, %v2087_v63  ;;  %v1599_v63 = vmul.f32 %v1598_v35, %v6447_v33  ;;  %v1566_v15 = vmul.f32 %v1565_v53, %v6424_v22  ;;  %v1530_v36 = vmul.f32 %v1529_v37, %v6385_v43 }
 0x1dc   : > { %v6534_v40 = vmin.f32 %v1671_v34, 16.0  ;;  %v1919_v34 = vmul.f32 %v1918_v32, %v6439_v51  ;;  %v6563_v7 = vmin.f32 %v2031_v60, 16.0  ;;  %v1561_v53 = vmul.f32 %v1560_v50, %v6424_v22 }
 0x1dd   : > { %v1376_v2 = vpop.f32.mrf.mxu2  ;;  %2187 = vmatmul.bf16.vlgmr.msrb.gmra.mxu2 %v2103_v21  ;;  %v1993_v21 = vmul.f32 2.1237322e-06, %v6540_v52  ;;  %v1567_v9 = vadd.f32 0.014752088, %v1566_v15  ;;  %v1600_v58 = vadd.f32 0.18741608, %v1599_v63 }
 0x1de   : > { %v6498_v19 = vadd.f32 %v6323_v8, %v1376_v2  ;;  %v1673_v39 = vmul.f32 2.1237322e-06, %v6534_v40  ;;  %v1531_v12 = vadd.f32 0.4994258, %v1530_v36  ;;  %v1958_v63 = vadd.f32 0.05243302, %v1957_v6 }
 0x1df   : > { %v1568_v35 = vmul.f32 %v1567_v9, %v6424_v22  ;;  %v1994_v3 = vadd.f32 0.00028619796, %v1993_v21  ;;  %v6589_v36 = vmul.f32 %v1522_v48, %v6372_v62  ;;  %v1562_v6 = vadd.f32 1.1283791, %v1561_v53 }
 0x1e0   : > { %v6517_v61 = vmul.f32 0.70710677, %v6498_v19  ;;  %v1674_v2 = vadd.f32 0.00028619796, %v1673_v39  ;;  %v6571_v39 = vmul.f32 0.5, %v6459_v27  ;;  %v6602_v48 = vmul.f32 %v1958_v63, %v6465_v0 }
 0x1e1   : > { %v6594_v9 = vadd.f32 0.18741608, %v1919_v34  ;;  %v6605_v34 = vmul.f32 %v1562_v6, %v6396_v13 }
 0x1e2   : > { %v1711_v26 = vmul.f32 %v6517_v61, %v6517_v61  ;;  %v1675_v54 = vmul.f32 %v1674_v2, %v6534_v40  ;;  %v1569_v2 = vadd.f32 0.112945676, %v1568_v35 }
 0x1e4   : > { %v6538_v10 = vmin.f32 %v1711_v26, 16.0  ;;  %v1676_v26 = vadd.f32 0.0036580483, %v1675_v54  ;;  %v1604_v54 = vmul.f32 3.8918573e-05, %v6447_v33  ;;  %v1570_v62 = vmul.f32 %v1569_v2, %v6424_v22 }
 0x1e5   : > { %v1379_v16 = vpop.f32.mrf.mxu2 }
 0x1e6   : > { %v6544_v46 = vadd.f32 %v6323_v8, %v1379_v16  ;;  %v1713_v38 = vmul.f32 2.1237322e-06, %v6538_v10  ;;  %v1532_v16 = vmul.f32 %v1531_v12, %v6385_v43  ;;  %v2033_v43 = vmul.f32 2.1237322e-06, %v6563_v7 }
 0x1e7   : > { %v1677_v27 = vmul.f32 %v1676_v26, %v6534_v40  ;;  %v1640_v12 = vadd.f32 0.18741608, %v1639_v25  ;;  %v1571_v53 = vadd.f32 0.4994258, %v1570_v62  ;;  %v6611_v25 = vmul.f32 0.5, %v6495_v42 }
 0x1e8   : > { %v1714_v5 = vadd.f32 0.00028619796, %v1713_v38  ;;  %v6553_v30 = vmul.f32 0.70710677, %v6544_v46  ;;  %v1601_v38 = vmul.f32 %v1600_v58, %v6447_v33  ;;  %v6578_v15 = vadd.f32 1.0, %v1532_v16 }
 0x1e9   : > { %v2034_v55 = vadd.f32 0.00028619796, %v2033_v43  ;;  %v1678_v26 = vadd.f32 0.05243302, %v1677_v27  ;;  %v6614_v43 = vmul.f32 0.5, %v6498_v19  ;;  %v1641_v6 = vmul.f32 %v1640_v12, %v6480_v31 }
 0x1ea   : > { %v1715_v47 = vmul.f32 %v1714_v5, %v6538_v10  ;;  %v1751_v23 = vmul.f32 %v6553_v30, %v6553_v30  ;;  %5242 = vrcp.f32 %v6578_v15  ;;  %v1602_v58 = vadd.f32 1.1283791, %v1601_v38 }
 0x1eb   : > { %v6621_v13 = vmul.f32 %v2034_v55, %v6563_v7  ;;  %v1679_v42 = vmul.f32 %v1678_v26, %v6534_v40  ;;  %v1644_v12 = vmul.f32 3.8918573e-05, %v6480_v31  ;;  %vm1539_vm10 = vweird.f32 %v6578_v15 }
 0x1ec   : > { %v1716_v14 = vadd.f32 0.0036580483, %v1715_v47  ;;  %v6566_v17 = vmin.f32 %v1751_v23, 16.0  ;;  %v1995_v47 = vmul.f32 %v1994_v3, %v6540_v52  ;;  %v1605_v3 = vadd.f32 0.001143296, %v1604_v54 }
 0x1ed   : > { %v1381_v57 = vpop.f32.mrf.mxu2  ;;  %v6618_v2 = vmul.f32 %v1602_v58, %v6432_v4 }
 0x1ee   : > { %v6574_v32 = vadd.f32 %v6323_v8, %v1381_v57  ;;  %v1753_v37 = vmul.f32 2.1237322e-06, %v6566_v17  ;;  %v1717_v50 = vmul.f32 %v1716_v14, %v6538_v10 }
 0x1f0   : > { %v6583_v60 = vmul.f32 0.70710677, %v6574_v32  ;;  %v1754_v5 = vadd.f32 0.00028619796, %v1753_v37  ;;  %v1718_v14 = vadd.f32 0.05243302, %v1717_v50  ;;  %v5243_v38 = vpop.eup %5242 }
 0x1f1   : > { %v6608_v37 = vadd.f32 0.0036580483, %v1995_v47  ;;  %v1535_v50 = vmul.f32 %v5243_v38, %v6578_v15  ;;  %v1606_v47 = vmul.f32 %v1605_v3, %v6447_v33  ;;  %vm1540_vm9 = vweird.f32 %v5243_v38 }
 0x1f2   : > { %v1791_v21 = vmul.f32 %v6583_v60, %v6583_v60  ;;  %v1755_v23 = vmul.f32 %v1754_v5, %v6566_v17  ;;  %v1719_v54 = vmul.f32 %v1718_v14, %v6538_v10  ;;  %v6640_v14 = vmul.f32 0.5, %v6544_v46  ;;  %vm6649_vm11 = vmor %vm1539_vm10, %vm1540_vm9 }
 0x1f3   : > { %v1536_v58 = vsub.f32 1.0, %v1535_v50  ;;  %v1680_v50 = vadd.f32 0.18741608, %v1679_v42 }
 0x1f4   : > { %v6598_v35 = vmin.f32 %v1791_v21, 16.0  ;;  %v1756_v57 = vadd.f32 0.0036580483, %v1755_v23  ;;  %v1572_v21 = vmul.f32 %v1571_v53, %v6424_v22  ;;  %v1545_v53 = vand.u32 2147483648, %v6578_v15 }
 0x1f5   : > { %v1384_v5 = vpop.f32.mrf.mxu2  ;;  %v1537_v26 = vmul.f32 %v5243_v38, %v1536_v58 }
 0x1f6   : > { %v1793_v16 = vmul.f32 2.1237322e-06, %v6598_v35  ;;  %v1757_v63 = vmul.f32 %v1756_v57, %v6566_v17  ;;  %v6628_v19 = vadd.f32 %v6323_v8, %v1384_v5  ;;  %v6633_v55 = vadd.f32 1.0, %v1572_v21 }
 0x1f7   : > { %v1607_v57 = vadd.f32 0.014752088, %v1606_v47  ;;  %v1538_v3 = vadd.f32 %v5243_v38, %v1537_v26  ;;  %v1720_v5 = vadd.f32 0.18741608, %v1719_v54  ;;  %v1645_v21 = vadd.f32 0.001143296, %v1644_v12 }
 0x1f8   : > { %v1794_v27 = vadd.f32 0.00028619796, %v1793_v16  ;;  %v1758_v23 = vadd.f32 0.05243302, %v1757_v63  ;;  %v6637_v22 = vmul.f32 0.70710677, %v6628_v19  ;;  %5244 = vrcp.f32 %v6633_v55 }
 0x1f9   : > { %v1642_v16 = vadd.f32 1.1283791, %v1641_v6  ;;  %v1543_v63 = vand.u32 2147483647, %v6578_v15  ;;  %v1608_v46 = vmul.f32 %v1607_v57, %v6447_v33  ;;  %v1542_v15 = vsel %vm6649_vm11, %v5243_v38, %v1538_v3 }
 0x1fa   : > { %v1795_v4 = vmul.f32 %v1794_v27, %v6598_v35  ;;  %v1831_v27 = vmul.f32 %v6637_v22, %v6637_v22  ;;  %v1546_v54 = vor.u32 1.1754944e-38, %v1545_v53  ;;  %v1681_v38 = vmul.f32 %v1680_v50, %v6534_v40 }
 0x1fb   : > { %v6661_v42 = vmul.f32 %v1642_v16, %v6468_v45  ;;  %v1609_v44 = vadd.f32 0.112945676, %v1608_v46  ;;  %vm1544_vm12 = vcmp.eq.f32.partialorder %v1543_v63, 8.507059e+37  ;;  %vm1579_vm14 = vweird.f32 %v6633_v55 }
 0x1fc   : > { %v1796_v62 = vadd.f32 0.0036580483, %v1795_v4  ;;  %v1759_v4 = vmul.f32 %v1758_v23, %v6566_v17  ;;  %v6658_v47 = vmin.f32 %v1831_v27, 16.0  ;;  %v1646_v23 = vmul.f32 %v1645_v21, %v6480_v31 }
 0x1fd   : > { %v1386_v26 = vpop.f32.mrf.mxu2  ;;  %v1547_v3 = vsel %vm1544_vm12, %v1546_v54, %v1542_v15  ;;  %v1610_v45 = vmul.f32 %v1609_v44, %v6447_v33  ;;  %v1585_v54 = vand.u32 2147483648, %v6633_v55 }
 0x1fe   : > { %v1797_v58 = vmul.f32 %v1796_v62, %v6598_v35  ;;  %v6664_v56 = vadd.f32 %v6323_v8, %v1386_v26  ;;  %v1833_v12 = vmul.f32 2.1237322e-06, %v6658_v47  ;;  %v1684_v62 = vmul.f32 3.8918573e-05, %v6534_v40  ;;  %v5245_v57 = vpop.eup %5244 }
 0x1ff   : > { %v1721_v8 = vmul.f32 %v1720_v5, %v6538_v10  ;;  %v1760_v16 = vadd.f32 0.18741608, %v1759_v4  ;;  %v1575_v63 = vmul.f32 %v5245_v57, %v6633_v55  ;;  %v1611_v21 = vadd.f32 0.4994258, %v1610_v45 }
 0x200   : > { %v6671_v27 = vmul.f32 0.70710677, %v6664_v56  ;;  %v1798_v53 = vadd.f32 0.05243302, %v1797_v58  ;;  %v1834_v6 = vadd.f32 0.00028619796, %v1833_v12  ;;  %v1548_v50 = vmul.f32 %v1547_v3, %v6589_v36 }
 0x201   : > { %v1647_v26 = vadd.f32 0.014752088, %v1646_v23  ;;  %v1576_v15 = vsub.f32 1.0, %v1575_v63  ;;  %v1685_v59 = vadd.f32 0.001143296, %v1684_v62  ;;  %v1612_v5 = vmul.f32 %v1611_v21, %v6447_v33 }
 0x202   : > { %v1871_v46 = vmul.f32 %v6671_v27, %v6671_v27  ;;  %v1835_v44 = vmul.f32 %v1834_v6, %v6658_v47  ;;  %vm1580_vm13 = vweird.f32 %v5245_v57  ;;  %v1583_v12 = vand.u32 2147483647, %v6633_v55 }
 0x203   : > { %v1648_v4 = vmul.f32 %v1647_v26, %v6480_v31  ;;  %v1577_v58 = vmul.f32 %v5245_v57, %v1576_v15  ;;  %v1686_v23 = vmul.f32 %v1685_v59, %v6534_v40  ;;  %v1799_v36 = vmul.f32 %v1798_v53, %v6598_v35  ;;  %vm1581_vm15 = vmor %vm1579_vm14, %vm1580_vm13 }
 0x204   : > { %v6681_v1 = vmin.f32 %v1871_v46, 16.0  ;;  %v6690_v3 = vadd.f32 1.0, %v1612_v5  ;;  %v4892_v45 = vclamps-f32 %v1548_v50, 1.0  ;;  %v1586_v46 = vor.u32 1.1754944e-38, %v1585_v54 }
 0x205   : > { %v1578_v63 = vadd.f32 %v5245_v57, %v1577_v58  ;;  %v1649_v6 = vadd.f32 0.112945676, %v1648_v4  ;;  %v1687_v33 = vadd.f32 0.014752088, %v1686_v23  ;;  %v1836_v21 = vadd.f32 0.0036580483, %v1835_v44 }
 0x206   : > { %v1873_v62 = vmul.f32 2.1237322e-06, %v6681_v1  ;;  %5246 = vrcp.f32 %v6690_v3  ;;  %v1682_v15 = vadd.f32 1.1283791, %v1681_v38  ;;  %vm1584_vm0 = vcmp.eq.f32.partialorder %v1583_v12, 8.507059e+37 }
 0x207   : > { %v1582_v59 = vsel %vm1581_vm15, %v5245_v57, %v1578_v63  ;;  %v1650_v53 = vmul.f32 %v1649_v6, %v6480_v31  ;;  %v1761_v55 = vmul.f32 %v1760_v16, %v6566_v17  ;;  %v1800_v41 = vadd.f32 0.18741608, %v1799_v36 }
 0x208   : > { %v1874_v26 = vadd.f32 0.00028619796, %v1873_v62  ;;  %v1587_v5 = vsel %vm1584_vm0, %v1586_v46, %v1582_v59  ;;  %v1688_v50 = vmul.f32 %v1687_v33, %v6534_v40  ;;  %v6697_v4 = vmul.f32 0.5, %v6574_v32 }
 0x209   : > { %v1588_v54 = vmul.f32 %v1587_v5, %v6605_v34  ;;  %v2073_v44 = vadd.f32 1.0, %v4892_v45  ;;  %v1651_v58 = vadd.f32 0.4994258, %v1650_v53  ;;  %v1837_v23 = vmul.f32 %v1836_v21, %v6658_v47 }
 0x20a   : > { %v1875_v57 = vmul.f32 %v1874_v26, %v6681_v1  ;;  %v1689_v38 = vadd.f32 0.112945676, %v1688_v50  ;;  %v1724_v12 = vmul.f32 3.8918573e-05, %v6538_v10  ;;  %v6704_v16 = vmul.f32 %v1682_v15, %v6513_v28 }
 0x20b   : > { %v6706_v36 = vadd.f32 1.1283791, %v1721_v8  ;;  %v4893_v62 = vclamps-f32 %v1588_v54, 1.0  ;;  %v1652_v32 = vmul.f32 %v1651_v58, %v6480_v31  ;;  %v6709_v6 = vadd.f32 1.1283791, %v1761_v55 }
 0x20c   : > { %v5247_v63 = vpop.eup %5246  ;;  %v1801_v34 = vmul.f32 %v1800_v41, %v6598_v35  ;;  %v1690_v45 = vmul.f32 %v1689_v38, %v6534_v40  ;;  %v1725_v33 = vadd.f32 0.001143296, %v1724_v12  ;;  %v2089_v21 = vmul.f32 %v2073_v44, %v6502_v11 }
 0x20d   : > { %v2074_v46 = vadd.f32 1.0, %v4893_v62  ;;  %v1615_v26 = vmul.f32 %v5247_v63, %v6690_v3  ;;  %v6715_v28 = vadd.f32 1.0, %v1652_v32  ;;  %v1838_v8 = vadd.f32 0.05243302, %v1837_v23 }
 0x20e   : > { %v1876_v15 = vadd.f32 0.0036580483, %v1875_v57  ;;  %v1691_v59 = vadd.f32 0.4994258, %v1690_v45  ;;  %v1726_v31 = vmul.f32 %v1725_v33, %v6538_v10  ;;  %v1623_v41 = vand.u32 2147483647, %v6690_v3 }
 0x20f   : > { %v2090_v53 = vmul.f32 %v2074_v46, %v6506_v24  ;;  %v1616_v55 = vsub.f32 1.0, %v1615_v26  ;;  %5248 = vrcp.f32 %v6715_v28  ;;  %vm1620_vm1 = vweird.f32 %v5247_v63 }
 0x210   : > { %v1625_v5 = vand.u32 2147483648, %v6690_v3  ;;  %v1764_v11 = vmul.f32 3.8918573e-05, %v6566_v17  ;;  %v1804_v50 = vmul.f32 3.8918573e-05, %v6598_v35  ;;  %v1692_v58 = vmul.f32 %v1691_v59, %v6534_v40 }
 0x211   : > { %v2104_v54 = vpack.c.bf16 %v2090_v53, %v2089_v21  ;;  %v1617_v44 = vmul.f32 %v5247_v63, %v1616_v55  ;;  %v1727_v23 = vadd.f32 0.014752088, %v1726_v31  ;;  %v6725_v57 = vadd.f32 1.1283791, %v1801_v34 }
 0x212   : > { %v1839_v24 = vmul.f32 %v1838_v8, %v6658_v47  ;;  %v1877_v38 = vmul.f32 %v1876_v15, %v6681_v1  ;;  %vm1619_vm2 = vweird.f32 %v6690_v3  ;;  %v1663_v62 = vand.u32 2147483647, %v6715_v28 }
 0x213   : > { %2192 = vmatmul.bf16.gmra.mxu2 %v2104_v54  ;;  %v1618_v12 = vadd.f32 %v5247_v63, %v1617_v44  ;;  %v6731_v32 = vadd.f32 1.0, %v1692_v58  ;;  %v1728_v45 = vmul.f32 %v1727_v23, %v6538_v10  ;;  %vm1621_vm3 = vmor %vm1619_vm2, %vm1620_vm1  ;;  %vm1624_vm4 = vcmp.eq.f32.partialorder %v1623_v41, 8.507059e+37 }
 0x214   : > { %v1626_v40 = vor.u32 1.1754944e-38, %v1625_v5  ;;  %v1765_v34 = vadd.f32 0.001143296, %v1764_v11  ;;  %v1805_v33 = vadd.f32 0.001143296, %v1804_v50  ;;  %v1665_v26 = vand.u32 2147483648, %v6715_v28 }
 0x215   : > { %v5249_v46 = vpop.eup %5248  ;;  %v1622_v21 = vsel %vm1621_vm3, %v5247_v63, %v1618_v12  ;;  %5250 = vrcp.f32 %v6731_v32  ;;  %v1844_v3 = vmul.f32 3.8918573e-05, %v6658_v47  ;;  %v6738_v8 = vadd.f32 0.18741608, %v1839_v24 }
 0x216   : > { %v1627_v15 = vsel %vm1624_vm4, %v1626_v40, %v1622_v21  ;;  %v1655_v59 = vmul.f32 %v5249_v46, %v6715_v28  ;;  %v1884_v31 = vmul.f32 3.8918573e-05, %v6681_v1  ;;  %v6742_v53 = vadd.f32 0.05243302, %v1877_v38 }
 0x217   : > { %vm1659_vm5 = vweird.f32 %v6715_v28  ;;  %vm6745_vm6 = vcmp.eq.f32.partialorder %v1663_v62, 8.507059e+37  ;;  %v1729_v63 = vadd.f32 0.112945676, %v1728_v45  ;;  %v1628_v41 = vmul.f32 %v1627_v15, %v6618_v2 }
 0x218   : > { %v1656_v5 = vsub.f32 1.0, %v1655_v59  ;;  %v1766_v11 = vmul.f32 %v1765_v34, %v6566_v17  ;;  %v1806_v50 = vmul.f32 %v1805_v33, %v6598_v35  ;;  %vm1660_vm7 = vweird.f32 %v5249_v46 }
 0x219   : > { %v1666_v54 = vor.u32 1.1754944e-38, %v1665_v26  ;;  %v1730_v44 = vmul.f32 %v1729_v63, %v6538_v10  ;;  %v1845_v58 = vadd.f32 0.001143296, %v1844_v3  ;;  %v1885_v12 = vadd.f32 0.001143296, %v1884_v31  ;;  %vm1661_vm8 = vmor %vm1659_vm5, %vm1660_vm7 }
 0x21a   : > { %v1657_v23 = vmul.f32 %v5249_v46, %v1656_v5  ;;  %v1767_v24 = vadd.f32 0.014752088, %v1766_v11  ;;  %v1807_v38 = vadd.f32 0.014752088, %v1806_v50  ;;  %v1703_v40 = vand.u32 2147483647, %v6731_v32 }
 0x21b   : > { %v5251_v62 = vpop.eup %5250  ;;  %v1705_v45 = vand.u32 2147483648, %v6731_v32  ;;  %v1731_v2 = vadd.f32 0.4994258, %v1730_v44  ;;  %v1846_v21 = vmul.f32 %v1845_v58, %v6658_v47  ;;  %v4894_v34 = vclamps-f32 %v1628_v41, 1.0 }
 0x21c   : > { %v1658_v15 = vadd.f32 %v5249_v46, %v1657_v23  ;;  %v1695_v33 = vmul.f32 %v5251_v62, %v6731_v32  ;;  %v1768_v26 = vmul.f32 %v1767_v24, %v6566_v17  ;;  %vm1700_vm9 = vweird.f32 %v5251_v62 }
 0x21d   : > { %v1732_v3 = vmul.f32 %v1731_v2, %v6538_v10  ;;  %v1808_v59 = vmul.f32 %v1807_v38, %v6598_v35  ;;  %v1847_v31 = vadd.f32 0.014752088, %v1846_v21  ;;  %v1886_v41 = vmul.f32 %v1885_v12, %v6681_v1 }
 0x21e   : > { %v1662_v63 = vsel %vm1661_vm8, %v5249_v46, %v1658_v15  ;;  %v1696_v5 = vsub.f32 1.0, %v1695_v33  ;;  %v1769_v11 = vadd.f32 0.112945676, %v1768_v26  ;;  %v2075_v2 = vadd.f32 1.0, %v4894_v34 }
 0x21f   : > { %v1667_v50 = vsel %vm6745_vm6, %v1666_v54, %v1662_v63  ;;  %v6766_v44 = vadd.f32 1.0, %v1732_v3  ;;  %v1809_v58 = vadd.f32 0.112945676, %v1808_v59  ;;  %v1848_v28 = vmul.f32 %v1847_v31, %v6658_v47 }
 0x220   : > { %v1668_v23 = vmul.f32 %v1667_v50, %v6661_v42  ;;  %v1697_v24 = vmul.f32 %v5251_v62, %v1696_v5  ;;  %v1770_v10 = vmul.f32 %v1769_v11, %v6566_v17  ;;  %v1887_v38 = vadd.f32 0.014752088, %v1886_v41 }
 0x221   : > { %vm1699_vm10 = vweird.f32 %v6731_v32  ;;  %5252 = vrcp.f32 %v6766_v44  ;;  %v1924_v46 = vmul.f32 3.8918573e-05, %v6439_v51  ;;  %v1810_v21 = vmul.f32 %v1809_v58, %v6598_v35 }
 0x222   : > { %v4895_v55 = vclamps-f32 %v1668_v23, 1.0  ;;  %v1698_v54 = vadd.f32 %v5251_v62, %v1697_v24  ;;  %v1771_v12 = vadd.f32 0.4994258, %v1770_v10  ;;  %vm1701_vm11 = vmor %vm1699_vm10, %vm1700_vm9  ;;  %vm1704_vm12 = vcmp.eq.f32.partialorder %v1703_v40, 8.507059e+37 }
 0x223   : > { %v1706_v42 = vor.u32 1.1754944e-38, %v1705_v45  ;;  %v1849_v15 = vadd.f32 0.112945676, %v1848_v28  ;;  %v1888_v33 = vmul.f32 %v1887_v38, %v6681_v1  ;;  %v1811_v3 = vadd.f32 0.4994258, %v1810_v21 }
 0x224   : > { %v2076_v26 = vadd.f32 1.0, %v4895_v55  ;;  %v1702_v34 = vsel %vm1701_vm11, %v5251_v62, %v1698_v54  ;;  %v1772_v32 = vmul.f32 %v1771_v12, %v6566_v17  ;;  %v1925_v5 = vadd.f32 0.001143296, %v1924_v46 }
 0x225   : > { %v1707_v59 = vsel %vm1704_vm12, %v1706_v42, %v1702_v34  ;;  %v1850_v31 = vmul.f32 %v1849_v15, %v6658_v47  ;;  %v1889_v63 = vadd.f32 0.112945676, %v1888_v33  ;;  %v2091_v11 = vmul.f32 %v2075_v2, %v6527_v29 }
 0x226   : > { %v2092_v41 = vmul.f32 %v2076_v26, %v6571_v39  ;;  %v6781_v50 = vadd.f32 1.0, %v1772_v32  ;;  %v1812_v40 = vmul.f32 %v1811_v3, %v6598_v35  ;;  %v1708_v58 = vmul.f32 %v1707_v59, %v6704_v16 }
 0x227   : > { %v5253_v45 = vpop.eup %5252  ;;  %v1851_v62 = vadd.f32 0.4994258, %v1850_v31  ;;  %v1890_v17 = vmul.f32 %v1889_v63, %v6681_v1  ;;  %v1926_v28 = vmul.f32 %v1925_v5, %v6439_v51  ;;  %v1723_v23 = vmul.f32 %v6706_v36, %v6517_v61 }
 0x228   : > { %v6791_v29 = vmul.f32 %v6709_v6, %v6553_v30  ;;  %v2105_v39 = vpack.c.bf16 %v2092_v41, %v2091_v11  ;;  %v1735_v24 = vmul.f32 %v5253_v45, %v6766_v44  ;;  %v6796_v35 = vmul.f32 %v6725_v57, %v6583_v60 }
 0x229   : > { %v1841_v16 = vmul.f32 %v6738_v8, %v6658_v47  ;;  %v1879_v10 = vmul.f32 %v6742_v53, %v6681_v1  ;;  %5254 = vrcp.f32 %v6781_v50  ;;  %v6803_v36 = vadd.f32 1.0, %v1812_v40 }
 0x22a   : > { %2197 = vmatmul.bf16.gmra.mxu2 %v2105_v39  ;;  %v1736_v61 = vsub.f32 1.0, %v1735_v24  ;;  %v1852_v30 = vmul.f32 %v1851_v62, %v6658_v47  ;;  %v1964_v6 = vmul.f32 3.8918573e-05, %v6465_v0  ;;  %v4896_v38 = vclamps-f32 %v1708_v58, 1.0 }
 0x22b   : > { %v1745_v60 = vand.u32 2147483648, %v6766_v44  ;;  %v1891_v57 = vadd.f32 0.4994258, %v1890_v17  ;;  %v1927_v2 = vadd.f32 0.014752088, %v1926_v28  ;;  %vm1740_vm13 = vweird.f32 %v5253_v45 }
 0x22c   : > { %v1737_v46 = vmul.f32 %v5253_v45, %v1736_v61  ;;  %v1743_v8 = vand.u32 2147483647, %v6766_v44  ;;  %5256 = vrcp.f32 %v6803_v36  ;;  %v6810_v53 = vadd.f32 1.1283791, %v1841_v16 }
 0x22d   : > { %vm1739_vm14 = vweird.f32 %v6766_v44  ;;  %v6813_v55 = vadd.f32 1.0, %v1852_v30  ;;  %v1892_v47 = vmul.f32 %v1891_v57, %v6681_v1  ;;  %v1783_v12 = vand.u32 2147483647, %v6781_v50 }
 0x22e   : > { %v1738_v54 = vadd.f32 %v5253_v45, %v1737_v46  ;;  %v1928_v21 = vmul.f32 %v1927_v2, %v6439_v51  ;;  %v1965_v42 = vadd.f32 0.001143296, %v1964_v6  ;;  %vm1741_vm15 = vmor %vm1739_vm14, %vm1740_vm13  ;;  %v1746_v33 = vor.u32 1.1754944e-38, %v1745_v60 }
 0x22f   : > { %v5255_v15 = vpop.eup %5254  ;;  %v2077_v26 = vadd.f32 1.0, %v4896_v38  ;;  %v1785_v34 = vand.u32 2147483648, %v6781_v50  ;;  %5258 = vrcp.f32 %v6813_v55  ;;  %v1880_v32 = vadd.f32 0.18741608, %v1879_v10 }
 0x230   : > { %v1742_v44 = vsel %vm1741_vm15, %v5253_v45, %v1738_v54  ;;  %vm1744_vm0 = vcmp.eq.f32.partialorder %v1743_v8, 8.507059e+37  ;;  %v1775_v3 = vmul.f32 %v5255_v15, %v6781_v50  ;;  %vm1779_vm1 = vweird.f32 %v6781_v50 }
 0x231   : > { %v1747_v59 = vsel %vm1744_vm0, %v1746_v33, %v1742_v44  ;;  %v6822_v31 = vadd.f32 1.0, %v1892_v47  ;;  %v1929_v63 = vadd.f32 0.112945676, %v1928_v21  ;;  %vm6824_vm2 = vcmp.eq.f32.partialorder %v1783_v12, 8.507059e+37 }
 0x232   : > { %v5257_v5 = vpop.eup %5256  ;;  %v1748_v11 = vmul.f32 %v1747_v59, %v1723_v23  ;;  %v1776_v41 = vsub.f32 1.0, %v1775_v3  ;;  %v1966_v58 = vmul.f32 %v1965_v42, %v6465_v0  ;;  %v2093_v45 = vmul.f32 %v2077_v26, %v6611_v25 }
 0x233   : > { %v1786_v62 = vor.u32 1.1754944e-38, %v1785_v34  ;;  %v1815_v17 = vmul.f32 %v5257_v5, %v6803_v36  ;;  %5260 = vrcp.f32 %v6822_v31  ;;  %vm1780_vm3 = vweird.f32 %v5255_v15 }
 0x234   : > { %v4897_v28 = vclamps-f32 %v1748_v11, 1.0  ;;  %v1777_v39 = vmul.f32 %v5255_v15, %v1776_v41  ;;  %vm1819_vm4 = vweird.f32 %v6803_v36  ;;  %v1823_v16 = vand.u32 2147483647, %v6803_v36  ;;  %vm1781_vm5 = vmor %vm1779_vm1, %vm1780_vm3 }
 0x235   : > { %v6833_v23 = vpop.eup %5258  ;;  %v1816_v24 = vsub.f32 1.0, %v1815_v17  ;;  %v1930_v10 = vmul.f32 %v1929_v63, %v6439_v51  ;;  %v1967_v61 = vadd.f32 0.014752088, %v1966_v58  ;;  %v1825_v6 = vand.u32 2147483648, %v6803_v36 }
 0x236   : > { %v2078_v30 = vadd.f32 1.0, %v4897_v28  ;;  %v1778_v25 = vadd.f32 %v5255_v15, %v1777_v39  ;;  %v1855_v38 = vmul.f32 %v6833_v23, %v6813_v55  ;;  %vm1820_vm6 = vweird.f32 %v5257_v5 }
 0x237   : > { %v1817_v60 = vmul.f32 %v5257_v5, %v1816_v24  ;;  %v1931_v57 = vadd.f32 0.4994258, %v1930_v10  ;;  %v2004_v2 = vmul.f32 3.8918573e-05, %v6540_v52  ;;  %v1968_v54 = vmul.f32 %v1967_v61, %v6465_v0  ;;  %vm1821_vm8 = vmor %vm1819_vm4, %vm1820_vm6 }
 0x238   : > { %v2094_v46 = vmul.f32 %v2078_v30, %v6614_v43  ;;  %v1782_v8 = vsel %vm1781_vm5, %v5255_v15, %v1778_v25  ;;  %v1856_v47 = vsub.f32 1.0, %v1855_v38  ;;  %vm1824_vm7 = vcmp.eq.f32.partialorder %v1823_v16, 8.507059e+37 }
 0x239   : > { %v5261_v12 = vpop.eup %5260  ;;  %v1787_v21 = vsel %vm6824_vm2, %v1786_v62, %v1782_v8  ;;  %v1818_v42 = vadd.f32 %v5257_v5, %v1817_v60  ;;  %v1932_v50 = vmul.f32 %v1931_v57, %v6439_v51  ;;  %v1826_v34 = vor.u32 1.1754944e-38, %v1825_v6 }
 0x23a   : > { %v2106_v33 = vpack.c.bf16 %v2094_v46, %v2093_v45  ;;  %v1788_v26 = vmul.f32 %v1787_v21, %v6791_v29  ;;  %v1895_v43 = vmul.f32 %v5261_v12, %v6822_v31  ;;  %v1857_v44 = vmul.f32 %v6833_v23, %v1856_v47 }
 0x23b   : > { %v1822_v15 = vsel %vm1821_vm8, %v5257_v5, %v1818_v42  ;;  %v6853_v3 = vadd.f32 1.0, %v1932_v50  ;;  %v1969_v59 = vadd.f32 0.112945676, %v1968_v54  ;;  %v1881_v63 = vmul.f32 %v1880_v32, %v6681_v1 }
 0x23c   : > { %2202 = vmatmul.bf16.gmra.mxu2 %v2106_v33  ;;  %v1827_v11 = vsel %vm1824_vm7, %v1826_v34, %v1822_v15  ;;  %vm1859_vm9 = vweird.f32 %v6813_v55  ;;  %v1896_v41 = vsub.f32 1.0, %v1895_v43  ;;  %v1863_v36 = vand.u32 2147483647, %v6813_v55 }
 0x23d   : > { %v1828_v29 = vmul.f32 %v1827_v11, %v6796_v35  ;;  %5262 = vrcp.f32 %v6853_v3  ;;  %v2005_v40 = vadd.f32 0.001143296, %v2004_v2  ;;  %v4898_v5 = vclamps-f32 %v1788_v26, 1.0 }
 0x23e   : > { %v1897_v58 = vmul.f32 %v5261_v12, %v1896_v41  ;;  %vm1900_vm10 = vweird.f32 %v5261_v12  ;;  %v1905_v45 = vand.u32 2147483648, %v6822_v31  ;;  %v1858_v1 = vadd.f32 %v6833_v23, %v1857_v44 }
 0x23f   : > { %v4899_v62 = vclamps-f32 %v1828_v29, 1.0  ;;  %vm1860_vm11 = vweird.f32 %v6833_v23  ;;  %v1970_v32 = vmul.f32 %v1969_v59, %v6465_v0  ;;  %v1865_v17 = vand.u32 2147483648, %v6813_v55 }
 0x240   : > { %v1898_v35 = vadd.f32 %v5261_v12, %v1897_v58  ;;  %vm1899_vm12 = vweird.f32 %v6822_v31  ;;  %v1903_v28 = vand.u32 2147483647, %v6822_v31  ;;  %v2006_v10 = vmul.f32 %v2005_v40, %v6540_v52  ;;  %vm6875_vm14 = vmor %vm1859_vm9, %vm1860_vm11 }
 0x241   : > { %v2080_v39 = vadd.f32 1.0, %v4899_v62  ;;  %vm6867_vm13 = vmor %vm1899_vm12, %vm1900_vm10  ;;  %v1971_v16 = vadd.f32 0.4994258, %v1970_v32  ;;  %v2044_v61 = vmul.f32 3.8918573e-05, %v6563_v7  ;;  %v2079_v25 = vadd.f32 1.0, %v4898_v5 }
 0x242   : > { %v1882_v30 = vadd.f32 1.1283791, %v1881_v63  ;;  %vm6879_vm15 = vcmp.eq.f32.partialorder %v1863_v36, 8.507059e+37  ;;  %v1902_v38 = vsel %vm6867_vm13, %v5261_v12, %v1898_v35  ;;  %v1862_v57 = vsel %vm6875_vm14, %v6833_v23, %v1858_v1 }
 0x243   : > { %v6885_v60 = vpop.eup %5262  ;;  %v1906_v2 = vor.u32 1.1754944e-38, %v1905_v45  ;;  %v1972_v55 = vmul.f32 %v1971_v16, %v6465_v0  ;;  %v2007_v46 = vadd.f32 0.014752088, %v2006_v10  ;;  %v2096_v8 = vmul.f32 %v2080_v39, %v6697_v4 }
 0x244   : > { %v1866_v47 = vor.u32 1.1754944e-38, %v1865_v17  ;;  %vm1904_vm0 = vcmp.eq.f32.partialorder %v1903_v28, 8.507059e+37  ;;  %v1935_v54 = vmul.f32 %v6885_v60, %v6853_v3  ;;  %v2045_v50 = vadd.f32 0.001143296, %v2044_v61 }
 0x245   : > { %v1907_v21 = vsel %vm1904_vm0, %v1906_v2, %v1902_v38  ;;  %v6894_v42 = vadd.f32 1.0, %v1972_v55  ;;  %v2008_v12 = vmul.f32 %v2007_v46, %v6540_v52  ;;  %v2036_v33 = vadd.f32 0.0036580483, %v6621_v13 }
 0x246   : > { %v1883_v23 = vmul.f32 %v1882_v30, %v6671_v27  ;;  %v2095_v26 = vmul.f32 %v2079_v25, %v6640_v14  ;;  %v1867_v4 = vsel %vm6879_vm15, %v1866_v47, %v1862_v57  ;;  %v1843_v34 = vmul.f32 %v6810_v53, %v6637_v22 }
 0x247   : > { %v1936_v43 = vsub.f32 1.0, %v1935_v54  ;;  %5264 = vrcp.f32 %v6894_v42  ;;  %v2009_v59 = vadd.f32 0.112945676, %v2008_v12  ;;  %v2046_v63 = vmul.f32 %v2045_v50, %v6563_v7 }
 0x248   : > { %v2107_v15 = vpack.c.bf16 %v2096_v8, %v2095_v26  ;;  %v1908_v44 = vmul.f32 %v1907_v21, %v1883_v23  ;;  %v1921_v13 = vmul.f32 %v6594_v9, %v6439_v51  ;;  %v1960_v27 = vadd.f32 0.18741608, %v6602_v48 }
 0x249   : > { %v1997_v14 = vmul.f32 %v6608_v37, %v6540_v52  ;;  %v1868_v11 = vmul.f32 %v1867_v4, %v1843_v34  ;;  %v2037_v41 = vmul.f32 %v2036_v33, %v6563_v7  ;;  %v2010_v22 = vmul.f32 %v2009_v59, %v6540_v52 }
 0x24a   : > { %v2047_v53 = vadd.f32 0.014752088, %v2046_v63  ;;  %v1937_v29 = vmul.f32 %v6885_v60, %v1936_v43  ;;  %v4901_v36 = vclamps-f32 %v1908_v44, 1.0  ;;  %v1922_v51 = vadd.f32 1.1283791, %v1921_v13 }
 0x24b   : > { %v2011_v40 = vadd.f32 0.4994258, %v2010_v22  ;;  %v1961_v9 = vmul.f32 %v1960_v27, %v6465_v0  ;;  %v1998_v48 = vadd.f32 0.05243302, %v1997_v14  ;;  %v4900_v45 = vclamps-f32 %v1868_v11, 1.0 }
 0x24c   : > { %2207 = vmatmul.bf16.gmra.mxu2 %v2107_v15  ;;  %v2048_v5 = vmul.f32 %v2047_v53, %v6563_v7  ;;  %v2038_v37 = vadd.f32 0.05243302, %v2037_v41  ;;  %v1410_v62 = vmul.f32 0.5, %v6664_v56  ;;  %v1938_v17 = vadd.f32 %v6885_v60, %v1937_v29 }
 0x24d   : > { %v5265_v58 = vpop.eup %5264  ;;  %v2012_v32 = vmul.f32 %v2011_v40, %v6540_v52  ;;  %vm1939_vm1 = vweird.f32 %v6853_v3  ;;  %vm1940_vm2 = vweird.f32 %v6885_v60  ;;  %v2082_v28 = vadd.f32 1.0, %v4901_v36 }
 0x24e   : > { %v1975_v1 = vmul.f32 %v5265_v58, %v6894_v42  ;;  %v2049_v35 = vadd.f32 0.112945676, %v2048_v5  ;;  %v1945_v39 = vand.u32 2147483648, %v6853_v3  ;;  %v2081_v16 = vadd.f32 1.0, %v4900_v45  ;;  %vm6928_vm3 = vmor %vm1939_vm1, %vm1940_vm2 }
 0x24f   : > { %v6923_v24 = vadd.f32 1.0, %v2012_v32  ;;  %v1943_v56 = vand.u32 2147483647, %v6853_v3  ;;  %v1985_v10 = vand.u32 2147483648, %v6894_v42  ;;  %vm1980_vm4 = vweird.f32 %v5265_v58 }
 0x250   : > { %v1976_v0 = vsub.f32 1.0, %v1975_v1  ;;  %v2050_v61 = vmul.f32 %v2049_v35, %v6563_v7  ;;  %v1983_v6 = vand.u32 2147483647, %v6894_v42  ;;  %v1962_v31 = vadd.f32 1.1283791, %v1961_v9 }
 0x251   : > { %5266 = vrcp.f32 %v6923_v24  ;;  %v1409_v38 = vmul.f32 0.5, %v6628_v19  ;;  %v1942_v3 = vsel %vm6928_vm3, %v6885_v60, %v1938_v17  ;;  %v2098_v2 = vmul.f32 %v2082_v28, %v1410_v62  ;;  %v8746_v62 = vld [vmem:[#allocation17_spill] sm:$0xff] }
 0x252   : > { %v1977_v25 = vmul.f32 %v5265_v58, %v1976_v0  ;;  %v2051_v57 = vadd.f32 0.4994258, %v2050_v61  ;;  %v1946_v55 = vor.u32 1.1754944e-38, %v1945_v39  ;;  %vm1979_vm5 = vweird.f32 %v6894_v42 }
 0x253   : > { %v2039_v8 = vmul.f32 %v2038_v37, %v6563_v7  ;;  %vm1944_vm6 = vcmp.eq.f32.partialorder %v1943_v56, 8.507059e+37  ;;  %vm1981_vm7 = vmor %vm1979_vm5, %vm1980_vm4  ;;  %v1986_v47 = vor.u32 1.1754944e-38, %v1985_v10  ;;  %v2097_v21 = vmul.f32 %v2081_v16, %v1409_v38  ;;  %v8750_v38 = vld [vmem:[#allocation14_spill] sm:$0xff] }
 0x254   : > { %v1978_v46 = vadd.f32 %v5265_v58, %v1977_v25  ;;  %v2052_v54 = vmul.f32 %v2051_v57, %v6563_v7  ;;  %v1947_v12 = vsel %vm1944_vm6, %v1946_v55, %v1942_v3  ;;  %vm1984_vm8 = vcmp.eq.f32.partialorder %v1983_v6, 8.507059e+37 }
 0x255   : > { %v1923_v50 = vmul.f32 %v1922_v51, %v6412_v18  ;;  %v1963_v26 = vmul.f32 %v1962_v31, %v6444_v20  ;;  %v1999_v42 = vmul.f32 %v1998_v48, %v6540_v52  ;;  %v2108_v4 = vpack.c.bf16 %v2098_v2, %v2097_v21  ;;  %v6949_v20 = vld [vmem:[%s8652_s6] ss:$0 sm:$0xff] }
 0x256   : > { %v1982_v19 = vsel %vm1981_vm7, %v5265_v58, %v1978_v46  ;;  %v2053_v33 = vadd.f32 1.0, %v2052_v54  ;;  %v2040_v34 = vadd.f32 0.18741608, %v2039_v8  ;;  %v1412_v41 = vmul.f32 0.5, %v6429_v49 }
 0x257   : > { %v1987_v60 = vsel %vm1984_vm8, %v1986_v47, %v1982_v19  ;;  %v5267_v23 = vpop.eup %5266  ;;  %v1948_v43 = vmul.f32 %v1947_v12, %v1923_v50  ;;  %v2000_v63 = vadd.f32 0.18741608, %v1999_v42  ;;  %vm2019_vm10 = vweird.f32 %v6923_v24  ;;  %v8751_v12 = vld [vmem:[#allocation15_spill] sm:$0xff] }
 0x258   : > { %v2015_v15 = vmul.f32 %v5267_v23, %v6923_v24  ;;  %5268 = vrcp.f32 %v2053_v33  ;;  %v1988_v44 = vmul.f32 %v1987_v60, %v1963_v26  ;;  %v2041_v13 = vmul.f32 %v2040_v34, %v6563_v7 }
 0x259   : > { %v4902_v18 = vclamps-f32 %v1948_v43, 1.0  ;;  %v2001_v53 = vmul.f32 %v2000_v63, %v6540_v52  ;;  %vm2020_vm9 = vweird.f32 %v5267_v23  ;;  %v2023_v9 = vand.u32 2147483647, %v6923_v24 }
 0x25a   : > { %v2016_v59 = vsub.f32 1.0, %v2015_v15  ;;  %v4903_v27 = vclamps-f32 %v1988_v44, 1.0  ;;  %v2042_v29 = vadd.f32 1.1283791, %v2041_v13  ;;  %v2025_v48 = vand.u32 2147483648, %v6923_v24  ;;  %vm6964_vm12 = vmor %vm2019_vm10, %vm2020_vm9  ;;  %v8749_v24 = vld [vmem:[#allocation16_spill] sm:$0xff] }
 0x25b   : > { %v2083_v36 = vadd.f32 1.0, %v4902_v18  ;;  %v2065_v49 = vand.u32 2147483648, %v2053_v33  ;;  %v2063_v52 = vand.u32 2147483647, %v2053_v33  ;;  %v1411_v1 = vmul.f32 0.5, %v8746_v62 }
 0x25c   : > { %2212 = vmatmul.bf16.gmra.mxu2 %v2108_v4  ;;  %v2017_v14 = vmul.f32 %v5267_v23, %v2016_v59  ;;  %v2084_v5 = vadd.f32 1.0, %v4903_v27  ;;  %v2002_v32 = vadd.f32 1.1283791, %v2001_v53  ;;  %vm2059_vm13 = vweird.f32 %v2053_v33 }
 0x25d   : > { %v2043_v16 = vmul.f32 %v2042_v29, %v8749_v24  ;;  %v2099_v56 = vmul.f32 %v2083_v36, %v1411_v1  ;;  %v2026_v10 = vor.u32 1.1754944e-38, %v2025_v48  ;;  %v2066_v61 = vor.u32 1.1754944e-38, %v2065_v49 }
 0x25e   : > { %v5269_v11 = vpop.eup %5268  ;;  %v2018_v7 = vadd.f32 %v5267_v23, %v2017_v14  ;;  %v2100_v35 = vmul.f32 %v2084_v5, %v1412_v41  ;;  %vm2024_vm15 = vcmp.eq.f32.partialorder %v2023_v9, 8.507059e+37  ;;  %vm2064_vm0 = vcmp.eq.f32.partialorder %v2063_v52, 8.507059e+37 }
 0x25f   : > { %v2055_v22 = vmul.f32 %v5269_v11, %v2053_v33  ;;  %vm2060_vm11 = vweird.f32 %v5269_v11  ;;  %v2003_v3 = vmul.f32 %v2002_v32, %v8750_v38  ;;  %v1414_v19 = vmul.f32 0.5, %v8751_v12 }
 0x260   : > { %v2188_v40 = vpop.f32.mrf.mxu2  ;;  %v2022_v28 = vsel %vm6964_vm12, %v5267_v23, %v2018_v7  ;;  %vm2061_vm14 = vmor %vm2059_vm13, %vm2060_vm11  ;;  %v2109_v57 = vpack.c.bf16 %v2100_v35, %v2099_v56  ;;  %v8752_v23 = vld [vmem:[#allocation19_spill] sm:$0xff] }
 0x261   : > { %v2056_v58 = vsub.f32 1.0, %v2055_v22  ;;  %v6954_v51 = vadd.f32 %v6949_v20, %v2188_v40  ;;  %v2027_v6 = vsel %vm2024_vm15, %v2026_v10, %v2022_v28  ;;  %v1413_v26 = vmul.f32 0.5, %v8752_v23 }
 0x262   : > { %v2028_v55 = vmul.f32 %v2027_v6, %v2003_v3 }
 0x263   : > { %v2057_v45 = vmul.f32 %v5269_v11, %v2056_v58  ;;  %v6960_v37 = vmul.f32 0.70710677, %v6954_v51 }
 0x264   : > { %v4904_v47 = vclamps-f32 %v2028_v55, 1.0 }
 0x265   : > { %v2058_v39 = vadd.f32 %v5269_v11, %v2057_v45  ;;  %v2260_v0 = vmul.f32 %v6960_v37, %v6960_v37 }
 0x266   : > { %v2085_v50 = vadd.f32 1.0, %v4904_v47 }
 0x267   : > { %v2062_v30 = vsel %vm2061_vm14, %v5269_v11, %v2058_v39  ;;  %v6973_v25 = vmin.f32 %v2260_v0, 16.0 }
 0x268   : > { %v2067_v31 = vsel %vm2064_vm0, %v2066_v61, %v2062_v30  ;;  %v2190_v33 = vpop.f32.mrf.mxu2  ;;  %v2101_v34 = vmul.f32 %v2085_v50, %v1413_v26  ;;  %v5111_v61 = vld [vmem:[%s8653_s7 + $0x38] sm:$0xff] }
 0x269   : > { %v2068_v2 = vmul.f32 %v2067_v31, %v2043_v16  ;;  %v2273_v46 = vmul.f32 3.8918573e-05, %v6973_v25  ;;  %v6981_v4 = vadd.f32 %v6949_v20, %v2190_v33  ;;  %v2262_v36 = vmul.f32 2.1237322e-06, %v6973_v25  ;;  %3008 = vmatpush.bf16.msra.mxu3 %v5111_v61  ;;  %v5110_v31 = vld [vmem:[%s8653_s7 + $0x30] sm:$0xff] }
 0x26b   : > { %v4905_v8 = vclamps-f32 %v2068_v2, 1.0  ;;  %v2274_v54 = vadd.f32 0.001143296, %v2273_v46  ;;  %v6984_v15 = vmul.f32 0.70710677, %v6981_v4 }
 0x26c   : > { %2217 = vmatmul.bf16.gmra.mxu2 %v2109_v57  ;;  %v2263_v9 = vadd.f32 0.00028619796, %v2262_v36 }
 0x26d   : > { %v2086_v21 = vadd.f32 1.0, %v4905_v8  ;;  %v2275_v60 = vmul.f32 %v2274_v54, %v6973_v25  ;;  %v2300_v59 = vmul.f32 %v6984_v15, %v6984_v15  ;;  %3009 = vmatpush.bf16.msra.mxu3 %v5110_v31 }
 0x26e   : > { %v2264_v62 = vmul.f32 %v2263_v9, %v6973_v25 }
 0x26f   : > { %v2102_v42 = vmul.f32 %v2086_v21, %v1414_v19  ;;  %v2276_v43 = vadd.f32 0.014752088, %v2275_v60  ;;  %v2301_v13 = vmin.f32 %v2300_v59, 16.0  ;;  %v5108_v59 = vld [vmem:[%s8653_s7 + $0x20] sm:$0xff] }
 0x270   : > { %v2265_v35 = vadd.f32 0.0036580483, %v2264_v62 }
 0x271   : > { %v2110_v44 = vpack.c.bf16 %v2102_v42, %v2101_v34  ;;  %v2277_v63 = vmul.f32 %v2276_v43, %v6973_v25  ;;  %v2313_v18 = vmul.f32 3.8918573e-05, %v2301_v13  ;;  %v2302_v53 = vmul.f32 2.1237322e-06, %v2301_v13  ;;  %v5109_v42 = vld [vmem:[%s8653_s7 + $0x28] sm:$0xff] }
 0x272   : > { %v2266_v39 = vmul.f32 %v2265_v35, %v6973_v25  ;;  %3010 = vmatpush.bf16.msra.mxu3 %v5109_v42 }
 0x273   : > { %v2278_v27 = vadd.f32 0.112945676, %v2277_v63  ;;  %v2314_v14 = vadd.f32 0.001143296, %v2313_v18  ;;  %v2303_v7 = vadd.f32 0.00028619796, %v2302_v53 }
 0x274   : > { %v2267_v30 = vadd.f32 0.05243302, %v2266_v39 }
 0x275   : > { %v2315_v11 = vmul.f32 %v2314_v14, %v2301_v13  ;;  %v2279_v41 = vmul.f32 %v2278_v27, %v6973_v25  ;;  %v2304_v45 = vmul.f32 %v2303_v7, %v2301_v13 }
 0x276   : > { %v2268_v57 = vmul.f32 %v2267_v30, %v6973_v25  ;;  %3011 = vmatpush.bf16.msra.mxu3 %v5108_v59 }
 0x277   : > { %v2316_v22 = vadd.f32 0.014752088, %v2315_v11  ;;  %v2280_v40 = vadd.f32 0.4994258, %v2279_v41  ;;  %v2305_v17 = vadd.f32 0.0036580483, %v2304_v45 }
 0x278   : > { %v2269_v8 = vadd.f32 0.18741608, %v2268_v57 }
 0x279   : > { %v2317_v29 = vmul.f32 %v2316_v22, %v2301_v13  ;;  %v2281_v48 = vmul.f32 %v2280_v40, %v6973_v25  ;;  %v2306_v28 = vmul.f32 %v2305_v17, %v2301_v13  ;;  %v5107_v40 = vld [vmem:[%s8653_s7 + $0x18] sm:$0xff]  ;;  %v2228_v17 = vmul.f32 0.5, %v6954_v51 }
 0x27a   : > { %v2270_v19 = vmul.f32 %v2269_v8, %v6973_v25  ;;  %3012 = vmatpush.bf16.msra.mxu3 %v5107_v40 }
 0x27b   : > { %v2318_v5 = vadd.f32 0.112945676, %v2317_v29  ;;  %v2282_v1 = vadd.f32 1.0, %v2281_v48  ;;  %v2307_v16 = vadd.f32 0.05243302, %v2306_v28 }
 0x27c   : > { %2222 = vmatmul.bf16.gmra.mxu2 %v2110_v44  ;;  %v2271_v63 = vadd.f32 1.1283791, %v2270_v19 }
 0x27d   : > { %v2319_v58 = vmul.f32 %v2318_v5, %v2301_v13  ;;  %v2308_v38 = vmul.f32 %v2307_v16, %v2301_v13  ;;  %v2294_v23 = vand.u32 2147483648, %v2282_v1  ;;  %vm2288_vm5 = vweird.f32 %v2282_v1 }
 0x27e   : > { %v2292_v34 = vand.u32 2147483647, %v2282_v1  ;;  %v2272_v22 = vmul.f32 %v2271_v63, %v6960_v37 }
 0x27f   : > { %v2320_v49 = vadd.f32 0.4994258, %v2319_v58  ;;  %v2309_v55 = vadd.f32 0.18741608, %v2308_v38  ;;  %v2295_v27 = vor.u32 1.1754944e-38, %v2294_v23 }
 0x280   : > { %vm2293_vm8 = vcmp.eq.f32.partialorder %v2292_v34, 8.507059e+37 }
 0x281   : > { %v2321_v52 = vmul.f32 %v2320_v49, %v2301_v13  ;;  %v2310_v21 = vmul.f32 %v2309_v55, %v2301_v13 }
 0x283   : > { %v2322_v32 = vadd.f32 1.0, %v2321_v52  ;;  %v2311_v43 = vadd.f32 1.1283791, %v2310_v21 }
 0x285   : > { %5270 = vrcp.f32 %v2322_v32  ;;  %v2334_v50 = vand.u32 2147483648, %v2322_v32  ;;  %vm2328_vm3 = vweird.f32 %v2322_v32  ;;  %v2332_v33 = vand.u32 2147483647, %v2322_v32 }
 0x286   : > { %5272 = vrcp.f32 %v2282_v1  ;;  %v2312_v11 = vmul.f32 %v2311_v43, %v6984_v15  ;;  %v5106_v15 = vld [vmem:[%s8653_s7 + $0x10] sm:$0xff] }
 0x287   : > { %v2335_v44 = vor.u32 1.1754944e-38, %v2334_v50  ;;  %vm2333_vm7 = vcmp.eq.f32.partialorder %v2332_v33, 8.507059e+37  ;;  %3013 = vmatpush.bf16.msra.mxu3 %v5106_v15 }
 0x28b   : > { %v5271_v0 = vpop.eup %5270 }
 0x28c   : > { %v5273_v24 = vpop.eup %5272  ;;  %v2324_v56 = vmul.f32 %v5271_v0, %v2322_v32  ;;  %vm2329_vm1 = vweird.f32 %v5271_v0  ;;  %v5105_v32 = vld [vmem:[%s8653_s7 + $0x8] sm:$0xff] }
 0x28d   : > { %v2284_v6 = vmul.f32 %v5273_v24, %v2282_v1  ;;  %vm2289_vm2 = vweird.f32 %v5273_v24  ;;  %vm7002_vm4 = vmor %vm2328_vm3, %vm2329_vm1  ;;  %v2229_v1 = vmul.f32 0.5, %v6981_v4  ;;  %3014 = vmatpush.bf16.msra.mxu3 %v5105_v32 }
 0x28e   : > { %v2325_v3 = vsub.f32 1.0, %v2324_v56  ;;  %vm2290_vm6 = vmor %vm2288_vm5, %vm2289_vm2 }
 0x28f   : > { %v2285_v2 = vsub.f32 1.0, %v2284_v6 }
 0x290   : > { %v2326_v46 = vmul.f32 %v5271_v0, %v2325_v3 }
 0x291   : > { %v2286_v47 = vmul.f32 %v5273_v24, %v2285_v2 }
 0x292   : > { %v2327_v12 = vadd.f32 %v5271_v0, %v2326_v46 }
 0x293   : > { %v2287_v60 = vadd.f32 %v5273_v24, %v2286_v47 }
 0x294   : > { %v2331_v25 = vsel %vm7002_vm4, %v5271_v0, %v2327_v12  ;;  %v5104_v0 = vld [vmem:[%s8653_s7] sm:$0xff] }
 0x295   : > { %v2291_v13 = vsel %vm2290_vm6, %v5273_v24, %v2287_v60  ;;  %v2336_v14 = vsel %vm2333_vm7, %v2335_v44, %v2331_v25  ;;  %3015 = vmatpush.bf16.msra.mxu3 %v5104_v0 }
 0x296   : > { %v2193_v10 = vpop.f32.mrf.mxu2  ;;  %v2296_v41 = vsel %vm2293_vm8, %v2295_v27, %v2291_v13  ;;  %v2337_v53 = vmul.f32 %v2336_v14, %v2312_v11 }
 0x297   : > { %v7017_v29 = vadd.f32 %v6949_v20, %v2193_v10  ;;  %v2297_v5 = vmul.f32 %v2296_v41, %v2272_v22 }
 0x298   : > { %v4939_v7 = vclamps-f32 %v2337_v53, 1.0 }
 0x299   : > { %v7029_v37 = vmul.f32 0.70710677, %v7017_v29  ;;  %v4938_v48 = vclamps-f32 %v2297_v5, 1.0 }
 0x29a   : > { %v2901_v49 = vadd.f32 1.0, %v4939_v7 }
 0x29b   : > { %v2340_v45 = vmul.f32 %v7029_v37, %v7029_v37  ;;  %v2900_v62 = vadd.f32 1.0, %v4938_v48 }
 0x29c   : > { %v2917_v35 = vmul.f32 %v2901_v49, %v2229_v1 }
 0x29d   : > { %v7043_v28 = vmin.f32 %v2340_v45, 16.0  ;;  %v2916_v24 = vmul.f32 %v2900_v62, %v2228_v17 }
 0x29e   : > { %v2195_v54 = vpop.f32.mrf.mxu2 }
 0x29f   : > { %v7020_v36 = vadd.f32 %v6949_v20, %v2195_v54  ;;  %v2932_v56 = vpack.c.bf16 %v2917_v35, %v2916_v24  ;;  %v2342_v4 = vmul.f32 2.1237322e-06, %v7043_v28  ;;  %v2353_v30 = vmul.f32 3.8918573e-05, %v7043_v28 }
 0x2a1   : > { %v7032_v9 = vmul.f32 0.70710677, %v7020_v36  ;;  %v2343_v61 = vadd.f32 0.00028619796, %v2342_v4  ;;  %3016 = vmatmul.bf16.vlgmr.msra.gmra.mxu3 %v2932_v56  ;;  %v2354_v38 = vadd.f32 0.001143296, %v2353_v30 }
 0x2a3   : > { %v2380_v52 = vmul.f32 %v7032_v9, %v7032_v9  ;;  %v2344_v57 = vmul.f32 %v2343_v61, %v7043_v28  ;;  %v2355_v2 = vmul.f32 %v2354_v38, %v7043_v28 }
 0x2a5   : > { %v7045_v39 = vmin.f32 %v2380_v52, 16.0  ;;  %v2356_v8 = vadd.f32 0.014752088, %v2355_v2  ;;  %v2345_v54 = vadd.f32 0.0036580483, %v2344_v57 }
 0x2a7   : > { %v2382_v10 = vmul.f32 2.1237322e-06, %v7045_v39  ;;  %v2357_v21 = vmul.f32 %v2356_v8, %v7043_v28  ;;  %v2393_v12 = vmul.f32 3.8918573e-05, %v7045_v39  ;;  %v2346_v42 = vmul.f32 %v2345_v54, %v7043_v28 }
 0x2a9   : > { %v2383_v6 = vadd.f32 0.00028619796, %v2382_v10  ;;  %v2358_v33 = vadd.f32 0.112945676, %v2357_v21  ;;  %v2394_v23 = vadd.f32 0.001143296, %v2393_v12 }
 0x2aa   : > { %v2347_v27 = vadd.f32 0.05243302, %v2346_v42 }
 0x2ab   : > { %v2384_v55 = vmul.f32 %v2383_v6, %v7045_v39  ;;  %v2359_v34 = vmul.f32 %v2358_v33, %v7043_v28  ;;  %v2395_v43 = vmul.f32 %v2394_v23, %v7045_v39 }
 0x2ac   : > { %v2348_v48 = vmul.f32 %v2347_v27, %v7043_v28 }
 0x2ad   : > { %v2198_v18 = vpop.f32.mrf.mxu2  ;;  %v2385_v19 = vadd.f32 0.0036580483, %v2384_v55  ;;  %v2360_v63 = vadd.f32 0.4994258, %v2359_v34  ;;  %v2396_v13 = vadd.f32 0.014752088, %v2395_v43 }
 0x2ae   : > { %v7053_v51 = vadd.f32 %v6949_v20, %v2198_v18  ;;  %v2349_v35 = vadd.f32 0.18741608, %v2348_v48 }
 0x2af   : > { %v2386_v25 = vmul.f32 %v2385_v19, %v7045_v39  ;;  %v2361_v14 = vmul.f32 %v2360_v63, %v7043_v28  ;;  %v2397_v11 = vmul.f32 %v2396_v13, %v7045_v39 }
 0x2b0   : > { %v7057_v3 = vmul.f32 0.70710677, %v7053_v51  ;;  %v2350_v57 = vmul.f32 %v2349_v35, %v7043_v28 }
 0x2b1   : > { %v2387_v41 = vadd.f32 0.05243302, %v2386_v25  ;;  %v2362_v5 = vadd.f32 1.0, %v2361_v14  ;;  %v2398_v15 = vadd.f32 0.112945676, %v2397_v11 }
 0x2b2   : > { %v2420_v47 = vmul.f32 %v7057_v3, %v7057_v3  ;;  %v2351_v28 = vadd.f32 1.1283791, %v2350_v57 }
 0x2b3   : > { %5274 = vrcp.f32 %v2362_v5  ;;  %v2388_v49 = vmul.f32 %v2387_v41, %v7045_v39  ;;  %v2399_v62 = vmul.f32 %v2398_v15, %v7045_v39  ;;  %v2374_v23 = vand.u32 2147483648, %v2362_v5 }
 0x2b4   : > { %v7074_v26 = vmin.f32 %v2420_v47, 16.0  ;;  %vm2368_vm10 = vweird.f32 %v2362_v5  ;;  %v2352_v48 = vmul.f32 %v2351_v28, %v7029_v37 }
 0x2b5   : > { %v2200_v58 = vpop.f32.mrf.mxu2  ;;  %v2400_v0 = vadd.f32 0.4994258, %v2399_v62  ;;  %v2389_v24 = vadd.f32 0.18741608, %v2388_v49 }
 0x2b6   : > { %v7063_v46 = vadd.f32 %v6949_v20, %v2200_v58  ;;  %v2422_v18 = vmul.f32 2.1237322e-06, %v7074_v26  ;;  %v2433_v17 = vmul.f32 3.8918573e-05, %v7074_v26 }
 0x2b7   : > { %v2401_v61 = vmul.f32 %v2400_v0, %v7045_v39  ;;  %v2390_v8 = vmul.f32 %v2389_v24, %v7045_v39  ;;  %v2372_v39 = vand.u32 2147483647, %v2362_v5 }
 0x2b8   : > { %v7070_v50 = vmul.f32 0.70710677, %v7063_v46  ;;  %v2423_v7 = vadd.f32 0.00028619796, %v2422_v18 }
 0x2b9   : > { %v5275_v56 = vpop.eup %5274  ;;  %v7117_v2 = vadd.f32 1.0, %v2401_v61  ;;  %v2391_v34 = vadd.f32 1.1283791, %v2390_v8  ;;  %vm2373_vm12 = vcmp.eq.f32.partialorder %v2372_v39, 8.507059e+37 }
 0x2ba   : > { %v2460_v44 = vmul.f32 %v7070_v50, %v7070_v50  ;;  %v2424_v1 = vmul.f32 %v2423_v7, %v7074_v26  ;;  %vm2369_vm9 = vweird.f32 %v5275_v56 }
 0x2bb   : > { %5276 = vrcp.f32 %v7117_v2  ;;  %vm7127_vm11 = vmor %vm2368_vm10, %vm2369_vm9  ;;  %v2392_v49 = vmul.f32 %v2391_v34, %v7032_v9  ;;  %vm2408_vm14 = vweird.f32 %v7117_v2 }
 0x2bc   : > { %v7088_v22 = vmin.f32 %v2460_v44, 16.0  ;;  %v2425_v30 = vadd.f32 0.0036580483, %v2424_v1 }
 0x2be   : > { %v2462_v45 = vmul.f32 2.1237322e-06, %v7088_v22  ;;  %v2426_v12 = vmul.f32 %v2425_v30, %v7074_v26  ;;  %v2473_v7 = vmul.f32 3.8918573e-05, %v7088_v22 }
 0x2bf   : > { %v2203_v16 = vpop.f32.mrf.mxu2 }
 0x2c0   : > { %v7083_v59 = vadd.f32 %v6949_v20, %v2203_v16  ;;  %v2434_v16 = vadd.f32 0.001143296, %v2433_v17  ;;  %v2463_v4 = vadd.f32 0.00028619796, %v2462_v45  ;;  %v2427_v18 = vadd.f32 0.05243302, %v2426_v12 }
 0x2c1   : > { %v5277_v41 = vpop.eup %5276 }
 0x2c2   : > { %v7091_v53 = vmul.f32 0.70710677, %v7083_v59  ;;  %v2435_v55 = vmul.f32 %v2434_v16, %v7074_v26  ;;  %v2464_v54 = vmul.f32 %v2463_v4, %v7088_v22  ;;  %v2404_v45 = vmul.f32 %v5277_v41, %v7117_v2 }
 0x2c3   : > { %v2428_v35 = vmul.f32 %v2427_v18, %v7074_v26  ;;  %v2414_v16 = vand.u32 2147483648, %v7117_v2  ;;  %v2474_v4 = vadd.f32 0.001143296, %v2473_v7  ;;  %vm2409_vm13 = vweird.f32 %v5277_v41 }
 0x2c4   : > { %v2500_v52 = vmul.f32 %v7091_v53, %v7091_v53  ;;  %v2436_v42 = vadd.f32 0.014752088, %v2435_v55  ;;  %v2465_v25 = vadd.f32 0.0036580483, %v2464_v54  ;;  %v2405_v37 = vsub.f32 1.0, %v2404_v45  ;;  %vm2410_vm15 = vmor %vm2408_vm14, %vm2409_vm13 }
 0x2c5   : > { %v2475_v8 = vmul.f32 %v2474_v4, %v7088_v22  ;;  %v2415_v12 = vor.u32 1.1754944e-38, %v2414_v16  ;;  %v2230_v18 = vmul.f32 0.5, %v7017_v29 }
 0x2c6   : > { %v7109_v10 = vmin.f32 %v2500_v52, 16.0  ;;  %v2437_v13 = vmul.f32 %v2436_v42, %v7074_v26  ;;  %v2406_v30 = vmul.f32 %v5277_v41, %v2405_v37 }
 0x2c7   : > { %v2205_v31 = vpop.f32.mrf.mxu2  ;;  %v2476_v34 = vadd.f32 0.014752088, %v2475_v8 }
 0x2c8   : > { %v7096_v58 = vadd.f32 %v6949_v20, %v2205_v31  ;;  %v2364_v31 = vmul.f32 %v5275_v56, %v2362_v5  ;;  %v2502_v21 = vmul.f32 2.1237322e-06, %v7109_v10  ;;  %v2375_v5 = vor.u32 1.1754944e-38, %v2374_v23 }
 0x2c9   : > { %v2438_v15 = vadd.f32 0.112945676, %v2437_v13  ;;  %v2407_v54 = vadd.f32 %v5277_v41, %v2406_v30  ;;  %v2477_v7 = vmul.f32 %v2476_v34, %v7088_v22 }
 0x2ca   : > { %v7106_v32 = vmul.f32 0.70710677, %v7096_v58  ;;  %v2365_v47 = vsub.f32 1.0, %v2364_v31  ;;  %v2503_v44 = vadd.f32 0.00028619796, %v2502_v21 }
 0x2cb   : > { %v2439_v17 = vmul.f32 %v2438_v15, %v7074_v26  ;;  %v2411_v42 = vsel %vm2410_vm15, %v5277_v41, %v2407_v54 }
 0x2cc   : > { %v2540_v6 = vmul.f32 %v7106_v32, %v7106_v32  ;;  %v2366_v33 = vmul.f32 %v5275_v56, %v2365_v47  ;;  %v2504_v62 = vmul.f32 %v2503_v44, %v7109_v10 }
 0x2ce   : > { %v7125_v19 = vmin.f32 %v2540_v6, 16.0  ;;  %v2367_v43 = vadd.f32 %v5275_v56, %v2366_v33  ;;  %v2412_v6 = vand.u32 2147483647, %v7117_v2  ;;  %v2505_v57 = vadd.f32 0.0036580483, %v2504_v62 }
 0x2cf   : > { %v7072_v60 = vpop.f32.mrf.mxu2  ;;  %v2513_v2 = vmul.f32 3.8918573e-05, %v7109_v10 }
 0x2d0   : > { %v2542_v27 = vmul.f32 2.1237322e-06, %v7125_v19  ;;  %v7135_v14 = vadd.f32 %v6949_v20, %v7072_v60  ;;  %v2371_v11 = vsel %vm7127_vm11, %v5275_v56, %v2367_v43  ;;  %v2466_v60 = vmul.f32 %v2465_v25, %v7088_v22 }
 0x2d1   : > { %v2376_v1 = vsel %vm2373_vm12, %v2375_v5, %v2371_v11  ;;  %v2440_v56 = vadd.f32 0.4994258, %v2439_v17  ;;  %vm2413_vm0 = vcmp.eq.f32.partialorder %v2412_v6, 8.507059e+37  ;;  %v2506_v25 = vmul.f32 %v2505_v57, %v7109_v10 }
 0x2d2   : > { %v2543_v0 = vadd.f32 0.00028619796, %v2542_v27  ;;  %v7150_v24 = vmul.f32 0.70710677, %v7135_v14  ;;  %v2377_v61 = vmul.f32 %v2376_v1, %v2352_v48  ;;  %v2467_v31 = vadd.f32 0.05243302, %v2466_v60 }
 0x2d3   : > { %v2441_v55 = vmul.f32 %v2440_v56, %v7074_v26  ;;  %v2416_v39 = vsel %vm2413_vm0, %v2415_v12, %v2411_v42  ;;  %v2231_v27 = vmul.f32 0.5, %v7020_v36  ;;  %v2429_v48 = vadd.f32 0.18741608, %v2428_v35 }
 0x2d4   : > { %v2544_v47 = vmul.f32 %v2543_v0, %v7125_v19  ;;  %v4940_v23 = vclamps-f32 %v2377_v61, 1.0  ;;  %v2468_v43 = vmul.f32 %v2467_v31, %v7088_v22  ;;  %v2514_v60 = vadd.f32 0.001143296, %v2513_v2 }
 0x2d5   : > { %v7171_v28 = vadd.f32 1.0, %v2441_v55  ;;  %v2478_v0 = vadd.f32 0.112945676, %v2477_v7  ;;  %v2553_v16 = vmul.f32 3.8918573e-05, %v7125_v19  ;;  %v2430_v30 = vmul.f32 %v2429_v48, %v7074_v26 }
 0x2d6   : > { %v2545_v44 = vadd.f32 0.0036580483, %v2544_v47  ;;  %v2902_v5 = vadd.f32 1.0, %v4940_v23  ;;  %v2469_v45 = vadd.f32 0.18741608, %v2468_v43  ;;  %v2515_v37 = vmul.f32 %v2514_v60, %v7109_v10 }
 0x2d7   : > { %v7093_v40 = vpop.f32.mrf.mxu2  ;;  %5278 = vrcp.f32 %v7171_v28  ;;  %v2479_v6 = vmul.f32 %v2478_v0, %v7088_v22  ;;  %v2554_v23 = vadd.f32 0.001143296, %v2553_v16  ;;  %vm2448_vm2 = vweird.f32 %v7171_v28 }
 0x2d8   : > { %v7154_v9 = vadd.f32 %v6949_v20, %v7093_v40  ;;  %v2580_v40 = vmul.f32 %v7150_v24, %v7150_v24  ;;  %v2546_v62 = vmul.f32 %v2545_v44, %v7125_v19  ;;  %v2918_v56 = vmul.f32 %v2902_v5, %v2230_v18 }
 0x2d9   : > { %v2516_v31 = vadd.f32 0.014752088, %v2515_v37  ;;  %v2470_v57 = vmul.f32 %v2469_v45, %v7088_v22  ;;  %v2480_v54 = vadd.f32 0.4994258, %v2479_v6  ;;  %v2555_v44 = vmul.f32 %v2554_v23, %v7125_v19 }
 0x2da   : > { %v7165_v21 = vmul.f32 0.70710677, %v7154_v9  ;;  %v7177_v63 = vmin.f32 %v2580_v40, 16.0  ;;  %v2547_v42 = vadd.f32 0.05243302, %v2546_v62 }
 0x2db   : > { %v2517_v12 = vmul.f32 %v2516_v31, %v7109_v10  ;;  %v2481_v2 = vmul.f32 %v2480_v54, %v7088_v22  ;;  %v2431_v18 = vadd.f32 1.1283791, %v2430_v30  ;;  %v2452_v0 = vand.u32 2147483647, %v7171_v28 }
 0x2dc   : > { %v2620_v11 = vmul.f32 %v7165_v21, %v7165_v21  ;;  %v2582_v29 = vmul.f32 2.1237322e-06, %v7177_v63  ;;  %v2593_v48 = vmul.f32 3.8918573e-05, %v7177_v63  ;;  %v2548_v22 = vmul.f32 %v2547_v42, %v7125_v19 }
 0x2dd   : > { %v7191_v36 = vpop.eup %5278  ;;  %v7220_v5 = vadd.f32 1.0, %v2481_v2  ;;  %vm2453_vm4 = vcmp.eq.f32.partialorder %v2452_v0, 8.507059e+37 }
 0x2de   : > { %v7193_v17 = vmin.f32 %v2620_v11, 16.0  ;;  %v2444_v61 = vmul.f32 %v7191_v36, %v7171_v28  ;;  %v2583_v40 = vadd.f32 0.00028619796, %v2582_v29  ;;  %vm2449_vm1 = vweird.f32 %v7191_v36 }
 0x2df   : > { %v7114_v38 = vpop.f32.mrf.mxu2  ;;  %5280 = vrcp.f32 %v7220_v5  ;;  %vm7243_vm3 = vmor %vm2448_vm2, %vm2449_vm1  ;;  %vm2488_vm6 = vweird.f32 %v7220_v5 }
 0x2e0   : > { %v7169_v33 = vadd.f32 %v6949_v20, %v7114_v38  ;;  %v2417_v38 = vmul.f32 %v2416_v39, %v2392_v49  ;;  %v2507_v49 = vadd.f32 0.05243302, %v2506_v25  ;;  %v2445_v47 = vsub.f32 1.0, %v2444_v61 }
 0x2e1   : > { %v2622_v34 = vmul.f32 2.1237322e-06, %v7193_v17  ;;  %v2518_v25 = vadd.f32 0.112945676, %v2517_v12  ;;  %v2584_v45 = vmul.f32 %v2583_v40, %v7177_v63  ;;  %v2549_v61 = vadd.f32 0.18741608, %v2548_v22 }
 0x2e2   : > { %v4941_v41 = vclamps-f32 %v2417_v38, 1.0  ;;  %v7186_v15 = vmul.f32 0.70710677, %v7169_v33  ;;  %v2508_v55 = vmul.f32 %v2507_v49, %v7109_v10  ;;  %v2446_v39 = vmul.f32 %v7191_v36, %v2445_v47 }
 0x2e3   : > { %v7215_v38 = vmul.f32 0.5, %v7053_v51  ;;  %v2519_v7 = vmul.f32 %v2518_v25, %v7109_v10  ;;  %v2623_v60 = vadd.f32 0.00028619796, %v2622_v34  ;;  %v2556_v49 = vadd.f32 0.014752088, %v2555_v44 }
 0x2e4   : > { %v2903_v1 = vadd.f32 1.0, %v4941_v41  ;;  %v2660_v35 = vmul.f32 %v7186_v15, %v7186_v15  ;;  %v2509_v11 = vadd.f32 0.18741608, %v2508_v55  ;;  %v2471_v41 = vadd.f32 1.1283791, %v2470_v57 }
 0x2e5   : > { %v2447_v62 = vadd.f32 %v7191_v36, %v2446_v39  ;;  %v2520_v37 = vadd.f32 0.4994258, %v2519_v7  ;;  %v2557_v16 = vmul.f32 %v2556_v49, %v7125_v19  ;;  %v2585_v30 = vadd.f32 0.0036580483, %v2584_v45  ;;  %v5281_v40 = vpop.eup %5280 }
 0x2e6   : > { %v2919_v4 = vmul.f32 %v2903_v1, %v2231_v27  ;;  %v7207_v43 = vmin.f32 %v2660_v35, 16.0  ;;  %v7218_v27 = vmul.f32 0.5, %v7063_v46  ;;  %v2510_v46 = vmul.f32 %v2509_v11, %v7109_v10 }
 0x2e7   : > { %v7143_v52 = vpop.f32.mrf.mxu2  ;;  %v2454_v1 = vand.u32 2147483648, %v7171_v28  ;;  %v7241_v35 = vmul.f32 0.5, %v7083_v59  ;;  %v2624_v6 = vmul.f32 %v2623_v60, %v7193_v17  ;;  %v2451_v28 = vsel %vm7243_vm3, %v7191_v36, %v2447_v62 }
 0x2e8   : > { %v2933_v8 = vpack.c.bf16 %v2919_v4, %v2918_v56  ;;  %v2662_v51 = vmul.f32 2.1237322e-06, %v7207_v43  ;;  %v7233_v29 = vadd.f32 %v6949_v20, %v7143_v52  ;;  %v2594_v56 = vadd.f32 0.001143296, %v2593_v48 }
 0x2e9   : > { %v2432_v4 = vmul.f32 %v2431_v18, %v7057_v3  ;;  %v2521_v57 = vmul.f32 %v2520_v37, %v7109_v10  ;;  %v2472_v3 = vmul.f32 %v2471_v41, %v7070_v50  ;;  %v2511_v55 = vadd.f32 1.1283791, %v2510_v46 }
 0x2ea   : > { %3021 = vmatmul.bf16.gmra.mxu3 %v2933_v8  ;;  %v2663_v31 = vadd.f32 0.00028619796, %v2662_v51  ;;  %v7254_v59 = vmul.f32 0.70710677, %v7233_v29  ;;  %v2455_v8 = vor.u32 1.1754944e-38, %v2454_v1  ;;  %v2595_v23 = vmul.f32 %v2594_v56, %v7177_v63 }
 0x2eb   : > { %v7256_v54 = vadd.f32 1.0, %v2521_v57  ;;  %v2558_v12 = vadd.f32 0.112945676, %v2557_v16  ;;  %v2550_v42 = vmul.f32 %v2549_v61, %v7125_v19  ;;  %v2586_v36 = vmul.f32 %v2585_v30, %v7177_v63 }
 0x2ec   : > { %v2456_v10 = vsel %vm2453_vm4, %v2455_v8, %v2451_v28  ;;  %v2484_v50 = vmul.f32 %v5281_v40, %v7220_v5  ;;  %v2625_v34 = vadd.f32 0.0036580483, %v2624_v6  ;;  %v2664_v39 = vmul.f32 %v2663_v31, %v7207_v43 }
 0x2ed   : > { %5282 = vrcp.f32 %v7256_v54  ;;  %v7268_v25 = vmul.f32 %v2511_v55, %v7091_v53  ;;  %v2700_v44 = vmul.f32 %v7254_v59, %v7254_v59  ;;  %v2492_v11 = vand.u32 2147483647, %v7220_v5 }
 0x2ee   : > { %v2485_v18 = vsub.f32 1.0, %v2484_v50  ;;  %v2457_v41 = vmul.f32 %v2456_v10, %v2432_v4  ;;  %v2494_v7 = vand.u32 2147483648, %v7220_v5  ;;  %v2559_v48 = vmul.f32 %v2558_v12, %v7125_v19 }
 0x2ef   : > { %v7179_v13 = vpop.f32.mrf.mxu2  ;;  %v2596_v22 = vadd.f32 0.014752088, %v2595_v23  ;;  %v7275_v45 = vadd.f32 1.1283791, %v2550_v42  ;;  %v2587_v60 = vadd.f32 0.05243302, %v2586_v36  ;;  %vm2489_vm5 = vweird.f32 %v5281_v40 }
 0x2f0   : > { %v2486_v49 = vmul.f32 %v5281_v40, %v2485_v18  ;;  %v2626_v53 = vmul.f32 %v2625_v34, %v7193_v17  ;;  %v2665_v51 = vadd.f32 0.0036580483, %v2664_v39  ;;  %v7282_v1 = vmin.f32 %v2700_v44, 16.0  ;;  %vm2490_vm7 = vmor %vm2488_vm6, %vm2489_vm5 }
 0x2f1   : > { %v2597_v46 = vmul.f32 %v2596_v22, %v7177_v63  ;;  %v2560_v37 = vadd.f32 0.4994258, %v2559_v48  ;;  %v4942_v56 = vclamps-f32 %v2457_v41, 1.0  ;;  %vm2493_vm8 = vcmp.eq.f32.partialorder %v2492_v11, 8.507059e+37 }
 0x2f2   : > { %v2487_v0 = vadd.f32 %v5281_v40, %v2486_v49  ;;  %v2495_v4 = vor.u32 1.1754944e-38, %v2494_v7  ;;  %v2633_v31 = vmul.f32 3.8918573e-05, %v7193_v17  ;;  %v2666_v28 = vmul.f32 %v2665_v51, %v7207_v43 }
 0x2f3   : > { %v7285_v16 = vpop.eup %5282  ;;  %v2598_v61 = vadd.f32 0.112945676, %v2597_v46  ;;  %v2561_v6 = vmul.f32 %v2560_v37, %v7125_v19  ;;  %v7294_v5 = vadd.f32 %v6949_v20, %v7179_v13  ;;  %v2588_v19 = vmul.f32 %v2587_v60, %v7177_v63 }
 0x2f4   : > { %v2491_v30 = vsel %vm2490_vm7, %v5281_v40, %v2487_v0  ;;  %v2524_v52 = vmul.f32 %v7285_v16, %v7256_v54  ;;  %v2627_v23 = vadd.f32 0.05243302, %v2626_v53  ;;  %v2702_v42 = vmul.f32 2.1237322e-06, %v7282_v1 }
 0x2f5   : > { %v2496_v57 = vsel %vm2493_vm8, %v2495_v4, %v2491_v30  ;;  %v7298_v40 = vadd.f32 1.0, %v2561_v6  ;;  %v2599_v12 = vmul.f32 %v2598_v61, %v7177_v63  ;;  %v2904_v36 = vadd.f32 1.0, %v4942_v56 }
 0x2f6   : > { %v2497_v8 = vmul.f32 %v2496_v57, %v2472_v3  ;;  %v2634_v50 = vadd.f32 0.001143296, %v2633_v31  ;;  %v2667_v34 = vadd.f32 0.05243302, %v2666_v28  ;;  %v7306_v3 = vmul.f32 0.70710677, %v7294_v5 }
 0x2f7   : > { %v7209_v26 = vpop.f32.mrf.mxu2  ;;  %5284 = vrcp.f32 %v7298_v40  ;;  %vm2529_vm9 = vweird.f32 %v7285_v16  ;;  %v2600_v41 = vadd.f32 0.4994258, %v2599_v12  ;;  %v2703_v7 = vadd.f32 0.00028619796, %v2702_v42 }
 0x2f8   : > { %v4943_v10 = vclamps-f32 %v2497_v8, 1.0  ;;  %v7310_v39 = vadd.f32 %v6949_v20, %v7209_v26  ;;  %v2920_v48 = vmul.f32 %v2904_v36, %v7215_v38  ;;  %vm2528_vm10 = vweird.f32 %v7256_v54 }
 0x2f9   : > { %v2534_v22 = vand.u32 2147483648, %v7256_v54  ;;  %v2532_v26 = vand.u32 2147483647, %v7256_v54  ;;  %v2601_v53 = vmul.f32 %v2600_v41, %v7177_v63  ;;  %v2635_v51 = vmul.f32 %v2634_v50, %v7193_v17  ;;  %vm7332_vm11 = vmor %vm2528_vm10, %vm2529_vm9 }
 0x2fa   : > { %v2905_v18 = vadd.f32 1.0, %v4943_v10  ;;  %v2628_v46 = vmul.f32 %v2627_v23, %v7193_v17  ;;  %v2740_v0 = vmul.f32 %v7306_v3, %v7306_v3  ;;  %v7327_v38 = vmul.f32 0.70710677, %v7310_v39 }
 0x2fb   : > { %v7342_v30 = vadd.f32 1.0, %v2601_v53  ;;  %v2668_v6 = vmul.f32 %v2667_v34, %v7207_v43  ;;  %v2535_v31 = vor.u32 1.1754944e-38, %v2534_v22  ;;  %v2704_v57 = vmul.f32 %v2703_v7, %v7282_v1 }
 0x2fc   : > { %v2921_v60 = vmul.f32 %v2905_v18, %v7218_v27  ;;  %vm2533_vm12 = vcmp.eq.f32.partialorder %v2532_v26, 8.507059e+37  ;;  %v2636_v8 = vadd.f32 0.014752088, %v2635_v51  ;;  %v2629_v12 = vadd.f32 0.18741608, %v2628_v46 }
 0x2fd   : > { %v5285_v54 = vpop.eup %5284  ;;  %5286 = vrcp.f32 %v7342_v30  ;;  %v2572_v10 = vand.u32 2147483647, %v7298_v40  ;;  %v2673_v50 = vmul.f32 3.8918573e-05, %v7207_v43  ;;  %v2235_v41 = vmul.f32 0.5, %v7096_v58 }
 0x2fe   : > { %v2934_v56 = vpack.c.bf16 %v2921_v60, %v2920_v48  ;;  %v2564_v28 = vmul.f32 %v5285_v54, %v7298_v40  ;;  %vm2569_vm13 = vweird.f32 %v5285_v54  ;;  %v2669_v7 = vadd.f32 0.18741608, %v2668_v6 }
 0x2ff   : > { %v2223_v47 = vpop.f32.mrf.mxu2  ;;  %v2705_v48 = vadd.f32 0.0036580483, %v2704_v57  ;;  %vm2568_vm14 = vweird.f32 %v7298_v40  ;;  %v2674_v58 = vadd.f32 0.001143296, %v2673_v50  ;;  %vm2573_vm0 = vcmp.eq.f32.partialorder %v2572_v10, 8.507059e+37 }
 0x300   : > { %v7264_v2 = vadd.f32 %v6949_v20, %v2223_v47  ;;  %v2525_v47 = vsub.f32 1.0, %v2524_v52  ;;  %v2589_v52 = vadd.f32 0.18741608, %v2588_v19  ;;  %3026 = vmatmul.bf16.gmra.mxu3 %v2934_v56  ;;  %v7353_v19 = vmin.f32 %v2740_v0, 16.0  ;;  %vm2570_vm15 = vmor %vm2568_vm14, %vm2569_vm13 }
 0x301   : > { %v2706_v57 = vmul.f32 %v2705_v48, %v7282_v1  ;;  %vm2608_vm2 = vweird.f32 %v7342_v30 }
 0x302   : > { %v7279_v62 = vmul.f32 0.70710677, %v7264_v2  ;;  %v2526_v13 = vmul.f32 %v7285_v16, %v2525_v47  ;;  %v2565_v47 = vsub.f32 1.0, %v2564_v28  ;;  %v2742_v0 = vmul.f32 2.1237322e-06, %v7353_v19 }
 0x303   : > { %v7370_v53 = vpop.eup %5286 }
 0x304   : > { %v2820_v55 = vmul.f32 %v7279_v62, %v7279_v62  ;;  %v2527_v11 = vadd.f32 %v7285_v16, %v2526_v13  ;;  %v2566_v36 = vmul.f32 %v5285_v54, %v2565_v47  ;;  %v2574_v13 = vand.u32 2147483648, %v7298_v40 }
 0x305   : > { %v2604_v40 = vmul.f32 %v7370_v53, %v7342_v30  ;;  %v2630_v47 = vmul.f32 %v2629_v12, %v7193_v17  ;;  %vm2609_vm1 = vweird.f32 %v7370_v53 }
 0x306   : > { %v7312_v44 = vmin.f32 %v2820_v55, 16.0  ;;  %v2531_v4 = vsel %vm7332_vm11, %v7285_v16, %v2527_v11  ;;  %v2637_v11 = vmul.f32 %v2636_v8, %v7193_v17  ;;  %v2567_v26 = vadd.f32 %v5285_v54, %v2566_v36  ;;  %vm7406_vm3 = vmor %vm2608_vm2, %vm2609_vm1 }
 0x307   : > { %v2225_v49 = vpop.f32.mrf.mxu2  ;;  %v2536_v16 = vsel %vm2533_vm12, %v2535_v31, %v2531_v4  ;;  %v2575_v51 = vor.u32 1.1754944e-38, %v2574_v13  ;;  %v2605_v8 = vsub.f32 1.0, %v2604_v40 }
 0x308   : > { %v2833_v37 = vmul.f32 3.8918573e-05, %v7312_v44  ;;  %v7340_v61 = vadd.f32 %v6949_v20, %v2225_v49  ;;  %v2780_v20 = vmul.f32 %v7327_v38, %v7327_v38  ;;  %v2537_v34 = vmul.f32 %v2536_v16, %v7268_v25 }
 0x309   : > { %v2552_v25 = vmul.f32 %v7275_v45, %v7106_v32  ;;  %v2638_v46 = vadd.f32 0.112945676, %v2637_v11  ;;  %v2571_v27 = vsel %vm2570_vm15, %v5285_v54, %v2567_v26  ;;  %v2675_v45 = vmul.f32 %v2674_v58, %v7207_v43 }
 0x30a   : > { %v7348_v55 = vmul.f32 0.70710677, %v7340_v61  ;;  %v2834_v23 = vadd.f32 0.001143296, %v2833_v37  ;;  %v7365_v22 = vmin.f32 %v2780_v20, 16.0  ;;  %v4944_v37 = vclamps-f32 %v2537_v34, 1.0 }
 0x30b   : > { %v2576_v56 = vsel %vm2573_vm0, %v2575_v51, %v2571_v27  ;;  %v2639_v6 = vmul.f32 %v2638_v46, %v7193_v17  ;;  %v2713_v54 = vmul.f32 3.8918573e-05, %v7282_v1  ;;  %v2590_v16 = vmul.f32 %v2589_v52, %v7177_v63 }
 0x30c   : > { %v2860_v42 = vmul.f32 %v7348_v55, %v7348_v55  ;;  %v2835_v60 = vmul.f32 %v2834_v23, %v7312_v44  ;;  %v2782_v31 = vmul.f32 2.1237322e-06, %v7365_v22  ;;  %v2577_v32 = vmul.f32 %v2576_v56, %v2552_v25 }
 0x30d   : > { %v2640_v20 = vadd.f32 0.4994258, %v2639_v6  ;;  %v2606_v10 = vmul.f32 %v7370_v53, %v2605_v8  ;;  %v2676_v50 = vadd.f32 0.014752088, %v2675_v45  ;;  %v2670_v34 = vmul.f32 %v2669_v7, %v7207_v43 }
 0x30e   : > { %v7361_v18 = vmin.f32 %v2860_v42, 16.0  ;;  %v2836_v28 = vadd.f32 0.014752088, %v2835_v60  ;;  %v4945_v23 = vclamps-f32 %v2577_v32, 1.0  ;;  %v2906_v42 = vadd.f32 1.0, %v4944_v37 }
 0x30f   : > { %v2641_v13 = vmul.f32 %v2640_v20, %v7193_v17  ;;  %v2743_v11 = vadd.f32 0.00028619796, %v2742_v0  ;;  %v2714_v60 = vadd.f32 0.001143296, %v2713_v54  ;;  %v2707_v26 = vadd.f32 0.05243302, %v2706_v57 }
 0x310   : > { %v2873_v49 = vmul.f32 3.8918573e-05, %v7361_v18  ;;  %v2907_v48 = vadd.f32 1.0, %v4945_v23  ;;  %v2837_v63 = vmul.f32 %v2836_v28, %v7312_v44  ;;  %v2922_v12 = vmul.f32 %v2906_v42, %v7241_v35 }
 0x311   : > { %v7389_v52 = vadd.f32 1.0, %v2641_v13  ;;  %v2677_v51 = vmul.f32 %v2676_v50, %v7207_v43  ;;  %v2715_v46 = vmul.f32 %v2714_v60, %v7282_v1  ;;  %v2607_v58 = vadd.f32 %v7370_v53, %v2606_v10 }
 0x312   : > { %v2874_v4 = vadd.f32 0.001143296, %v2873_v49  ;;  %v2783_v49 = vadd.f32 0.00028619796, %v2782_v31  ;;  %v2923_v25 = vmul.f32 %v2907_v48, %v2235_v41  ;;  %v7398_v7 = vmul.f32 0.5, %v7135_v14 }
 0x313   : > { %5288 = vrcp.f32 %v7389_v52  ;;  %v2744_v0 = vmul.f32 %v2743_v11, %v7353_v19  ;;  %v2614_v35 = vand.u32 2147483648, %v7342_v30  ;;  %v2591_v41 = vadd.f32 1.1283791, %v2590_v16 }
 0x314   : > { %v2875_v36 = vmul.f32 %v2874_v4, %v7361_v18  ;;  %v2935_v37 = vpack.c.bf16 %v2923_v25, %v2922_v12  ;;  %v2838_v27 = vadd.f32 0.112945676, %v2837_v63  ;;  %v2612_v56 = vand.u32 2147483647, %v7342_v30 }
 0x315   : > { %v2708_v4 = vmul.f32 %v2707_v26, %v7282_v1  ;;  %v2784_v40 = vmul.f32 %v2783_v49, %v7365_v22  ;;  %v2678_v14 = vadd.f32 0.112945676, %v2677_v51  ;;  %v2716_v31 = vadd.f32 0.014752088, %v2715_v46 }
 0x316   : > { %v2876_v17 = vadd.f32 0.014752088, %v2875_v36  ;;  %3031 = vmatmul.bf16.gmra.mxu3 %v2935_v37  ;;  %v2631_v28 = vadd.f32 1.1283791, %v2630_v47  ;;  %v2671_v32 = vadd.f32 1.1283791, %v2670_v34  ;;  %v2611_v57 = vsel %vm7406_vm3, %v7370_v53, %v2607_v58 }
 0x317   : > { %v2745_v30 = vadd.f32 0.0036580483, %v2744_v0  ;;  %v2822_v8 = vmul.f32 2.1237322e-06, %v7312_v44  ;;  %v2615_v20 = vor.u32 1.1754944e-38, %v2614_v35  ;;  %v2679_v54 = vmul.f32 %v2678_v14, %v7207_v43 }
 0x318   : > { %v2877_v45 = vmul.f32 %v2876_v17, %v7361_v18  ;;  %v2839_v23 = vmul.f32 %v2838_v27, %v7312_v44  ;;  %vm2613_vm4 = vcmp.eq.f32.partialorder %v2612_v56, 8.507059e+37  ;;  %v2717_v42 = vmul.f32 %v2716_v31, %v7282_v1 }
 0x319   : > { %v5289_v16 = vpop.eup %5288  ;;  %v2753_v47 = vmul.f32 3.8918573e-05, %v7353_v19  ;;  %v2709_v36 = vadd.f32 0.18741608, %v2708_v4  ;;  %v2785_v10 = vadd.f32 0.0036580483, %v2784_v40  ;;  %v2616_v13 = vsel %vm2613_vm4, %v2615_v20, %v2611_v57 }
 0x31a   : > { %v2644_v50 = vmul.f32 %v5289_v16, %v7389_v52  ;;  %v2592_v53 = vmul.f32 %v2591_v41, %v7150_v24  ;;  %v2878_v34 = vadd.f32 0.112945676, %v2877_v45  ;;  %v2680_v11 = vadd.f32 0.4994258, %v2679_v54 }
 0x31b   : > { %v2718_v48 = vadd.f32 0.112945676, %v2717_v42  ;;  %v2632_v60 = vmul.f32 %v2631_v28, %v7165_v21  ;;  %v2823_v26 = vadd.f32 0.00028619796, %v2822_v8  ;;  %v2754_v63 = vadd.f32 0.001143296, %v2753_v47 }
 0x31c   : > { %v2645_v49 = vsub.f32 1.0, %v2644_v50  ;;  %v2840_v12 = vadd.f32 0.4994258, %v2839_v23  ;;  %v2617_v25 = vmul.f32 %v2616_v13, %v2592_v53  ;;  %v2652_v51 = vand.u32 2147483647, %v7389_v52 }
 0x31d   : > { %v2654_v46 = vand.u32 2147483648, %v7389_v52  ;;  %vm2649_vm5 = vweird.f32 %v5289_v16  ;;  %v2681_v58 = vmul.f32 %v2680_v11, %v7207_v43  ;;  %v2719_v24 = vmul.f32 %v2718_v48, %v7282_v1 }
 0x31e   : > { %v2646_v17 = vmul.f32 %v5289_v16, %v2645_v49  ;;  %v2862_v0 = vmul.f32 2.1237322e-06, %v7361_v18  ;;  %v2879_v37 = vmul.f32 %v2878_v34, %v7361_v18  ;;  %v2755_v21 = vmul.f32 %v2754_v63, %v7353_v19 }
 0x31f   : > { %v2793_v35 = vmul.f32 3.8918573e-05, %v7365_v22  ;;  %vm2648_vm6 = vweird.f32 %v7389_v52  ;;  %v7431_v27 = vadd.f32 1.0, %v2681_v58  ;;  %v2720_v56 = vadd.f32 0.4994258, %v2719_v24 }
 0x320   : > { %v2647_v41 = vadd.f32 %v5289_v16, %v2646_v17  ;;  %v2746_v4 = vmul.f32 %v2745_v30, %v7353_v19  ;;  %vm2650_vm7 = vmor %vm2648_vm6, %vm2649_vm5  ;;  %v2655_v43 = vor.u32 1.1754944e-38, %v2654_v46  ;;  %v2756_v40 = vadd.f32 0.014752088, %v2755_v21 }
 0x321   : > { %v2794_v6 = vadd.f32 0.001143296, %v2793_v35  ;;  %v4946_v14 = vclamps-f32 %v2617_v25, 1.0  ;;  %vm2653_vm8 = vcmp.eq.f32.partialorder %v2652_v51, 8.507059e+37  ;;  %5290 = vrcp.f32 %v7431_v27 }
 0x322   : > { %v2651_v31 = vsel %vm2650_vm7, %v5289_v16, %v2647_v41  ;;  %v2880_v28 = vadd.f32 0.4994258, %v2879_v37  ;;  %v2721_v57 = vmul.f32 %v2720_v56, %v7282_v1  ;;  %v2757_v52 = vmul.f32 %v2756_v40, %v7353_v19 }
 0x323   : > { %v2656_v45 = vsel %vm2653_vm8, %v2655_v43, %v2651_v31  ;;  %v2710_v8 = vmul.f32 %v2709_v36, %v7282_v1  ;;  %v2786_v20 = vmul.f32 %v2785_v10, %v7365_v22  ;;  %v2824_v30 = vmul.f32 %v2823_v26, %v7312_v44 }
 0x324   : > { %v2657_v54 = vmul.f32 %v2656_v45, %v2632_v60  ;;  %v2841_v23 = vmul.f32 %v2840_v12, %v7312_v44  ;;  %v7441_v42 = vadd.f32 1.0, %v2721_v57  ;;  %v2758_v16 = vadd.f32 0.112945676, %v2757_v52 }
 0x325   : > { %v2795_v47 = vmul.f32 %v2794_v6, %v7365_v22  ;;  %v2237_v13 = vmul.f32 0.5, %v7154_v9  ;;  %v2672_v50 = vmul.f32 %v2671_v32, %v7186_v15  ;;  %v2908_v34 = vadd.f32 1.0, %v4946_v14 }
 0x326   : > { %v4947_v53 = vclamps-f32 %v2657_v54, 1.0  ;;  %v2747_v11 = vadd.f32 0.05243302, %v2746_v4  ;;  %v2863_v1 = vadd.f32 0.00028619796, %v2862_v0  ;;  %v2881_v36 = vmul.f32 %v2880_v28, %v7361_v18 }
 0x327   : > { %5292 = vrcp.f32 %v7441_v42  ;;  %v5291_v10 = vpop.eup %5290  ;;  %v2711_v48 = vadd.f32 1.1283791, %v2710_v8  ;;  %v2759_v26 = vmul.f32 %v2758_v16, %v7353_v19  ;;  %v2796_v49 = vadd.f32 0.014752088, %v2795_v47 }
 0x328   : > { %v2909_v60 = vadd.f32 1.0, %v4947_v53  ;;  %v2787_v63 = vadd.f32 0.05243302, %v2786_v20  ;;  %v2825_v12 = vadd.f32 0.0036580483, %v2824_v30  ;;  %v7449_v25 = vadd.f32 1.0, %v2841_v23 }
 0x329   : > { %v2684_v9 = vmul.f32 %v5291_v10, %v7431_v27  ;;  %v2924_v15 = vmul.f32 %v2908_v34, %v7398_v7  ;;  %v2760_v51 = vadd.f32 0.4994258, %v2759_v26  ;;  %v2797_v46 = vmul.f32 %v2796_v49, %v7365_v22 }
 0x32a   : > { %v2925_v32 = vmul.f32 %v2909_v60, %v2237_v13  ;;  %v2748_v17 = vmul.f32 %v2747_v11, %v7353_v19  ;;  %v2864_v58 = vmul.f32 %v2863_v1, %v7361_v18  ;;  %v7456_v24 = vadd.f32 1.0, %v2881_v36 }
 0x32b   : > { %v2685_v0 = vsub.f32 1.0, %v2684_v9  ;;  %v2694_v21 = vand.u32 2147483648, %v7431_v27  ;;  %v2761_v35 = vmul.f32 %v2760_v51, %v7353_v19  ;;  %v2798_v41 = vadd.f32 0.112945676, %v2797_v46 }
 0x32c   : > { %v2936_v37 = vpack.c.bf16 %v2925_v32, %v2924_v15  ;;  %v2788_v7 = vmul.f32 %v2787_v63, %v7365_v22  ;;  %vm2689_vm9 = vweird.f32 %v5291_v10  ;;  %v2692_v43 = vand.u32 2147483647, %v7431_v27 }
 0x32d   : > { %v5293_v56 = vpop.eup %5292  ;;  %v2686_v4 = vmul.f32 %v5291_v10, %v2685_v0  ;;  %v2826_v40 = vmul.f32 %v2825_v12, %v7312_v44  ;;  %5294 = vrcp.f32 %v7449_v25  ;;  %v7465_v14 = vadd.f32 1.0, %v2761_v35 }
 0x32e   : > { %3036 = vmatmul.bf16.gmra.mxu3 %v2936_v37  ;;  %v2724_v6 = vmul.f32 %v5293_v56, %v7441_v42  ;;  %5296 = vrcp.f32 %v7456_v24  ;;  %vm2688_vm10 = vweird.f32 %v7431_v27  ;;  %v2799_v28 = vmul.f32 %v2798_v41, %v7365_v22 }
 0x32f   : > { %v2687_v31 = vadd.f32 %v5291_v10, %v2686_v4  ;;  %v2865_v45 = vadd.f32 0.0036580483, %v2864_v58  ;;  %vm2690_vm11 = vmor %vm2688_vm10, %vm2689_vm9  ;;  %v2695_v57 = vor.u32 1.1754944e-38, %v2694_v21  ;;  %5298 = vrcp.f32 %v7465_v14 }
 0x330   : > { %v2725_v52 = vsub.f32 1.0, %v2724_v6  ;;  %vm2693_vm12 = vcmp.eq.f32.partialorder %v2692_v43, 8.507059e+37  ;;  %v2734_v20 = vand.u32 2147483648, %v7441_v42  ;;  %v2800_v30 = vadd.f32 0.4994258, %v2799_v28 }
 0x331   : > { %v2691_v8 = vsel %vm2690_vm11, %v5291_v10, %v2687_v31  ;;  %vm2729_vm13 = vweird.f32 %v5293_v56  ;;  %v2732_v16 = vand.u32 2147483647, %v7441_v42  ;;  %v2749_v47 = vadd.f32 0.18741608, %v2748_v17 }
 0x332   : > { %v2696_v54 = vsel %vm2693_vm12, %v2695_v57, %v2691_v8  ;;  %v2726_v23 = vmul.f32 %v5293_v56, %v2725_v52  ;;  %v2801_v13 = vmul.f32 %v2800_v30, %v7365_v22  ;;  %v2866_v34 = vmul.f32 %v2865_v45, %v7361_v18 }
 0x333   : > { %v2697_v27 = vmul.f32 %v2696_v54, %v2672_v50  ;;  %v7474_v53 = vpop.eup %5294  ;;  %vm2728_vm14 = vweird.f32 %v7441_v42  ;;  %v2712_v36 = vmul.f32 %v2711_v48, %v7254_v59  ;;  %v2789_v10 = vadd.f32 0.18741608, %v2788_v7 }
 0x334   : > { %v2727_v11 = vadd.f32 %v5293_v56, %v2726_v23  ;;  %v7478_v1 = vpop.eup %5296  ;;  %vm2730_vm15 = vmor %vm2728_vm14, %vm2729_vm13  ;;  %v2735_v60 = vor.u32 1.1754944e-38, %v2734_v20  ;;  %v7481_v26 = vadd.f32 1.0, %v2801_v13  ;;  %v2827_v50 = vadd.f32 0.05243302, %v2826_v40 }
 0x335   : > { %v5299_v49 = vpop.eup %5298  ;;  %v4948_v63 = vclamps-f32 %v2697_v27, 1.0  ;;  %vm2733_vm0 = vcmp.eq.f32.partialorder %v2732_v16, 8.507059e+37  ;;  %v2750_v9 = vmul.f32 %v2749_v47, %v7353_v19  ;;  %v2844_v42 = vmul.f32 %v7474_v53, %v7449_v25 }
 0x336   : > { %v2731_v12 = vsel %vm2730_vm15, %v5293_v56, %v2727_v11  ;;  %v2764_v32 = vmul.f32 %v5299_v49, %v7465_v14  ;;  %v2867_v51 = vadd.f32 0.05243302, %v2866_v34  ;;  %5300 = vrcp.f32 %v7481_v26 }
 0x337   : > { %v2736_v15 = vsel %vm2733_vm0, %v2735_v60, %v2731_v12  ;;  %v2238_v48 = vmul.f32 0.5, %v7169_v33  ;;  %v2790_v46 = vmul.f32 %v2789_v10, %v7365_v22  ;;  %v2884_v17 = vmul.f32 %v7478_v1, %v7456_v24  ;;  %v5119_v60 = vld [vmem:[%s8655_s9 + $0x38] sm:$0xff] }
 0x338   : > { %v2737_v59 = vmul.f32 %v2736_v15, %v2712_v36  ;;  %v2765_v58 = vsub.f32 1.0, %v2764_v32  ;;  %v2828_v19 = vmul.f32 %v2827_v50, %v7312_v44  ;;  %v2910_v37 = vadd.f32 1.0, %v4948_v63  ;;  %3837 = vmatpush.bf16.msrb.mxu0 %v5119_v60 }
 0x339   : > { %v2774_v21 = vand.u32 2147483648, %v7465_v14  ;;  %v2239_v35 = vmul.f32 0.5, %v7233_v29  ;;  %vm2769_vm1 = vweird.f32 %v5299_v49  ;;  %v2772_v56 = vand.u32 2147483647, %v7465_v14 }
 0x33a   : > { %v4949_v0 = vclamps-f32 %v2737_v59, 1.0  ;;  %v2766_v41 = vmul.f32 %v5299_v49, %v2765_v58  ;;  %v2751_v7 = vadd.f32 1.1283791, %v2750_v9  ;;  %v2845_v33 = vsub.f32 1.0, %v2844_v42 }
 0x33b   : > { %v2868_v22 = vmul.f32 %v2867_v51, %v7361_v18  ;;  %v2791_v43 = vadd.f32 1.1283791, %v2790_v46  ;;  %v2885_v40 = vsub.f32 1.0, %v2884_v17  ;;  %vm2768_vm2 = vweird.f32 %v7465_v14 }
 0x33c   : > { %v2911_v4 = vadd.f32 1.0, %v4949_v0  ;;  %v2767_v6 = vadd.f32 %v5299_v49, %v2766_v41  ;;  %v5301_v31 = vpop.eup %5300  ;;  %v2829_v28 = vadd.f32 0.18741608, %v2828_v19  ;;  %v2926_v45 = vmul.f32 %v2910_v37, %v2238_v48  ;;  %vm2770_vm3 = vmor %vm2768_vm2, %vm2769_vm1 }
 0x33d   : > { %v2775_v29 = vor.u32 1.1754944e-38, %v2774_v21  ;;  %vm2773_vm4 = vcmp.eq.f32.partialorder %v2772_v56, 8.507059e+37  ;;  %v2804_v8 = vmul.f32 %v5301_v31, %v7481_v26  ;;  %v2846_v20 = vmul.f32 %v7474_v53, %v2845_v33 }
 0x33e   : > { %v2927_v57 = vmul.f32 %v2911_v4, %v2239_v35  ;;  %v2771_v52 = vsel %vm2770_vm3, %v5299_v49, %v2767_v6  ;;  %v2869_v30 = vadd.f32 0.18741608, %v2868_v22  ;;  %v2752_v16 = vmul.f32 %v2751_v7, %v7306_v3  ;;  %v7512_v3 = vld [vmem:[%s8654_s8] ss:$0 sm:$0xff] }
 0x33f   : > { %v2776_v23 = vsel %vm2773_vm4, %v2775_v29, %v2771_v52  ;;  %v2886_v47 = vmul.f32 %v7478_v1, %v2885_v40  ;;  %v2805_v14 = vsub.f32 1.0, %v2804_v8  ;;  %v2792_v27 = vmul.f32 %v2791_v43, %v7327_v38  ;;  %v3017_v38 = vpop.f32.mrf.mxu3 }
 0x340   : > { %v2937_v54 = vpack.c.bf16 %v2927_v57, %v2926_v45  ;;  %v2830_v13 = vmul.f32 %v2829_v28, %v7312_v44  ;;  %v2814_v34 = vand.u32 2147483648, %v7481_v26  ;;  %v2777_v11 = vmul.f32 %v2776_v23, %v2752_v16 }
 0x341   : > { %v2806_v36 = vmul.f32 %v5301_v31, %v2805_v14  ;;  %vm2809_vm5 = vweird.f32 %v5301_v31  ;;  %v2812_v10 = vand.u32 2147483647, %v7481_v26  ;;  %v2847_v44 = vadd.f32 %v7474_v53, %v2846_v20 }
 0x342   : > { %3041 = vmatmul.bf16.gmra.mxu3 %v2937_v54  ;;  %vm2849_vm6 = vweird.f32 %v7474_v53  ;;  %v2870_v49 = vmul.f32 %v2869_v30, %v7361_v18  ;;  %vm2889_vm7 = vweird.f32 %v7478_v1  ;;  %v2887_v50 = vadd.f32 %v7478_v1, %v2886_v47 }
 0x343   : > { %v2807_v63 = vadd.f32 %v5301_v31, %v2806_v36  ;;  %vm2808_vm8 = vweird.f32 %v7481_v26  ;;  %v7521_v12 = vadd.f32 %v7512_v3, %v3017_v38  ;;  %vm2888_vm9 = vweird.f32 %v7456_v24 }
 0x344   : > { %v2892_v9 = vand.u32 2147483647, %v7456_v24  ;;  %v2894_v15 = vand.u32 2147483648, %v7456_v24  ;;  %vm2810_vm10 = vmor %vm2808_vm8, %vm2809_vm5  ;;  %v2815_v18 = vor.u32 1.1754944e-38, %v2814_v34  ;;  %v4950_v32 = vclamps-f32 %v2777_v11, 1.0 }
 0x345   : > { %v2811_v42 = vsel %vm2810_vm10, %v5301_v31, %v2807_v63  ;;  %vm2813_vm11 = vcmp.eq.f32.partialorder %v2812_v10, 8.507059e+37  ;;  %v7528_v51 = vmul.f32 0.70710677, %v7521_v12  ;;  %vm2848_vm12 = vweird.f32 %v7449_v25  ;;  %vm7535_vm13 = vmor %vm2888_vm9, %vm2889_vm7 }
 0x346   : > { %v2852_v26 = vand.u32 2147483647, %v7449_v25  ;;  %v2854_v59 = vand.u32 2147483648, %v7449_v25  ;;  %v2816_v24 = vsel %vm2813_vm11, %v2815_v18, %v2811_v42  ;;  %vm7541_vm14 = vmor %vm2848_vm12, %vm2849_vm6  ;;  %v2871_v17 = vadd.f32 1.1283791, %v2870_v49 }
 0x347   : > { %v2891_v58 = vsel %vm7535_vm13, %v7478_v1, %v2887_v50  ;;  %v2817_v19 = vmul.f32 %v2816_v24, %v2792_v27  ;;  %v3089_v25 = vmul.f32 %v7528_v51, %v7528_v51  ;;  %v2831_v0 = vadd.f32 1.1283791, %v2830_v13  ;;  %v3019_v16 = vpop.f32.mrf.mxu3 }
 0x348   : > { %v2851_v37 = vsel %vm7541_vm14, %v7474_v53, %v2847_v44  ;;  %v2895_v21 = vor.u32 1.1754944e-38, %v2894_v15  ;;  %vm2893_vm15 = vcmp.eq.f32.partialorder %v2892_v9, 8.507059e+37  ;;  %v2912_v41 = vadd.f32 1.0, %v4950_v32 }
 0x349   : > { %v4951_v35 = vclamps-f32 %v2817_v19, 1.0  ;;  %v7553_v56 = vmin.f32 %v3089_v25, 16.0  ;;  %v2240_v7 = vmul.f32 0.5, %v7294_v5  ;;  %v2241_v33 = vmul.f32 0.5, %v7310_v39 }
 0x34a   : > { %v2855_v1 = vor.u32 1.1754944e-38, %v2854_v59  ;;  %v2896_v22 = vsel %vm2893_vm15, %v2895_v21, %v2891_v58  ;;  %vm2853_vm0 = vcmp.eq.f32.partialorder %v2852_v26, 8.507059e+37  ;;  %v2872_v4 = vmul.f32 %v2871_v17, %v7348_v55 }
 0x34b   : > { %v2913_v43 = vadd.f32 1.0, %v4951_v35  ;;  %v3102_v40 = vmul.f32 3.8918573e-05, %v7553_v56  ;;  %v2832_v53 = vmul.f32 %v2831_v0, %v7279_v62  ;;  %v2928_v28 = vmul.f32 %v2912_v41, %v2240_v7  ;;  %v5118_v62 = vld [vmem:[%s8655_s9 + $0x30] sm:$0xff] }
 0x34c   : > { %v2856_v6 = vsel %vm2853_vm0, %v2855_v1, %v2851_v37  ;;  %v2897_v31 = vmul.f32 %v2896_v22, %v2872_v4  ;;  %v3091_v54 = vmul.f32 2.1237322e-06, %v7553_v56  ;;  %v2243_v14 = vmul.f32 0.5, %v7340_v61  ;;  %3838 = vmatpush.bf16.msrb.mxu0 %v5118_v62 }
 0x34d   : > { %v2929_v45 = vmul.f32 %v2913_v43, %v2241_v33  ;;  %v3103_v57 = vadd.f32 0.001143296, %v3102_v40  ;;  %v2857_v29 = vmul.f32 %v2856_v6, %v2832_v53  ;;  %v7569_v13 = vadd.f32 %v7512_v3, %v3019_v16  ;;  %v5117_v33 = vld [vmem:[%s8655_s9 + $0x28] sm:$0xff]  ;;  %v5116_v6 = vld [vmem:[%s8655_s9 + $0x20] sm:$0xff] }
 0x34e   : > { %v4953_v39 = vclamps-f32 %v2897_v31, 1.0  ;;  %v2242_v34 = vmul.f32 0.5, %v7264_v2  ;;  %v3092_v36 = vadd.f32 0.00028619796, %v3091_v54 }
 0x34f   : > { %v2938_v52 = vpack.c.bf16 %v2929_v45, %v2928_v28  ;;  %v3104_v5 = vmul.f32 %v3103_v57, %v7553_v56  ;;  %v4952_v20 = vclamps-f32 %v2857_v29, 1.0  ;;  %v7573_v60 = vmul.f32 0.70710677, %v7569_v13 }
 0x350   : > { %v2915_v30 = vadd.f32 1.0, %v4953_v39  ;;  %v3093_v50 = vmul.f32 %v3092_v36, %v7553_v56  ;;  %3839 = vmatpush.bf16.msrb.mxu0 %v5117_v33 }
 0x351   : > { %v3105_v8 = vadd.f32 0.014752088, %v3104_v5  ;;  %v2914_v47 = vadd.f32 1.0, %v4952_v20  ;;  %v3129_v61 = vmul.f32 %v7573_v60, %v7573_v60 }
 0x352   : > { %3046 = vmatmul.bf16.gmra.mxu3 %v2938_v52  ;;  %v2931_v11 = vmul.f32 %v2915_v30, %v2243_v14  ;;  %v3094_v18 = vadd.f32 0.0036580483, %v3093_v50 }
 0x353   : > { %v3106_v55 = vmul.f32 %v3105_v8, %v7553_v56  ;;  %v2930_v38 = vmul.f32 %v2914_v47, %v2242_v34  ;;  %v7581_v9 = vmin.f32 %v3129_v61, 16.0 }
 0x354   : > { %v3095_v46 = vmul.f32 %v3094_v18, %v7553_v56  ;;  %3840 = vmatpush.bf16.msrb.mxu0 %v5116_v6 }
 0x355   : > { %v3107_v23 = vadd.f32 0.112945676, %v3106_v55  ;;  %v2939_v49 = vpack.c.bf16 %v2931_v11, %v2930_v38  ;;  %v3131_v2 = vmul.f32 2.1237322e-06, %v7581_v9  ;;  %v3142_v15 = vmul.f32 3.8918573e-05, %v7581_v9 }
 0x356   : > { %v3096_v37 = vadd.f32 0.05243302, %v3095_v46  ;;  %v5115_v55 = vld [vmem:[%s8655_s9 + $0x18] sm:$0xff] }
 0x357   : > { %v3108_v27 = vmul.f32 %v3107_v23, %v7553_v56  ;;  %v3132_v32 = vadd.f32 0.00028619796, %v3131_v2  ;;  %v3143_v42 = vadd.f32 0.001143296, %v3142_v15 }
 0x358   : > { %v3097_v40 = vmul.f32 %v3096_v37, %v7553_v56  ;;  %3841 = vmatpush.bf16.msrb.mxu0 %v5115_v55 }
 0x359   : > { %v3109_v10 = vadd.f32 0.4994258, %v3108_v27  ;;  %v3133_v59 = vmul.f32 %v3132_v32, %v7581_v9  ;;  %v3144_v48 = vmul.f32 %v3143_v42, %v7581_v9 }
 0x35a   : > { %v3098_v39 = vadd.f32 0.18741608, %v3097_v40 }
 0x35b   : > { %v3110_v44 = vmul.f32 %v3109_v10, %v7553_v56  ;;  %v3134_v17 = vadd.f32 0.0036580483, %v3133_v59  ;;  %v3145_v58 = vadd.f32 0.014752088, %v3144_v48 }
 0x35c   : > { %v3099_v14 = vmul.f32 %v3098_v39, %v7553_v56 }
 0x35d   : > { %v7579_v63 = vadd.f32 1.0, %v3110_v44  ;;  %v3146_v0 = vmul.f32 %v3145_v58, %v7581_v9  ;;  %v3135_v41 = vmul.f32 %v3134_v17, %v7581_v9 }
 0x35e   : > { %v3100_v2 = vadd.f32 1.1283791, %v3099_v14 }
 0x35f   : > { %5302 = vrcp.f32 %v7579_v63  ;;  %v3147_v7 = vadd.f32 0.112945676, %v3146_v0  ;;  %v3136_v45 = vadd.f32 0.05243302, %v3135_v41  ;;  %v3123_v44 = vand.u32 2147483648, %v7579_v63 }
 0x360   : > { %vm3117_vm2 = vweird.f32 %v7579_v63  ;;  %v3121_v56 = vand.u32 2147483647, %v7579_v63 }
 0x361   : > { %v3148_v4 = vmul.f32 %v3147_v7, %v7581_v9  ;;  %v3137_v23 = vmul.f32 %v3136_v45, %v7581_v9  ;;  %v3124_v46 = vor.u32 1.1754944e-38, %v3123_v44  ;;  %v5113_v44 = vld [vmem:[%s8655_s9 + $0x8] sm:$0xff] }
 0x362   : > { %3051 = vmatmul.bf16.gmra.mxu3 %v2939_v49  ;;  %vm3122_vm4 = vcmp.eq.f32.partialorder %v3121_v56, 8.507059e+37 }
 0x363   : > { %v3149_v57 = vadd.f32 0.4994258, %v3148_v4  ;;  %v3138_v36 = vadd.f32 0.18741608, %v3137_v23 }
 0x365   : > { %v7592_v19 = vpop.eup %5302  ;;  %v3150_v5 = vmul.f32 %v3149_v57, %v7581_v9  ;;  %v3139_v59 = vmul.f32 %v3138_v36, %v7581_v9 }
 0x366   : > { %v3113_v35 = vmul.f32 %v7592_v19, %v7579_v63  ;;  %vm3118_vm1 = vweird.f32 %v7592_v19 }
 0x367   : > { %v3151_v62 = vadd.f32 1.0, %v3150_v5  ;;  %vm7644_vm3 = vmor %vm3117_vm2, %vm3118_vm1  ;;  %v3140_v33 = vadd.f32 1.1283791, %v3139_v59 }
 0x368   : > { %v3114_v28 = vsub.f32 1.0, %v3113_v35 }
 0x369   : > { %5304 = vrcp.f32 %v3151_v62  ;;  %v3161_v40 = vand.u32 2147483647, %v3151_v62  ;;  %vm3157_vm6 = vweird.f32 %v3151_v62 }
 0x36a   : > { %v3115_v54 = vmul.f32 %v7592_v19, %v3114_v28 }
 0x36b   : > { %vm3162_vm8 = vcmp.eq.f32.partialorder %v3161_v40, 8.507059e+37 }
 0x36c   : > { %v3116_v11 = vadd.f32 %v7592_v19, %v3115_v54 }
 0x36d   : > { %v3022_v26 = vpop.f32.mrf.mxu3 }
 0x36e   : > { %v7589_v24 = vadd.f32 %v7512_v3, %v3022_v26  ;;  %v3120_v26 = vsel %vm7644_vm3, %v7592_v19, %v3116_v11  ;;  %v3163_v19 = vand.u32 2147483648, %v3151_v62 }
 0x36f   : > { %v5305_v42 = vpop.eup %5304  ;;  %v3125_v35 = vsel %vm3122_vm4, %v3124_v46, %v3120_v26  ;;  %v5112_v46 = vld [vmem:[%s8655_s9] sm:$0xff] }
 0x370   : > { %v7595_v25 = vmul.f32 0.70710677, %v7589_v24  ;;  %v3153_v17 = vmul.f32 %v5305_v42, %v3151_v62  ;;  %vm3158_vm5 = vweird.f32 %v5305_v42  ;;  %v3164_v5 = vor.u32 1.1754944e-38, %v3163_v19 }
 0x371   : > { %vm3159_vm7 = vmor %vm3157_vm6, %vm3158_vm5 }
 0x372   : > { %v3169_v21 = vmul.f32 %v7595_v25, %v7595_v25  ;;  %v3154_v41 = vsub.f32 1.0, %v3153_v17 }
 0x374   : > { %v7606_v1 = vmin.f32 %v3169_v21, 16.0  ;;  %v3101_v21 = vmul.f32 %v3100_v2, %v7528_v51  ;;  %v3155_v4 = vmul.f32 %v5305_v42, %v3154_v41  ;;  %v5114_v51 = vld [vmem:[%s8655_s9 + $0x10] sm:$0xff]  ;;  %v3057_v2 = vmul.f32 0.5, %v7521_v12 }
 0x375   : > { %v3024_v22 = vpop.f32.mrf.mxu3  ;;  %3842 = vmatpush.bf16.msrb.mxu0 %v5114_v51 }
 0x376   : > { %v7610_v43 = vadd.f32 %v7512_v3, %v3024_v22  ;;  %v3171_v53 = vmul.f32 2.1237322e-06, %v7606_v1  ;;  %v3182_v31 = vmul.f32 3.8918573e-05, %v7606_v1  ;;  %v3126_v6 = vmul.f32 %v3125_v35, %v3101_v21 }
 0x377   : > { %v3156_v45 = vadd.f32 %v5305_v42, %v3155_v4 }
 0x378   : > { %v7619_v29 = vmul.f32 0.70710677, %v7610_v43  ;;  %v3183_v52 = vadd.f32 0.001143296, %v3182_v31  ;;  %v3172_v8 = vadd.f32 0.00028619796, %v3171_v53 }
 0x379   : > { %v3160_v39 = vsel %vm3159_vm7, %v5305_v42, %v3156_v45  ;;  %3843 = vmatpush.bf16.msrb.mxu0 %v5113_v44 }
 0x37a   : > { %v3209_v20 = vmul.f32 %v7619_v29, %v7619_v29  ;;  %v3184_v30 = vmul.f32 %v3183_v52, %v7606_v1  ;;  %v3173_v27 = vmul.f32 %v3172_v8, %v7606_v1  ;;  %v3141_v52 = vmul.f32 %v3140_v33, %v7573_v60 }
 0x37b   : > { %v3165_v54 = vsel %vm3162_vm8, %v3164_v5, %v3160_v39 }
 0x37c   : > { %v7630_v16 = vmin.f32 %v3209_v20, 16.0  ;;  %v3185_v47 = vadd.f32 0.014752088, %v3184_v30  ;;  %v3174_v18 = vadd.f32 0.0036580483, %v3173_v27  ;;  %v4986_v30 = vclamps-f32 %v3126_v6, 1.0 }
 0x37d   : > { %v3166_v62 = vmul.f32 %v3165_v54, %v3141_v52  ;;  %3844 = vmatpush.bf16.msrb.mxu0 %v5112_v46 }
 0x37e   : > { %v3211_v34 = vmul.f32 2.1237322e-06, %v7630_v16  ;;  %v3186_v10 = vmul.f32 %v3185_v47, %v7606_v1  ;;  %v3222_v38 = vmul.f32 3.8918573e-05, %v7630_v16  ;;  %v3175_v7 = vmul.f32 %v3174_v18, %v7606_v1 }
 0x37f   : > { %v4987_v27 = vclamps-f32 %v3166_v62, 1.0 }
 0x380   : > { %v3212_v61 = vadd.f32 0.00028619796, %v3211_v34  ;;  %v3187_v49 = vadd.f32 0.112945676, %v3186_v10  ;;  %v3223_v50 = vadd.f32 0.001143296, %v3222_v38 }
 0x381   : > { %v3176_v57 = vadd.f32 0.05243302, %v3175_v7  ;;  %v3729_v10 = vadd.f32 1.0, %v4986_v30  ;;  %v3730_v56 = vadd.f32 1.0, %v4987_v27 }
 0x382   : > { %v3213_v32 = vmul.f32 %v3212_v61, %v7630_v16  ;;  %v3188_v63 = vmul.f32 %v3187_v49, %v7606_v1  ;;  %v3224_v48 = vmul.f32 %v3223_v50, %v7630_v16  ;;  %v3058_v61 = vmul.f32 0.5, %v7569_v13 }
 0x383   : > { %v3027_v20 = vpop.f32.mrf.mxu3  ;;  %v3177_v47 = vmul.f32 %v3176_v57, %v7606_v1 }
 0x384   : > { %v3214_v58 = vadd.f32 0.0036580483, %v3213_v32  ;;  %v3189_v0 = vadd.f32 0.4994258, %v3188_v63  ;;  %v3225_v37 = vadd.f32 0.014752088, %v3224_v48  ;;  %v7669_v23 = vadd.f32 %v7512_v3, %v3027_v20 }
 0x385   : > { %v3178_v49 = vadd.f32 0.18741608, %v3177_v47  ;;  %v3746_v32 = vmul.f32 %v3730_v56, %v3058_v61  ;;  %v3745_v63 = vmul.f32 %v3729_v10, %v3057_v2 }
 0x386   : > { %v3190_v9 = vmul.f32 %v3189_v0, %v7606_v1  ;;  %v3226_v22 = vmul.f32 %v3225_v37, %v7630_v16  ;;  %v3215_v53 = vmul.f32 %v3214_v58, %v7630_v16  ;;  %v7673_v14 = vmul.f32 0.70710677, %v7669_v23 }
 0x387   : > { %v3179_v12 = vmul.f32 %v3178_v49, %v7606_v1  ;;  %v3761_v41 = vpack.c.bf16 %v3746_v32, %v3745_v63 }
 0x388   : > { %v7663_v31 = vadd.f32 1.0, %v3190_v9  ;;  %v3227_v28 = vadd.f32 0.112945676, %v3226_v22  ;;  %v3216_v8 = vadd.f32 0.05243302, %v3215_v53  ;;  %v3249_v38 = vmul.f32 %v7673_v14, %v7673_v14 }
 0x389   : > { %v3180_v9 = vadd.f32 1.1283791, %v3179_v12  ;;  %3845 = vmatmul.bf16.vlgmr.msrb.gmra.mxu0 %v3761_v41  ;;  %v3059_v41 = vmul.f32 0.5, %v7589_v24 }
 0x38a   : > { %5306 = vrcp.f32 %v7663_v31  ;;  %v3228_v55 = vmul.f32 %v3227_v28, %v7630_v16  ;;  %v3217_v34 = vmul.f32 %v3216_v8, %v7630_v16  ;;  %v7685_v15 = vmin.f32 %v3249_v38, 16.0 }
 0x38b   : > { %v3029_v26 = vpop.f32.mrf.mxu3  ;;  %vm3197_vm10 = vweird.f32 %v7663_v31  ;;  %v3203_v21 = vand.u32 2147483648, %v7663_v31  ;;  %v3201_v33 = vand.u32 2147483647, %v7663_v31  ;;  %v3181_v5 = vmul.f32 %v3180_v9, %v7595_v25 }
 0x38c   : > { %v3229_v60 = vadd.f32 0.4994258, %v3228_v55  ;;  %v3218_v42 = vadd.f32 0.18741608, %v3217_v34  ;;  %v3251_v48 = vmul.f32 2.1237322e-06, %v7685_v15  ;;  %v7691_v13 = vadd.f32 %v7512_v3, %v3029_v26 }
 0x38d   : > { %v3262_v58 = vmul.f32 3.8918573e-05, %v7685_v15  ;;  %v3204_v6 = vor.u32 1.1754944e-38, %v3203_v21  ;;  %vm3202_vm12 = vcmp.eq.f32.partialorder %v3201_v33, 8.507059e+37 }
 0x38e   : > { %v3230_v11 = vmul.f32 %v3229_v60, %v7630_v16  ;;  %v3252_v0 = vadd.f32 0.00028619796, %v3251_v48  ;;  %v7700_v37 = vmul.f32 0.70710677, %v7691_v13  ;;  %v3219_v35 = vmul.f32 %v3218_v42, %v7630_v16 }
 0x38f   : > { %v3263_v19 = vadd.f32 0.001143296, %v3262_v58 }
 0x390   : > { %v5307_v36 = vpop.eup %5306  ;;  %v7687_v18 = vadd.f32 1.0, %v3230_v11  ;;  %v3289_v1 = vmul.f32 %v7700_v37, %v7700_v37  ;;  %v3253_v40 = vmul.f32 %v3252_v0, %v7685_v15  ;;  %v3220_v51 = vadd.f32 1.1283791, %v3219_v35 }
 0x391   : > { %v3193_v50 = vmul.f32 %v5307_v36, %v7663_v31  ;;  %vm3198_vm9 = vweird.f32 %v5307_v36  ;;  %v3264_v16 = vmul.f32 %v3263_v19, %v7685_v15 }
 0x392   : > { %5308 = vrcp.f32 %v7687_v18  ;;  %vm3199_vm11 = vmor %vm3197_vm10, %vm3198_vm9  ;;  %v7709_v53 = vmin.f32 %v3289_v1, 16.0  ;;  %v3241_v8 = vand.u32 2147483647, %v7687_v18  ;;  %v3243_v20 = vand.u32 2147483648, %v7687_v18 }
 0x393   : > { %v3194_v59 = vsub.f32 1.0, %v3193_v50  ;;  %v3265_v57 = vadd.f32 0.014752088, %v3264_v16  ;;  %v3254_v55 = vadd.f32 0.0036580483, %v3253_v40  ;;  %v3221_v34 = vmul.f32 %v3220_v51, %v7619_v29 }
 0x394   : > { %v3291_v28 = vmul.f32 2.1237322e-06, %v7709_v53  ;;  %v3302_v52 = vmul.f32 3.8918573e-05, %v7709_v53  ;;  %vm3237_vm14 = vweird.f32 %v7687_v18  ;;  %vm3242_vm15 = vcmp.eq.f32.partialorder %v3241_v8, 8.507059e+37 }
 0x395   : > { %v3195_v17 = vmul.f32 %v5307_v36, %v3194_v59  ;;  %v3266_v54 = vmul.f32 %v3265_v57, %v7685_v15  ;;  %v3255_v44 = vmul.f32 %v3254_v55, %v7685_v15  ;;  %v3244_v56 = vor.u32 1.1754944e-38, %v3243_v20 }
 0x396   : > { %v3292_v30 = vadd.f32 0.00028619796, %v3291_v28  ;;  %v3303_v62 = vadd.f32 0.001143296, %v3302_v52 }
 0x397   : > { %v3196_v7 = vadd.f32 %v5307_v36, %v3195_v17  ;;  %v3256_v48 = vadd.f32 0.05243302, %v3255_v44 }
 0x398   : > { %v5309_v4 = vpop.eup %5308  ;;  %v3293_v11 = vmul.f32 %v3292_v30, %v7709_v53  ;;  %v3304_v38 = vmul.f32 %v3303_v62, %v7709_v53 }
 0x399   : > { %v3200_v22 = vsel %vm3199_vm11, %v5307_v36, %v3196_v7  ;;  %v3233_v31 = vmul.f32 %v5309_v4, %v7687_v18  ;;  %v3032_v47 = vpop.f32.mrf.mxu3  ;;  %vm3238_vm13 = vweird.f32 %v5309_v4  ;;  %v3267_v36 = vadd.f32 0.112945676, %v3266_v54 }
 0x39a   : > { %v3205_v45 = vsel %vm3202_vm12, %v3204_v6, %v3200_v22  ;;  %v7722_v25 = vadd.f32 %v7512_v3, %v3032_v47  ;;  %v3294_v61 = vadd.f32 0.0036580483, %v3293_v11  ;;  %vm3239_vm0 = vmor %vm3237_vm14, %vm3238_vm13  ;;  %v3305_v32 = vadd.f32 0.014752088, %v3304_v38 }
 0x39b   : > { %v3234_v39 = vsub.f32 1.0, %v3233_v31  ;;  %v3206_v60 = vmul.f32 %v3205_v45, %v3181_v5  ;;  %v3268_v49 = vmul.f32 %v3267_v36, %v7685_v15  ;;  %v3060_v7 = vmul.f32 0.5, %v7610_v43 }
 0x39c   : > { %v7729_v29 = vmul.f32 0.70710677, %v7722_v25  ;;  %v3306_v63 = vmul.f32 %v3305_v32, %v7709_v53  ;;  %v3295_v46 = vmul.f32 %v3294_v61, %v7709_v53  ;;  %v3257_v40 = vmul.f32 %v3256_v48, %v7685_v15 }
 0x39d   : > { %v3235_v27 = vmul.f32 %v5309_v4, %v3234_v39  ;;  %v4988_v50 = vclamps-f32 %v3206_v60, 1.0  ;;  %v3269_v26 = vadd.f32 0.4994258, %v3268_v49 }
 0x39e   : > { %v3329_v18 = vmul.f32 %v7729_v29, %v7729_v29  ;;  %v3307_v35 = vadd.f32 0.112945676, %v3306_v63  ;;  %v3296_v6 = vadd.f32 0.05243302, %v3295_v46  ;;  %v3258_v52 = vadd.f32 0.18741608, %v3257_v40 }
 0x39f   : > { %v3236_v10 = vadd.f32 %v5309_v4, %v3235_v27  ;;  %v3270_v12 = vmul.f32 %v3269_v26, %v7685_v15  ;;  %v3731_v21 = vadd.f32 1.0, %v4988_v50 }
 0x3a0   : > { %v7736_v17 = vmin.f32 %v3329_v18, 16.0  ;;  %v3308_v22 = vmul.f32 %v3307_v35, %v7709_v53  ;;  %v3297_v5 = vmul.f32 %v3296_v6, %v7709_v53 }
 0x3a1   : > { %v3240_v2 = vsel %vm3239_vm0, %v5309_v4, %v3236_v10  ;;  %v3034_v58 = vpop.f32.mrf.mxu3  ;;  %v3271_v1 = vadd.f32 1.0, %v3270_v12  ;;  %v3747_v43 = vmul.f32 %v3731_v21, %v3059_v41 }
 0x3a2   : > { %v3245_v42 = vsel %vm3242_vm15, %v3244_v56, %v3240_v2  ;;  %v7741_v33 = vadd.f32 %v7512_v3, %v3034_v58  ;;  %v3331_v19 = vmul.f32 2.1237322e-06, %v7736_v17  ;;  %v3342_v4 = vmul.f32 3.8918573e-05, %v7736_v17 }
 0x3a3   : > { %v3246_v59 = vmul.f32 %v3245_v42, %v3221_v34  ;;  %5310 = vrcp.f32 %v3271_v1  ;;  %v3309_v28 = vadd.f32 0.4994258, %v3308_v22  ;;  %v3259_v34 = vmul.f32 %v3258_v52, %v7685_v15 }
 0x3a4   : > { %v7748_v16 = vmul.f32 0.70710677, %v7741_v33  ;;  %v3332_v24 = vadd.f32 0.00028619796, %v3331_v19  ;;  %v3343_v57 = vadd.f32 0.001143296, %v3342_v4  ;;  %vm3277_vm2 = vweird.f32 %v3271_v1 }
 0x3a5   : > { %v4989_v0 = vclamps-f32 %v3246_v59, 1.0  ;;  %v3310_v8 = vmul.f32 %v3309_v28, %v7709_v53  ;;  %v3298_v11 = vadd.f32 0.18741608, %v3297_v5  ;;  %v3283_v56 = vand.u32 2147483648, %v3271_v1 }
 0x3a6   : > { %v3369_v31 = vmul.f32 %v7748_v16, %v7748_v16  ;;  %v3333_v20 = vmul.f32 %v3332_v24, %v7736_v17  ;;  %v3344_v55 = vmul.f32 %v3343_v57, %v7736_v17  ;;  %v3281_v2 = vand.u32 2147483647, %v3271_v1 }
 0x3a7   : > { %v3732_v9 = vadd.f32 1.0, %v4989_v0  ;;  %v7759_v62 = vadd.f32 1.0, %v3310_v8  ;;  %v3260_v42 = vadd.f32 1.1283791, %v3259_v34  ;;  %v3299_v26 = vmul.f32 %v3298_v11, %v7709_v53 }
 0x3a8   : > { %v7753_v39 = vmin.f32 %v3369_v31, 16.0  ;;  %v3345_v27 = vadd.f32 0.014752088, %v3344_v55  ;;  %v3334_v10 = vadd.f32 0.0036580483, %v3333_v20  ;;  %v3284_v0 = vor.u32 1.1754944e-38, %v3283_v56 }
 0x3a9   : > { %v3748_v51 = vmul.f32 %v3732_v9, %v3060_v7  ;;  %v5311_v30 = vpop.eup %5310  ;;  %5312 = vrcp.f32 %v7759_v62  ;;  %vm3282_vm4 = vcmp.eq.f32.partialorder %v3281_v2, 8.507059e+37  ;;  %v3300_v41 = vadd.f32 1.1283791, %v3299_v26 }
 0x3aa   : > { %v3371_v54 = vmul.f32 2.1237322e-06, %v7753_v39  ;;  %v3382_v47 = vmul.f32 3.8918573e-05, %v7753_v39  ;;  %v3273_v60 = vmul.f32 %v5311_v30, %v3271_v1  ;;  %v3346_v44 = vmul.f32 %v3345_v27, %v7736_v17 }
 0x3ab   : > { %v3762_v45 = vpack.c.bf16 %v3748_v51, %v3747_v43  ;;  %vm3278_vm1 = vweird.f32 %v5311_v30  ;;  %v3335_v18 = vmul.f32 %v3334_v10, %v7736_v17  ;;  %v3321_v1 = vand.u32 2147483647, %v7759_v62 }
 0x3ac   : > { %v3372_v36 = vadd.f32 0.00028619796, %v3371_v54  ;;  %v3274_v38 = vsub.f32 1.0, %v3273_v60  ;;  %v3383_v49 = vadd.f32 0.001143296, %v3382_v47  ;;  %vm3279_vm3 = vmor %vm3277_vm2, %vm3278_vm1  ;;  %v3261_v9 = vmul.f32 %v3260_v42, %v7673_v14 }
 0x3ad   : > { %3850 = vmatmul.bf16.gmra.mxu0 %v3762_v45  ;;  %v3347_v32 = vadd.f32 0.112945676, %v3346_v44  ;;  %v3336_v22 = vadd.f32 0.05243302, %v3335_v18  ;;  %v3323_v43 = vand.u32 2147483648, %v7759_v62  ;;  %v3301_v57 = vmul.f32 %v3300_v41, %v7700_v37 }
 0x3ae   : > { %v3373_v61 = vmul.f32 %v3372_v36, %v7753_v39  ;;  %v3275_v50 = vmul.f32 %v5311_v30, %v3274_v38  ;;  %v3384_v15 = vmul.f32 %v3383_v49, %v7753_v39  ;;  %vm3317_vm6 = vweird.f32 %v7759_v62 }
 0x3af   : > { %v3348_v48 = vmul.f32 %v3347_v32, %v7736_v17  ;;  %v5313_v46 = vpop.eup %5312  ;;  %v3337_v5 = vmul.f32 %v3336_v22, %v7736_v17  ;;  %v3324_v47 = vor.u32 1.1754944e-38, %v3323_v43  ;;  %vm3322_vm8 = vcmp.eq.f32.partialorder %v3321_v1, 8.507059e+37 }
 0x3b0   : > { %v3276_v63 = vadd.f32 %v5311_v30, %v3275_v50  ;;  %v3374_v12 = vadd.f32 0.0036580483, %v3373_v61  ;;  %v3385_v21 = vadd.f32 0.014752088, %v3384_v15  ;;  %v3313_v53 = vmul.f32 %v5313_v46, %v7759_v62 }
 0x3b1   : > { %v3037_v59 = vpop.f32.mrf.mxu3  ;;  %v3349_v40 = vadd.f32 0.4994258, %v3348_v48  ;;  %vm3318_vm5 = vweird.f32 %v5313_v46  ;;  %v3338_v10 = vadd.f32 0.18741608, %v3337_v5  ;;  %v3061_v15 = vmul.f32 0.5, %v7669_v23 }
 0x3b2   : > { %v7771_v58 = vadd.f32 %v7512_v3, %v3037_v59  ;;  %v3280_v35 = vsel %vm3279_vm3, %v5311_v30, %v3276_v63  ;;  %v3314_v4 = vsub.f32 1.0, %v3313_v53  ;;  %v3375_v6 = vmul.f32 %v3374_v12, %v7753_v39  ;;  %vm3319_vm7 = vmor %vm3317_vm6, %vm3318_vm5 }
 0x3b3   : > { %v3285_v19 = vsel %vm3282_vm4, %v3284_v0, %v3280_v35  ;;  %v3386_v51 = vmul.f32 %v3385_v21, %v7753_v39  ;;  %v3350_v45 = vmul.f32 %v3349_v40, %v7736_v17  ;;  %v3062_v18 = vmul.f32 0.5, %v7691_v13 }
 0x3b4   : > { %v7775_v7 = vmul.f32 0.70710677, %v7771_v58  ;;  %v3286_v31 = vmul.f32 %v3285_v19, %v3261_v9  ;;  %v3315_v28 = vmul.f32 %v5313_v46, %v3314_v4  ;;  %v3376_v30 = vadd.f32 0.05243302, %v3375_v6 }
 0x3b5   : > { %v3387_v52 = vadd.f32 0.112945676, %v3386_v51  ;;  %v7790_v55 = vadd.f32 1.0, %v3350_v45  ;;  %v3339_v48 = vmul.f32 %v3338_v10, %v7736_v17 }
 0x3b6   : > { %v3409_v24 = vmul.f32 %v7775_v7, %v7775_v7  ;;  %v3316_v20 = vadd.f32 %v5313_v46, %v3315_v28  ;;  %v4990_v37 = vclamps-f32 %v3286_v31, 1.0  ;;  %v3377_v38 = vmul.f32 %v3376_v30, %v7753_v39 }
 0x3b7   : > { %v3388_v60 = vmul.f32 %v3387_v52, %v7753_v39  ;;  %5314 = vrcp.f32 %v7790_v55  ;;  %v3363_v9 = vand.u32 2147483648, %v7790_v55  ;;  %v3340_v6 = vadd.f32 1.1283791, %v3339_v48 }
 0x3b8   : > { %v7786_v14 = vmin.f32 %v3409_v24, 16.0  ;;  %v3320_v27 = vsel %vm3319_vm7, %v5313_v46, %v3316_v20  ;;  %v3733_v50 = vadd.f32 1.0, %v4990_v37  ;;  %v3378_v46 = vadd.f32 0.18741608, %v3377_v38 }
 0x3b9   : > { %v3039_v8 = vpop.f32.mrf.mxu3  ;;  %v3325_v11 = vsel %vm3322_vm8, %v3324_v47, %v3320_v27  ;;  %v3389_v44 = vadd.f32 0.4994258, %v3388_v60  ;;  %v3361_v43 = vand.u32 2147483647, %v7790_v55  ;;  %vm3357_vm10 = vweird.f32 %v7790_v55 }
 0x3ba   : > { %v7793_v54 = vadd.f32 %v7512_v3, %v3039_v8  ;;  %v3411_v34 = vmul.f32 2.1237322e-06, %v7786_v14  ;;  %v3326_v36 = vmul.f32 %v3325_v11, %v3301_v57  ;;  %v3422_v61 = vmul.f32 3.8918573e-05, %v7786_v14 }
 0x3bb   : > { %v3390_v32 = vmul.f32 %v3389_v44, %v7753_v39  ;;  %v3749_v21 = vmul.f32 %v3733_v50, %v3061_v15  ;;  %v3379_v24 = vmul.f32 %v3378_v46, %v7753_v39  ;;  %v3364_v30 = vor.u32 1.1754944e-38, %v3363_v9 }
 0x3bc   : > { %v7799_v62 = vmul.f32 0.70710677, %v7793_v54  ;;  %v4991_v49 = vclamps-f32 %v3326_v36, 1.0  ;;  %v3412_v2 = vadd.f32 0.00028619796, %v3411_v34  ;;  %v3341_v47 = vmul.f32 %v3340_v6, %v7729_v29 }
 0x3bd   : > { %v3423_v42 = vadd.f32 0.001143296, %v3422_v61  ;;  %v5315_v26 = vpop.eup %5314  ;;  %v7812_v0 = vadd.f32 1.0, %v3390_v32  ;;  %vm3362_vm12 = vcmp.eq.f32.partialorder %v3361_v43, 8.507059e+37  ;;  %v3380_v37 = vadd.f32 1.1283791, %v3379_v24 }
 0x3be   : > { %v3449_v56 = vmul.f32 %v7799_v62, %v7799_v62  ;;  %v3734_v63 = vadd.f32 1.0, %v4991_v49  ;;  %v3353_v12 = vmul.f32 %v5315_v26, %v7790_v55  ;;  %v3413_v23 = vmul.f32 %v3412_v2, %v7786_v14 }
 0x3bf   : > { %v3424_v53 = vmul.f32 %v3423_v42, %v7786_v14  ;;  %5316 = vrcp.f32 %v7812_v0  ;;  %vm3358_vm9 = vweird.f32 %v5315_v26  ;;  %v3401_v38 = vand.u32 2147483647, %v7812_v0 }
 0x3c0   : > { %v7808_v59 = vmin.f32 %v3449_v56, 16.0  ;;  %v3750_v35 = vmul.f32 %v3734_v63, %v3062_v18  ;;  %v3354_v19 = vsub.f32 1.0, %v3353_v12  ;;  %v3414_v31 = vadd.f32 0.0036580483, %v3413_v23  ;;  %vm3359_vm11 = vmor %vm3357_vm10, %vm3358_vm9 }
 0x3c1   : > { %v3425_v40 = vadd.f32 0.014752088, %v3424_v53  ;;  %v3403_v29 = vand.u32 2147483648, %v7812_v0  ;;  %v3381_v42 = vmul.f32 %v3380_v37, %v7748_v16  ;;  %vm3397_vm14 = vweird.f32 %v7812_v0 }
 0x3c2   : > { %v3462_v41 = vmul.f32 3.8918573e-05, %v7808_v59  ;;  %v3451_v13 = vmul.f32 2.1237322e-06, %v7808_v59  ;;  %v3763_v17 = vpack.c.bf16 %v3750_v35, %v3749_v21  ;;  %v3355_v4 = vmul.f32 %v5315_v26, %v3354_v19 }
 0x3c3   : > { %v3426_v52 = vmul.f32 %v3425_v40, %v7786_v14  ;;  %v3415_v55 = vmul.f32 %v3414_v31, %v7786_v14  ;;  %vm3402_vm0 = vcmp.eq.f32.partialorder %v3401_v38, 8.507059e+37  ;;  %v3404_v12 = vor.u32 1.1754944e-38, %v3403_v29  ;;  %v5366_v38 = vld [vmem:[%s8654_s8] ss:$0 sm:$0xff] }
 0x3c4   : > { %3855 = vmatmul.bf16.gmra.mxu0 %v3763_v17  ;;  %v3463_v51 = vadd.f32 0.001143296, %v3462_v41  ;;  %v3356_v45 = vadd.f32 %v5315_v26, %v3355_v4  ;;  %v3452_v57 = vadd.f32 0.00028619796, %v3451_v13  ;;  %v3064_v31 = vmul.f32 0.5, %v7741_v33 }
 0x3c5   : > { %v3042_v1 = vpop.f32.mrf.mxu3  ;;  %v5317_v8 = vpop.eup %5316  ;;  %v3427_v34 = vadd.f32 0.112945676, %v3426_v52 }
 0x3c6   : > { %v7821_v22 = vadd.f32 %v7512_v3, %v3042_v1  ;;  %v3464_v5 = vmul.f32 %v3463_v51, %v7808_v59  ;;  %v3360_v20 = vsel %vm3359_vm11, %v5315_v26, %v3356_v45  ;;  %v3393_v60 = vmul.f32 %v5317_v8, %v7812_v0 }
 0x3c7   : > { %v3365_v27 = vsel %vm3362_vm12, %v3364_v30, %v3360_v20  ;;  %v3453_v11 = vmul.f32 %v3452_v57, %v7808_v59  ;;  %vm3398_vm13 = vweird.f32 %v5317_v8  ;;  %v3428_v2 = vmul.f32 %v3427_v34, %v7786_v14 }
 0x3c8   : > { %v7826_v28 = vmul.f32 0.70710677, %v7821_v22  ;;  %v3394_v10 = vsub.f32 1.0, %v3393_v60  ;;  %v3465_v44 = vadd.f32 0.014752088, %v3464_v5  ;;  %v3366_v49 = vmul.f32 %v3365_v27, %v3341_v47  ;;  %vm3399_vm15 = vmor %vm3397_vm14, %vm3398_vm13 }
 0x3c9   : > { %v3416_v26 = vadd.f32 0.05243302, %v3415_v55  ;;  %v3454_v18 = vadd.f32 0.0036580483, %v3453_v11  ;;  %v3429_v63 = vadd.f32 0.4994258, %v3428_v2 }
 0x3ca   : > { %v3489_v39 = vmul.f32 %v7826_v28, %v7826_v28  ;;  %v3395_v50 = vmul.f32 %v5317_v8, %v3394_v10  ;;  %v3466_v32 = vmul.f32 %v3465_v44, %v7808_v59  ;;  %v4992_v16 = vclamps-f32 %v3366_v49, 1.0 }
 0x3cb   : > { %v3430_v53 = vmul.f32 %v3429_v63, %v7786_v14  ;;  %v3455_v19 = vmul.f32 %v3454_v18, %v7808_v59  ;;  %v3417_v9 = vmul.f32 %v3416_v26, %v7786_v14  ;;  %v3063_v51 = vmul.f32 0.5, %v7722_v25 }
 0x3cc   : > { %v7838_v61 = vmin.f32 %v3489_v39, 16.0  ;;  %v3467_v48 = vadd.f32 0.112945676, %v3466_v32  ;;  %v3735_v24 = vadd.f32 1.0, %v4992_v16 }
 0x3cd   : > { %v3044_v36 = vpop.f32.mrf.mxu3  ;;  %v3431_v17 = vadd.f32 1.0, %v3430_v53  ;;  %v3456_v45 = vadd.f32 0.05243302, %v3455_v19  ;;  %v3418_v5 = vadd.f32 0.18741608, %v3417_v9 }
 0x3ce   : > { %v7841_v56 = vadd.f32 %v7512_v3, %v3044_v36  ;;  %v3396_v3 = vadd.f32 %v5317_v8, %v3395_v50  ;;  %v3502_v21 = vmul.f32 3.8918573e-05, %v7838_v61  ;;  %v3468_v41 = vmul.f32 %v3467_v48, %v7808_v59 }
 0x3cf   : > { %5318 = vrcp.f32 %v3431_v17  ;;  %v3491_v39 = vmul.f32 2.1237322e-06, %v7838_v61  ;;  %v3751_v20 = vmul.f32 %v3735_v24, %v3063_v51  ;;  %v3457_v55 = vmul.f32 %v3456_v45, %v7808_v59 }
 0x3d0   : > { %v7848_v15 = vmul.f32 0.70710677, %v7841_v56  ;;  %v3400_v35 = vsel %vm3399_vm15, %v5317_v8, %v3396_v3  ;;  %v3503_v23 = vadd.f32 0.001143296, %v3502_v21  ;;  %v3469_v40 = vadd.f32 0.4994258, %v3468_v41 }
 0x3d1   : > { %v3405_v0 = vsel %vm3402_vm0, %v3404_v12, %v3400_v35  ;;  %v3419_v11 = vmul.f32 %v3418_v5, %v7786_v14  ;;  %v3492_v36 = vadd.f32 0.00028619796, %v3491_v39  ;;  %v3458_v49 = vadd.f32 0.18741608, %v3457_v55 }
 0x3d2   : > { %v3529_v46 = vmul.f32 %v7848_v15, %v7848_v15  ;;  %v3406_v1 = vmul.f32 %v3405_v0, %v3381_v42  ;;  %v3504_v43 = vmul.f32 %v3503_v23, %v7838_v61  ;;  %v3470_v8 = vmul.f32 %v3469_v40, %v7808_v59 }
 0x3d3   : > { %v3443_v14 = vand.u32 2147483648, %v3431_v17  ;;  %v3420_v42 = vadd.f32 1.1283791, %v3419_v11  ;;  %v3493_v26 = vmul.f32 %v3492_v36, %v7838_v61  ;;  %v3441_v18 = vand.u32 2147483647, %v3431_v17 }
 0x3d4   : > { %v7858_v13 = vmin.f32 %v3529_v46, 16.0  ;;  %v4993_v6 = vclamps-f32 %v3406_v1, 1.0  ;;  %v3505_v47 = vadd.f32 0.014752088, %v3504_v43  ;;  %v7867_v60 = vadd.f32 1.0, %v3470_v8 }
 0x3d5   : > { %v3047_v4 = vpop.f32.mrf.mxu3  ;;  %v5319_v37 = vpop.eup %5318  ;;  %vm3437_vm2 = vweird.f32 %v3431_v17  ;;  %v3459_v12 = vmul.f32 %v3458_v49, %v7808_v59  ;;  %v3444_v0 = vor.u32 1.1754944e-38, %v3443_v14  ;;  %v3421_v19 = vmul.f32 %v3420_v42, %v7775_v7 }
 0x3d6   : > { %v3736_v57 = vadd.f32 1.0, %v4993_v6  ;;  %v3542_v52 = vmul.f32 3.8918573e-05, %v7858_v13  ;;  %v3433_v34 = vmul.f32 %v5319_v37, %v3431_v17  ;;  %5320 = vrcp.f32 %v7867_v60 }
 0x3d7   : > { %v3506_v10 = vmul.f32 %v3505_v47, %v7838_v61  ;;  %v7878_v44 = vadd.f32 %v5366_v38, %v3047_v4  ;;  %v3531_v50 = vmul.f32 2.1237322e-06, %v7858_v13  ;;  %vm3438_vm1 = vweird.f32 %v5319_v37 }
 0x3d8   : > { %v3752_v30 = vmul.f32 %v3736_v57, %v3064_v31  ;;  %v3543_v27 = vadd.f32 0.001143296, %v3542_v52  ;;  %v3434_v29 = vsub.f32 1.0, %v3433_v34  ;;  %vm3439_vm3 = vmor %vm3437_vm2, %vm3438_vm1  ;;  %v3494_v1 = vadd.f32 0.0036580483, %v3493_v26 }
 0x3d9   : > { %v3507_v3 = vadd.f32 0.112945676, %v3506_v10  ;;  %v7884_v63 = vmul.f32 0.70710677, %v7878_v44  ;;  %v3532_v21 = vadd.f32 0.00028619796, %v3531_v50  ;;  %vm3477_vm6 = vweird.f32 %v7867_v60 }
 0x3da   : > { %v3764_v25 = vpack.c.bf16 %v3752_v30, %v3751_v20  ;;  %v3544_v2 = vmul.f32 %v3543_v27, %v7858_v13  ;;  %v3435_v32 = vmul.f32 %v5319_v37, %v3434_v29  ;;  %vm3442_vm4 = vcmp.eq.f32.partialorder %v3441_v18, 8.507059e+37 }
 0x3db   : > { %v3508_v16 = vmul.f32 %v3507_v3, %v7838_v61  ;;  %v3569_v17 = vmul.f32 %v7884_v63, %v7884_v63  ;;  %v3460_v6 = vadd.f32 1.1283791, %v3459_v12  ;;  %v3533_v24 = vmul.f32 %v3532_v21, %v7858_v13 }
 0x3dc   : > { %3860 = vmatmul.bf16.gmra.mxu0 %v3764_v25  ;;  %v3436_v48 = vadd.f32 %v5319_v37, %v3435_v32  ;;  %v5321_v46 = vpop.eup %5320  ;;  %v3545_v35 = vadd.f32 0.014752088, %v3544_v2  ;;  %v3483_v43 = vand.u32 2147483648, %v7867_v60  ;;  %v3481_v45 = vand.u32 2147483647, %v7867_v60 }
 0x3dd   : > { %v7870_v33 = vpop.f32.mrf.mxu3  ;;  %v3473_v23 = vmul.f32 %v5321_v46, %v7867_v60  ;;  %v3509_v40 = vadd.f32 0.4994258, %v3508_v16  ;;  %vm3478_vm5 = vweird.f32 %v5321_v46  ;;  %v3495_v57 = vmul.f32 %v3494_v1, %v7838_v61 }
 0x3de   : > { %v3440_v41 = vsel %vm3439_vm3, %v5319_v37, %v3436_v48  ;;  %v3546_v51 = vmul.f32 %v3545_v35, %v7858_v13  ;;  %v7903_v8 = vmin.f32 %v3569_v17, 16.0  ;;  %v3461_v30 = vmul.f32 %v3460_v6, %v7799_v62  ;;  %vm3479_vm7 = vmor %vm3477_vm6, %vm3478_vm5 }
 0x3df   : > { %v3445_v59 = vsel %vm3442_vm4, %v3444_v0, %v3440_v41  ;;  %v3474_v4 = vsub.f32 1.0, %v3473_v23  ;;  %v3510_v5 = vmul.f32 %v3509_v40, %v7838_v61  ;;  %v3484_v47 = vor.u32 1.1754944e-38, %v3483_v43 }
 0x3e0   : > { %v3446_v52 = vmul.f32 %v3445_v59, %v3421_v19  ;;  %v3547_v55 = vadd.f32 0.112945676, %v3546_v51  ;;  %v3534_v25 = vadd.f32 0.0036580483, %v3533_v24  ;;  %vm3482_vm8 = vcmp.eq.f32.partialorder %v3481_v45, 8.507059e+37 }
 0x3e1   : > { %v3475_v7 = vmul.f32 %v5321_v46, %v3474_v4  ;;  %v7909_v37 = vadd.f32 1.0, %v3510_v5  ;;  %v7914_v36 = vadd.f32 %v5366_v38, %v7870_v33  ;;  %v3582_v50 = vmul.f32 3.8918573e-05, %v7903_v8 }
 0x3e2   : > { %v4994_v29 = vclamps-f32 %v3446_v52, 1.0  ;;  %v3548_v2 = vmul.f32 %v3547_v55, %v7858_v13  ;;  %v3496_v32 = vadd.f32 0.05243302, %v3495_v57  ;;  %v3535_v33 = vmul.f32 %v3534_v25, %v7858_v13 }
 0x3e3   : > { %v3476_v20 = vadd.f32 %v5321_v46, %v3475_v7  ;;  %5322 = vrcp.f32 %v7909_v37  ;;  %v7927_v26 = vmul.f32 0.70710677, %v7914_v36  ;;  %v3583_v48 = vadd.f32 0.001143296, %v3582_v50 }
 0x3e4   : > { %v3066_v12 = vmul.f32 0.5, %v7793_v54  ;;  %v3549_v16 = vadd.f32 0.4994258, %v3548_v2  ;;  %v3536_v0 = vadd.f32 0.05243302, %v3535_v33  ;;  %vm3517_vm10 = vweird.f32 %v7909_v37 }
 0x3e5   : > { %v3052_v53 = vpop.f32.mrf.mxu3  ;;  %v3480_v11 = vsel %vm3479_vm7, %v5321_v46, %v3476_v20  ;;  %v3065_v46 = vmul.f32 0.5, %v7771_v58  ;;  %v3609_v17 = vmul.f32 %v7927_v26, %v7927_v26  ;;  %v3584_v54 = vmul.f32 %v3583_v48, %v7903_v8 }
 0x3e6   : > { %v7890_v9 = vadd.f32 %v5366_v38, %v3052_v53  ;;  %v3485_v60 = vsel %vm3482_vm8, %v3484_v47, %v3480_v11  ;;  %v3497_v53 = vmul.f32 %v3496_v32, %v7838_v61  ;;  %v3550_v6 = vmul.f32 %v3549_v16, %v7858_v13 }
 0x3e7   : > { %v3486_v49 = vmul.f32 %v3485_v60, %v3461_v30  ;;  %v3537_v43 = vmul.f32 %v3536_v0, %v7858_v13  ;;  %v7946_v45 = vmin.f32 %v3609_v17, 16.0  ;;  %v3585_v5 = vadd.f32 0.014752088, %v3584_v54 }
 0x3e8   : > { %v7898_v31 = vmul.f32 0.70710677, %v7890_v9  ;;  %v3498_v24 = vadd.f32 0.18741608, %v3497_v53  ;;  %v7944_v7 = vadd.f32 1.0, %v3550_v6 }
 0x3e9   : > { %v4995_v42 = vclamps-f32 %v3486_v49, 1.0  ;;  %v5323_v35 = vpop.eup %5322  ;;  %v3571_v30 = vmul.f32 2.1237322e-06, %v7903_v8  ;;  %v3538_v47 = vadd.f32 0.18741608, %v3537_v43  ;;  %v3586_v25 = vmul.f32 %v3585_v5, %v7903_v8 }
 0x3ea   : > { %v3649_v39 = vmul.f32 %v7898_v31, %v7898_v31  ;;  %v3513_v1 = vmul.f32 %v5323_v35, %v7909_v37  ;;  %5324 = vrcp.f32 %v7944_v7  ;;  %v3499_v20 = vmul.f32 %v3498_v24, %v7838_v61 }
 0x3eb   : > { %v3738_v21 = vadd.f32 1.0, %v4995_v42  ;;  %vm3518_vm9 = vweird.f32 %v5323_v35  ;;  %v3572_v50 = vadd.f32 0.00028619796, %v3571_v30  ;;  %v3521_v61 = vand.u32 2147483647, %v7909_v37 }
 0x3ec   : > { %v7911_v27 = vmin.f32 %v3649_v39, 16.0  ;;  %v3514_v40 = vsub.f32 1.0, %v3513_v1  ;;  %v3500_v49 = vadd.f32 1.1283791, %v3499_v20  ;;  %v3539_v32 = vmul.f32 %v3538_v47, %v7858_v13  ;;  %vm3519_vm11 = vmor %vm3517_vm10, %vm3518_vm9 }
 0x3ed   : > { %v3054_v34 = vpop.f32.mrf.mxu3  ;;  %v3754_v19 = vmul.f32 %v3738_v21, %v3066_v12  ;;  %v3587_v42 = vadd.f32 0.112945676, %v3586_v25  ;;  %v3573_v21 = vmul.f32 %v3572_v50, %v7903_v8  ;;  %vm3522_vm12 = vcmp.eq.f32.partialorder %v3521_v61, 8.507059e+37 }
 0x3ee   : > { %v7916_v10 = vadd.f32 %v5366_v38, %v3054_v34  ;;  %v3662_v62 = vmul.f32 3.8918573e-05, %v7911_v27  ;;  %v3737_v38 = vadd.f32 1.0, %v4994_v29  ;;  %v3515_v52 = vmul.f32 %v5323_v35, %v3514_v40 }
 0x3ef   : > { %v3611_v34 = vmul.f32 2.1237322e-06, %v7946_v45  ;;  %v3501_v12 = vmul.f32 %v3500_v49, %v7826_v28  ;;  %v3588_v16 = vmul.f32 %v3587_v42, %v7903_v8  ;;  %v3622_v1 = vmul.f32 3.8918573e-05, %v7946_v45 }
 0x3f0   : > { %v7923_v14 = vmul.f32 0.70710677, %v7916_v10  ;;  %v3663_v18 = vadd.f32 0.001143296, %v3662_v62  ;;  %v3753_v23 = vmul.f32 %v3737_v38, %v3065_v46  ;;  %v3516_v29 = vadd.f32 %v5323_v35, %v3515_v52  ;;  %v5325_v2 = vpop.eup %5324 }
 0x3f1   : > { %v3523_v62 = vand.u32 2147483648, %v7909_v37  ;;  %v3612_v38 = vadd.f32 0.00028619796, %v3611_v34  ;;  %v3553_v46 = vmul.f32 %v5325_v2, %v7944_v7  ;;  %v3540_v37 = vadd.f32 1.1283791, %v3539_v32 }
 0x3f2   : > { %v3689_v3 = vmul.f32 %v7923_v14, %v7923_v14  ;;  %v3664_v59 = vmul.f32 %v3663_v18, %v7911_v27  ;;  %v3765_v4 = vpack.c.bf16 %v3754_v19, %v3753_v23  ;;  %v3651_v17 = vmul.f32 2.1237322e-06, %v7911_v27 }
 0x3f3   : > { %v3524_v48 = vor.u32 1.1754944e-38, %v3523_v62  ;;  %v3554_v0 = vsub.f32 1.0, %v3553_v46  ;;  %v3613_v23 = vmul.f32 %v3612_v38, %v7946_v45  ;;  %vm3558_vm13 = vweird.f32 %v5325_v2 }
 0x3f4   : > { %v7934_v41 = vmin.f32 %v3689_v3, 16.0  ;;  %3865 = vmatmul.bf16.gmra.mxu0 %v3765_v4  ;;  %v3665_v57 = vadd.f32 0.014752088, %v3664_v59  ;;  %v3520_v3 = vsel %vm3519_vm11, %v5323_v35, %v3516_v29  ;;  %v3589_v35 = vadd.f32 0.4994258, %v3588_v16 }
 0x3f5   : > { %v3525_v13 = vsel %vm3522_vm12, %v3524_v48, %v3520_v3  ;;  %v3555_v28 = vmul.f32 %v5325_v2, %v3554_v0  ;;  %v3561_v59 = vand.u32 2147483647, %v7944_v7  ;;  %v3623_v40 = vadd.f32 0.001143296, %v3622_v1 }
 0x3f6   : > { %v3702_v58 = vmul.f32 3.8918573e-05, %v7934_v41  ;;  %v3666_v11 = vmul.f32 %v3665_v57, %v7911_v27  ;;  %v3526_v54 = vmul.f32 %v3525_v13, %v3501_v12  ;;  %v3590_v4 = vmul.f32 %v3589_v35, %v7903_v8 }
 0x3f7   : > { %v3541_v6 = vmul.f32 %v3540_v37, %v7848_v15  ;;  %v3574_v24 = vadd.f32 0.0036580483, %v3573_v21  ;;  %v3691_v43 = vmul.f32 2.1237322e-06, %v7934_v41  ;;  %v3556_v52 = vadd.f32 %v5325_v2, %v3555_v28 }
 0x3f8   : > { %v3703_v51 = vadd.f32 0.001143296, %v3702_v58  ;;  %v3667_v18 = vadd.f32 0.112945676, %v3666_v11  ;;  %v3563_v58 = vand.u32 2147483648, %v7944_v7  ;;  %vm3557_vm14 = vweird.f32 %v7944_v7 }
 0x3f9   : > { %v7975_v5 = vadd.f32 1.0, %v3590_v4  ;;  %v3652_v20 = vadd.f32 0.00028619796, %v3651_v17  ;;  %vm3559_vm15 = vmor %vm3557_vm14, %vm3558_vm13  ;;  %v3624_v47 = vmul.f32 %v3623_v40, %v7946_v45  ;;  %vm3562_vm0 = vcmp.eq.f32.partialorder %v3561_v59, 8.507059e+37 }
 0x3fa   : > { %v3704_v39 = vmul.f32 %v3703_v51, %v7934_v41  ;;  %v3668_v19 = vmul.f32 %v3667_v18, %v7911_v27  ;;  %v3564_v30 = vor.u32 1.1754944e-38, %v3563_v58  ;;  %v3560_v25 = vsel %vm3559_vm15, %v5325_v2, %v3556_v52 }
 0x3fb   : > { %5326 = vrcp.f32 %v7975_v5  ;;  %v3692_v15 = vadd.f32 0.00028619796, %v3691_v43  ;;  %v3575_v29 = vmul.f32 %v3574_v24, %v7903_v8  ;;  %v3653_v49 = vmul.f32 %v3652_v20, %v7911_v27 }
 0x3fc   : > { %v3705_v55 = vadd.f32 0.014752088, %v3704_v39  ;;  %v3669_v57 = vadd.f32 0.4994258, %v3668_v19  ;;  %v3614_v39 = vadd.f32 0.0036580483, %v3613_v23  ;;  %v3565_v11 = vsel %vm3562_vm0, %v3564_v30, %v3560_v25 }
 0x3fd   : > { %v3625_v50 = vadd.f32 0.014752088, %v3624_v47  ;;  %v3067_v2 = vmul.f32 0.5, %v7821_v22  ;;  %v3068_v3 = vmul.f32 0.5, %v7841_v56  ;;  %v3576_v48 = vadd.f32 0.05243302, %v3575_v29 }
 0x3fe   : > { %v3706_v60 = vmul.f32 %v3705_v55, %v7934_v41  ;;  %v4996_v55 = vclamps-f32 %v3526_v54, 1.0  ;;  %v3670_v7 = vmul.f32 %v3669_v57, %v7911_v27  ;;  %v3615_v62 = vmul.f32 %v3614_v39, %v7946_v45 }
 0x3ff   : > { %v3626_v38 = vmul.f32 %v3625_v50, %v7946_v45  ;;  %v3654_v16 = vadd.f32 0.0036580483, %v3653_v49  ;;  %v3577_v19 = vmul.f32 %v3576_v48, %v7903_v8  ;;  %v3603_v25 = vand.u32 2147483648, %v7975_v5 }
 0x400   : > { %v3707_v33 = vadd.f32 0.112945676, %v3706_v60  ;;  %v3566_v60 = vmul.f32 %v3565_v11, %v3541_v6  ;;  %v3739_v32 = vadd.f32 1.0, %v4996_v55  ;;  %v7990_v46 = vadd.f32 1.0, %v3670_v7 }
 0x401   : > { %v5327_v18 = vpop.eup %5326  ;;  %v3616_v21 = vadd.f32 0.05243302, %v3615_v62  ;;  %v3655_v17 = vmul.f32 %v3654_v16, %v7911_v27  ;;  %v3578_v54 = vadd.f32 0.18741608, %v3577_v19  ;;  %vm3597_vm2 = vweird.f32 %v7975_v5 }
 0x402   : > { %v3708_v53 = vmul.f32 %v3707_v33, %v7934_v41  ;;  %v4997_v61 = vclamps-f32 %v3566_v60, 1.0  ;;  %v3693_v33 = vmul.f32 %v3692_v15, %v7934_v41  ;;  %v3593_v37 = vmul.f32 %v5327_v18, %v7975_v5 }
 0x403   : > { %v3755_v13 = vmul.f32 %v3739_v32, %v3067_v2  ;;  %v3617_v1 = vmul.f32 %v3616_v21, %v7946_v45  ;;  %v3656_v24 = vadd.f32 0.05243302, %v3655_v17  ;;  %v3579_v52 = vmul.f32 %v3578_v54, %v7903_v8 }
 0x404   : > { %v3709_v51 = vadd.f32 0.4994258, %v3708_v53  ;;  %v3740_v12 = vadd.f32 1.0, %v4997_v61  ;;  %v3627_v53 = vadd.f32 0.112945676, %v3626_v38  ;;  %v3594_v35 = vsub.f32 1.0, %v3593_v37 }
 0x405   : > { %v3694_v0 = vadd.f32 0.0036580483, %v3693_v33  ;;  %v3618_v6 = vadd.f32 0.18741608, %v3617_v1  ;;  %vm3598_vm1 = vweird.f32 %v5327_v18  ;;  %v3657_v47 = vmul.f32 %v3656_v24, %v7911_v27  ;;  %v8024_v37 = vld [vmem:[%s8656_s10] ss:$0 sm:$0xff] }
 0x406   : > { %v3710_v34 = vmul.f32 %v3709_v51, %v7934_v41  ;;  %v3756_v22 = vmul.f32 %v3740_v12, %v3068_v3  ;;  %v3628_v23 = vmul.f32 %v3627_v53, %v7946_v45  ;;  %v3595_v4 = vmul.f32 %v5327_v18, %v3594_v35  ;;  %vm3599_vm3 = vmor %vm3597_vm2, %vm3598_vm1 }
 0x407   : > { %v3695_v59 = vmul.f32 %v3694_v0, %v7934_v41  ;;  %v3619_v30 = vmul.f32 %v3618_v6, %v7946_v45  ;;  %v3601_v15 = vand.u32 2147483647, %v7975_v5  ;;  %v3604_v49 = vor.u32 1.1754944e-38, %v3603_v25 }
 0x408   : > { %v7986_v42 = vadd.f32 1.0, %v3710_v34  ;;  %v3766_v56 = vpack.c.bf16 %v3756_v22, %v3755_v13  ;;  %v3629_v28 = vadd.f32 0.4994258, %v3628_v23  ;;  %v3596_v20 = vadd.f32 %v5327_v18, %v3595_v4 }
 0x409   : > { %v3696_v57 = vadd.f32 0.05243302, %v3695_v59  ;;  %v3580_v34 = vadd.f32 1.1283791, %v3579_v52  ;;  %v3620_v60 = vadd.f32 1.1283791, %v3619_v30  ;;  %vm3677_vm12 = vweird.f32 %v7990_v46 }
 0x40a   : > { %5328 = vrcp.f32 %v7986_v42  ;;  %3870 = vmatmul.bf16.gmra.mxu0 %v3766_v56  ;;  %v3630_v58 = vmul.f32 %v3629_v28, %v7946_v45  ;;  %v3600_v29 = vsel %vm3599_vm3, %v5327_v18, %v3596_v20  ;;  %v3658_v45 = vadd.f32 0.18741608, %v3657_v47 }
 0x40b   : > { %5330 = vrcp.f32 %v7990_v46  ;;  %v3697_v8 = vmul.f32 %v3696_v57, %v7934_v41  ;;  %vm3602_vm4 = vcmp.eq.f32.partialorder %v3601_v15, 8.507059e+37  ;;  %v3581_v2 = vmul.f32 %v3580_v34, %v7884_v63  ;;  %v3846_v63 = vpop.f32.mrf.mxu0 }
 0x40c   : > { %v3631_v43 = vadd.f32 1.0, %v3630_v58  ;;  %v3605_v32 = vsel %vm3602_vm4, %v3604_v49, %v3600_v29  ;;  %v3621_v38 = vmul.f32 %v3620_v60, %v7927_v26  ;;  %v3659_v3 = vmul.f32 %v3658_v45, %v7911_v27 }
 0x40d   : > { %v3698_v61 = vadd.f32 0.18741608, %v3697_v8  ;;  %v3606_v12 = vmul.f32 %v3605_v32, %v3581_v2  ;;  %vm3717_vm7 = vweird.f32 %v7986_v42  ;;  %v8032_v13 = vadd.f32 %v8024_v37, %v3846_v63 }
 0x40e   : > { %5332 = vrcp.f32 %v3631_v43  ;;  %v3643_v48 = vand.u32 2147483648, %v3631_v43  ;;  %v3641_v16 = vand.u32 2147483647, %v3631_v43  ;;  %vm3637_vm9 = vweird.f32 %v3631_v43 }
 0x40f   : > { %v3699_v53 = vmul.f32 %v3698_v61, %v7934_v41  ;;  %v3721_v0 = vand.u32 2147483647, %v7986_v42  ;;  %v3723_v23 = vand.u32 2147483648, %v7986_v42  ;;  %v4998_v19 = vclamps-f32 %v3606_v12, 1.0 }
 0x410   : > { %v8001_v40 = vpop.eup %5328  ;;  %v3644_v41 = vor.u32 1.1754944e-38, %v3643_v48  ;;  %vm3642_vm11 = vcmp.eq.f32.partialorder %v3641_v16, 8.507059e+37  ;;  %v8039_v35 = vmul.f32 0.70710677, %v8032_v13  ;;  %v3681_v1 = vand.u32 2147483647, %v7990_v46 }
 0x411   : > { %v8003_v51 = vpop.eup %5330  ;;  %v3713_v39 = vmul.f32 %v8001_v40, %v7986_v42  ;;  %vm3718_vm8 = vweird.f32 %v8001_v40  ;;  %v3683_v17 = vand.u32 2147483648, %v7990_v46  ;;  %v3700_v58 = vadd.f32 1.1283791, %v3699_v53 }
 0x412   : > { %v3673_v55 = vmul.f32 %v8003_v51, %v7990_v46  ;;  %vm3678_vm6 = vweird.f32 %v8003_v51  ;;  %vm8048_vm13 = vmor %vm3717_vm7, %vm3718_vm8  ;;  %v3918_v6 = vmul.f32 %v8039_v35, %v8039_v35  ;;  %v3069_v46 = vmul.f32 0.5, %v7878_v44 }
 0x413   : > { %v3714_v11 = vsub.f32 1.0, %v3713_v39  ;;  %v3660_v24 = vadd.f32 1.1283791, %v3659_v3  ;;  %vm8060_vm14 = vmor %vm3677_vm12, %vm3678_vm6  ;;  %vm3722_vm15 = vcmp.eq.f32.partialorder %v3721_v0, 8.507059e+37  ;;  %v3741_v52 = vadd.f32 1.0, %v4998_v19 }
 0x414   : > { %v5333_v7 = vpop.eup %5332  ;;  %v3674_v62 = vsub.f32 1.0, %v3673_v55  ;;  %v8067_v39 = vmin.f32 %v3918_v6, 16.0  ;;  %v3070_v20 = vmul.f32 0.5, %v7914_v36  ;;  %vm3682_vm0 = vcmp.eq.f32.partialorder %v3681_v1, 8.507059e+37 }
 0x415   : > { %v3633_v50 = vmul.f32 %v5333_v7, %v3631_v43  ;;  %v3715_v33 = vmul.f32 %v8001_v40, %v3714_v11  ;;  %vm3638_vm5 = vweird.f32 %v5333_v7  ;;  %v3724_v43 = vor.u32 1.1754944e-38, %v3723_v23 }
 0x416   : > { %v3675_v18 = vmul.f32 %v8003_v51, %v3674_v62  ;;  %vm3639_vm10 = vmor %vm3637_vm9, %vm3638_vm5  ;;  %v3684_v44 = vor.u32 1.1754944e-38, %v3683_v17  ;;  %v3701_v47 = vmul.f32 %v3700_v58, %v7923_v14  ;;  %v3920_v25 = vmul.f32 2.1237322e-06, %v8067_v39 }
 0x417   : > { %v3634_v5 = vsub.f32 1.0, %v3633_v50  ;;  %v3716_v27 = vadd.f32 %v8001_v40, %v3715_v33  ;;  %v3931_v15 = vmul.f32 3.8918573e-05, %v8067_v39  ;;  %v3661_v8 = vmul.f32 %v3660_v24, %v7898_v31  ;;  %v3848_v50 = vpop.f32.mrf.mxu0 }
 0x418   : > { %v3676_v22 = vadd.f32 %v8003_v51, %v3675_v18  ;;  %v3757_v11 = vmul.f32 %v3741_v52, %v3069_v46  ;;  %v3921_v60 = vadd.f32 0.00028619796, %v3920_v25  ;;  %v8077_v32 = vadd.f32 %v8024_v37, %v3848_v50  ;;  %v5127_v25 = vld [vmem:[#allocation2 + $0x38] sm:$0xff] }
 0x419   : > { %v3635_v21 = vmul.f32 %v5333_v7, %v3634_v5  ;;  %v3720_v54 = vsel %vm8048_vm13, %v8001_v40, %v3716_v27  ;;  %v3072_v12 = vmul.f32 0.5, %v7916_v10  ;;  %v3071_v63 = vmul.f32 0.5, %v7890_v9  ;;  %4666 = vmatpush.bf16.msrb.mxu1 %v5127_v25 }
 0x41a   : > { %v3680_v57 = vsel %vm8060_vm14, %v8003_v51, %v3676_v22  ;;  %v3725_v30 = vsel %vm3722_vm15, %v3724_v43, %v3720_v54  ;;  %v3922_v61 = vmul.f32 %v3921_v60, %v8067_v39  ;;  %v8081_v33 = vmul.f32 0.70710677, %v8077_v32 }
 0x41b   : > { %v3636_v26 = vadd.f32 %v5333_v7, %v3635_v21  ;;  %v3685_v34 = vsel %vm3682_vm0, %v3684_v44, %v3680_v57  ;;  %v3726_v51 = vmul.f32 %v3725_v30, %v3701_v47 }
 0x41c   : > { %v3686_v45 = vmul.f32 %v3685_v34, %v3661_v8  ;;  %v3923_v3 = vadd.f32 0.0036580483, %v3922_v61  ;;  %v3958_v18 = vmul.f32 %v8081_v33, %v8081_v33 }
 0x41d   : > { %v3640_v56 = vsel %vm3639_vm10, %v5333_v7, %v3636_v26  ;;  %v3932_v7 = vadd.f32 0.001143296, %v3931_v15  ;;  %v5001_v49 = vclamps-f32 %v3726_v51, 1.0 }
 0x41e   : > { %v3645_v59 = vsel %vm3642_vm11, %v3644_v41, %v3640_v56  ;;  %v5000_v31 = vclamps-f32 %v3686_v45, 1.0  ;;  %v3959_v16 = vmin.f32 %v3958_v18, 16.0  ;;  %v3924_v22 = vmul.f32 %v3923_v3, %v8067_v39  ;;  %v5125_v18 = vld [vmem:[#allocation2 + $0x28] sm:$0xff] }
 0x41f   : > { %v3646_v4 = vmul.f32 %v3645_v59, %v3621_v38  ;;  %v3933_v62 = vmul.f32 %v3932_v7, %v8067_v39  ;;  %v3744_v5 = vadd.f32 1.0, %v5001_v49  ;;  %v5126_v7 = vld [vmem:[#allocation2 + $0x30] sm:$0xff] }
 0x420   : > { %v3743_v48 = vadd.f32 1.0, %v5000_v31  ;;  %v3960_v0 = vmul.f32 2.1237322e-06, %v3959_v16  ;;  %v3971_v23 = vmul.f32 3.8918573e-05, %v3959_v16  ;;  %4667 = vmatpush.bf16.msrb.mxu1 %v5126_v7 }
 0x421   : > { %v4999_v40 = vclamps-f32 %v3646_v4, 1.0  ;;  %v3934_v14 = vadd.f32 0.014752088, %v3933_v62  ;;  %v3760_v53 = vmul.f32 %v3744_v5, %v3072_v12  ;;  %v3925_v59 = vadd.f32 0.05243302, %v3924_v22 }
 0x422   : > { %v3759_v19 = vmul.f32 %v3743_v48, %v3071_v63  ;;  %v3961_v1 = vadd.f32 0.00028619796, %v3960_v0  ;;  %v3972_v10 = vadd.f32 0.001143296, %v3971_v23 }
 0x423   : > { %v3742_v55 = vadd.f32 1.0, %v4999_v40  ;;  %v3935_v2 = vmul.f32 %v3934_v14, %v8067_v39  ;;  %v3926_v42 = vmul.f32 %v3925_v59, %v8067_v39 }
 0x424   : > { %v3768_v17 = vpack.c.bf16 %v3760_v53, %v3759_v19  ;;  %v3962_v58 = vmul.f32 %v3961_v1, %v3959_v16  ;;  %v3973_v54 = vmul.f32 %v3972_v10, %v3959_v16  ;;  %4668 = vmatpush.bf16.msrb.mxu1 %v5125_v18  ;;  %v5124_v19 = vld [vmem:[#allocation2 + $0x20] sm:$0xff] }
 0x425   : > { %v3758_v29 = vmul.f32 %v3742_v55, %v3070_v20  ;;  %v3936_v38 = vadd.f32 0.112945676, %v3935_v2  ;;  %v3927_v15 = vadd.f32 0.18741608, %v3926_v42 }
 0x426   : > { %v3963_v4 = vadd.f32 0.0036580483, %v3962_v58  ;;  %v3974_v6 = vadd.f32 0.014752088, %v3973_v54 }
 0x427   : > { %v3767_v36 = vpack.c.bf16 %v3758_v29, %v3757_v11  ;;  %v3937_v21 = vmul.f32 %v3936_v38, %v8067_v39  ;;  %v3928_v61 = vmul.f32 %v3927_v15, %v8067_v39 }
 0x428   : > { %v3964_v43 = vmul.f32 %v3963_v4, %v3959_v16  ;;  %v3975_v57 = vmul.f32 %v3974_v6, %v3959_v16  ;;  %4669 = vmatpush.bf16.msrb.mxu1 %v5124_v19 }
 0x429   : > { %3875 = vmatmul.bf16.gmra.mxu0 %v3767_v36  ;;  %v3938_v27 = vadd.f32 0.4994258, %v3937_v21 }
 0x42a   : > { %v3851_v26 = vpop.f32.mrf.mxu0  ;;  %v3965_v20 = vadd.f32 0.05243302, %v3964_v43  ;;  %v3976_v44 = vadd.f32 0.112945676, %v3975_v57  ;;  %v5123_v43 = vld [vmem:[#allocation2 + $0x18] sm:$0xff] }
 0x42b   : > { %v8090_v41 = vadd.f32 %v8024_v37, %v3851_v26  ;;  %v3939_v56 = vmul.f32 %v3938_v27, %v8067_v39  ;;  %v3929_v26 = vadd.f32 1.1283791, %v3928_v61 }
 0x42c   : > { %v3966_v34 = vmul.f32 %v3965_v20, %v3959_v16  ;;  %v3977_v51 = vmul.f32 %v3976_v44, %v3959_v16  ;;  %4670 = vmatpush.bf16.msrb.mxu1 %v5123_v43 }
 0x42d   : > { %v8093_v28 = vadd.f32 1.0, %v3939_v56  ;;  %v8096_v9 = vmul.f32 0.70710677, %v8090_v41 }
 0x42e   : > { %v3967_v36 = vadd.f32 0.18741608, %v3966_v34  ;;  %v3978_v62 = vadd.f32 0.4994258, %v3977_v51 }
 0x42f   : > { %5334 = vrcp.f32 %v8093_v28  ;;  %v3998_v46 = vmul.f32 %v8096_v9, %v8096_v9  ;;  %vm3946_vm2 = vweird.f32 %v8093_v28  ;;  %v3952_v0 = vand.u32 2147483648, %v8093_v28 }
 0x430   : > { %v3979_v2 = vmul.f32 %v3978_v62, %v3959_v16  ;;  %v3968_v12 = vmul.f32 %v3967_v36, %v3959_v16  ;;  %v3950_v16 = vand.u32 2147483647, %v8093_v28  ;;  %v5122_v36 = vld [vmem:[#allocation2 + $0x10] sm:$0xff] }
 0x431   : > { %v8102_v40 = vmin.f32 %v3998_v46, 16.0  ;;  %4671 = vmatpush.bf16.msrb.mxu1 %v5122_v36 }
 0x432   : > { %v3853_v24 = vpop.f32.mrf.mxu0  ;;  %v8128_v21 = vadd.f32 1.0, %v3979_v2  ;;  %v3969_v56 = vadd.f32 1.1283791, %v3968_v12  ;;  %vm3951_vm4 = vcmp.eq.f32.partialorder %v3950_v16, 8.507059e+37 }
 0x433   : > { %v8105_v52 = vadd.f32 %v8024_v37, %v3853_v24  ;;  %v4000_v30 = vmul.f32 2.1237322e-06, %v8102_v40  ;;  %v4011_v60 = vmul.f32 3.8918573e-05, %v8102_v40  ;;  %v3953_v24 = vor.u32 1.1754944e-38, %v3952_v0 }
 0x434   : > { %5336 = vrcp.f32 %v8128_v21  ;;  %vm3986_vm6 = vweird.f32 %v8128_v21 }
 0x435   : > { %v8108_v47 = vpop.eup %5334  ;;  %v8111_v55 = vmul.f32 0.70710677, %v8105_v52  ;;  %v4001_v11 = vadd.f32 0.00028619796, %v4000_v30  ;;  %v4012_v50 = vadd.f32 0.001143296, %v4011_v60  ;;  %v3930_v30 = vmul.f32 %v3929_v26, %v8039_v35 }
 0x436   : > { %v3942_v8 = vmul.f32 %v8108_v47, %v8093_v28  ;;  %vm3947_vm1 = vweird.f32 %v8108_v47 }
 0x437   : > { %v4038_v29 = vmul.f32 %v8111_v55, %v8111_v55  ;;  %v4002_v38 = vmul.f32 %v4001_v11, %v8102_v40  ;;  %v4013_v48 = vmul.f32 %v4012_v50, %v8102_v40  ;;  %vm8144_vm3 = vmor %vm3946_vm2, %vm3947_vm1  ;;  %v3990_v11 = vand.u32 2147483647, %v8128_v21 }
 0x438   : > { %v3943_v45 = vsub.f32 1.0, %v3942_v8 }
 0x439   : > { %3880 = vmatmul.bf16.gmra.mxu0 %v3768_v17  ;;  %v8118_v49 = vmin.f32 %v4038_v29, 16.0  ;;  %v4014_v27 = vadd.f32 0.014752088, %v4013_v48  ;;  %v4003_v23 = vadd.f32 0.0036580483, %v4002_v38  ;;  %v3992_v29 = vand.u32 2147483648, %v8128_v21 }
 0x43a   : > { %v3944_v31 = vmul.f32 %v8108_v47, %v3943_v45  ;;  %v5337_v44 = vpop.eup %5336  ;;  %vm8176_vm7 = vcmp.eq.f32.partialorder %v3990_v11, 8.507059e+37  ;;  %v8224_v48 = vmul.f32 0.5, %v8090_v41 }
 0x43b   : > { %v4040_v3 = vmul.f32 2.1237322e-06, %v8118_v49  ;;  %v4051_v63 = vmul.f32 3.8918573e-05, %v8118_v49  ;;  %v4015_v17 = vmul.f32 %v4014_v27, %v8102_v40  ;;  %v4004_v42 = vmul.f32 %v4003_v23, %v8102_v40 }
 0x43c   : > { %v3945_v22 = vadd.f32 %v8108_v47, %v3944_v31  ;;  %v3982_v8 = vmul.f32 %v5337_v44, %v8128_v21  ;;  %vm3987_vm5 = vweird.f32 %v5337_v44  ;;  %v3993_v27 = vor.u32 1.1754944e-38, %v3992_v29 }
 0x43d   : > { %v4041_v39 = vadd.f32 0.00028619796, %v4040_v3  ;;  %v4052_v54 = vadd.f32 0.001143296, %v4051_v63  ;;  %v4016_v57 = vadd.f32 0.112945676, %v4015_v17  ;;  %vm3988_vm8 = vmor %vm3986_vm6, %vm3987_vm5 }
 0x43e   : > { %v3949_v28 = vsel %vm8144_vm3, %v8108_v47, %v3945_v22  ;;  %v3970_v47 = vmul.f32 %v3969_v56, %v8081_v33  ;;  %v3983_v60 = vsub.f32 1.0, %v3982_v8  ;;  %v4005_v45 = vadd.f32 0.05243302, %v4004_v42  ;;  %v5121_v22 = vld [vmem:[#allocation2 + $0x8] sm:$0xff] }
 0x43f   : > { %v4042_v1 = vmul.f32 %v4041_v39, %v8118_v49  ;;  %v4053_v20 = vmul.f32 %v4052_v54, %v8118_v49  ;;  %v3954_v15 = vsel %vm3951_vm4, %v3953_v24, %v3949_v28  ;;  %v4017_v35 = vmul.f32 %v4016_v57, %v8102_v40  ;;  %4672 = vmatpush.bf16.msrb.mxu1 %v5121_v22  ;;  %v5120_v24 = vld [vmem:[#allocation2] sm:$0xff] }
 0x440   : > { %v3984_v31 = vmul.f32 %v5337_v44, %v3983_v60  ;;  %v4006_v21 = vmul.f32 %v4005_v45, %v8102_v40  ;;  %v3886_v8 = vmul.f32 0.5, %v8032_v13  ;;  %v3887_v29 = vmul.f32 0.5, %v8077_v32 }
 0x441   : > { %v3856_v14 = vpop.f32.mrf.mxu0  ;;  %v4043_v4 = vadd.f32 0.0036580483, %v4042_v1  ;;  %v4054_v62 = vadd.f32 0.014752088, %v4053_v20  ;;  %v4018_v61 = vadd.f32 0.4994258, %v4017_v35 }
 0x442   : > { %v8123_v5 = vadd.f32 %v8024_v37, %v3856_v14  ;;  %v3955_v14 = vmul.f32 %v3954_v15, %v3930_v30  ;;  %v3985_v39 = vadd.f32 %v5337_v44, %v3984_v31  ;;  %v4007_v43 = vadd.f32 0.18741608, %v4006_v21 }
 0x443   : > { %v4044_v34 = vmul.f32 %v4043_v4, %v8118_v49  ;;  %v4055_v18 = vmul.f32 %v4054_v62, %v8118_v49  ;;  %v4019_v63 = vmul.f32 %v4018_v61, %v8102_v40  ;;  %4673 = vmatpush.bf16.msrb.mxu1 %v5120_v24 }
 0x444   : > { %v8132_v53 = vmul.f32 0.70710677, %v8123_v5  ;;  %v5034_v0 = vclamps-f32 %v3955_v14, 1.0  ;;  %v3989_v56 = vsel %vm3988_vm8, %v5337_v44, %v3985_v39 }
 0x445   : > { %v4045_v2 = vadd.f32 0.05243302, %v4044_v34  ;;  %v4056_v16 = vadd.f32 0.112945676, %v4055_v18  ;;  %v3994_v59 = vsel %vm8176_vm7, %v3993_v27, %v3989_v56 }
 0x446   : > { %v4078_v10 = vmul.f32 %v8132_v53, %v8132_v53  ;;  %v3995_v28 = vmul.f32 %v3994_v59, %v3970_v47  ;;  %v4558_v42 = vadd.f32 1.0, %v5034_v0 }
 0x447   : > { %v4046_v1 = vmul.f32 %v4045_v2, %v8118_v49  ;;  %v4057_v17 = vmul.f32 %v4056_v16, %v8118_v49 }
 0x448   : > { %v8151_v6 = vmin.f32 %v4078_v10, 16.0  ;;  %v8191_v10 = vadd.f32 1.0, %v4019_v63  ;;  %v5035_v44 = vclamps-f32 %v3995_v28, 1.0  ;;  %v4574_v45 = vmul.f32 %v4558_v42, %v3886_v8 }
 0x449   : > { %v3858_v58 = vpop.f32.mrf.mxu0  ;;  %v4047_v30 = vadd.f32 0.18741608, %v4046_v1  ;;  %v4058_v15 = vadd.f32 0.4994258, %v4057_v17 }
 0x44a   : > { %v8154_v46 = vadd.f32 %v8024_v37, %v3858_v58  ;;  %v4080_v25 = vmul.f32 2.1237322e-06, %v8151_v6  ;;  %v4091_v54 = vmul.f32 3.8918573e-05, %v8151_v6  ;;  %5338 = vrcp.f32 %v8191_v10 }
 0x44b   : > { %v4059_v60 = vmul.f32 %v4058_v15, %v8118_v49  ;;  %v4032_v16 = vand.u32 2147483648, %v8191_v10  ;;  %vm4026_vm10 = vweird.f32 %v8191_v10  ;;  %v4030_v56 = vand.u32 2147483647, %v8191_v10 }
 0x44c   : > { %v8164_v51 = vmul.f32 0.70710677, %v8154_v46  ;;  %v4081_v7 = vadd.f32 0.00028619796, %v4080_v25  ;;  %v4092_v11 = vadd.f32 0.001143296, %v4091_v54 }
 0x44d   : > { %v8216_v31 = vadd.f32 1.0, %v4059_v60  ;;  %v4033_v24 = vor.u32 1.1754944e-38, %v4032_v16  ;;  %vm4031_vm12 = vcmp.eq.f32.partialorder %v4030_v56, 8.507059e+37 }
 0x44e   : > { %v4118_v33 = vmul.f32 %v8164_v51, %v8164_v51  ;;  %v4082_v50 = vmul.f32 %v4081_v7, %v8151_v6  ;;  %v4559_v7 = vadd.f32 1.0, %v5035_v44 }
 0x44f   : > { %5340 = vrcp.f32 %v8216_v31  ;;  %vm4066_vm14 = vweird.f32 %v8216_v31 }
 0x450   : > { %v8172_v38 = vmin.f32 %v4118_v33, 16.0  ;;  %v4083_v23 = vadd.f32 0.0036580483, %v4082_v50  ;;  %v4008_v33 = vmul.f32 %v4007_v43, %v8102_v40  ;;  %v5339_v62 = vpop.eup %5338  ;;  %v4575_v14 = vmul.f32 %v4559_v7, %v3887_v29 }
 0x451   : > { %v4048_v50 = vmul.f32 %v4047_v30, %v8118_v49  ;;  %v4022_v2 = vmul.f32 %v5339_v62, %v8191_v10  ;;  %vm4027_vm9 = vweird.f32 %v5339_v62  ;;  %v4070_v29 = vand.u32 2147483647, %v8216_v31 }
 0x452   : > { %v4120_v26 = vmul.f32 2.1237322e-06, %v8172_v38  ;;  %v4084_v57 = vmul.f32 %v4083_v23, %v8151_v6  ;;  %v4590_v40 = vpack.c.bf16 %v4575_v14, %v4574_v45  ;;  %v4009_v27 = vadd.f32 1.1283791, %v4008_v33  ;;  %vm4028_vm11 = vmor %vm4026_vm10, %vm4027_vm9 }
 0x453   : > { %v4023_v39 = vsub.f32 1.0, %v4022_v2  ;;  %v4131_v1 = vmul.f32 3.8918573e-05, %v8172_v38  ;;  %v4072_v7 = vand.u32 2147483648, %v8216_v31  ;;  %vm4071_vm15 = vcmp.eq.f32.partialorder %v4070_v29, 8.507059e+37 }
 0x454   : > { %v4121_v4 = vadd.f32 0.00028619796, %v4120_v26  ;;  %v4085_v36 = vadd.f32 0.05243302, %v4084_v57  ;;  %v4049_v26 = vadd.f32 1.1283791, %v4048_v50  ;;  %4674 = vmatmul.bf16.vlgmr.msrb.gmra.mxu1 %v4590_v40 }
 0x455   : > { %v4024_v21 = vmul.f32 %v5339_v62, %v4023_v39  ;;  %v5341_v28 = vpop.eup %5340  ;;  %v4132_v42 = vadd.f32 0.001143296, %v4131_v1  ;;  %v4073_v16 = vor.u32 1.1754944e-38, %v4072_v7 }
 0x456   : > { %v4122_v35 = vmul.f32 %v4121_v4, %v8172_v38  ;;  %v4086_v63 = vmul.f32 %v4085_v36, %v8151_v6  ;;  %v4010_v4 = vmul.f32 %v4009_v27, %v8096_v9  ;;  %v4062_v30 = vmul.f32 %v5341_v28, %v8216_v31 }
 0x457   : > { %v4133_v45 = vmul.f32 %v4132_v42, %v8172_v38  ;;  %vm4067_vm13 = vweird.f32 %v5341_v28 }
 0x458   : > { %v4123_v18 = vadd.f32 0.0036580483, %v4122_v35  ;;  %v8236_v17 = vadd.f32 0.18741608, %v4086_v63  ;;  %v4063_v35 = vsub.f32 1.0, %v4062_v30  ;;  %vm4068_vm0 = vmor %vm4066_vm14, %vm4067_vm13 }
 0x459   : > { %v3861_v3 = vpop.f32.mrf.mxu0 }
 0x45a   : > { %v8181_v12 = vadd.f32 %v8024_v37, %v3861_v3  ;;  %v4093_v3 = vmul.f32 %v4092_v11, %v8151_v6  ;;  %v4124_v41 = vmul.f32 %v4123_v18, %v8172_v38  ;;  %v4064_v50 = vmul.f32 %v5341_v28, %v4063_v35 }
 0x45c   : > { %v8188_v19 = vmul.f32 0.70710677, %v8181_v12  ;;  %v4094_v23 = vadd.f32 0.014752088, %v4093_v3  ;;  %v4125_v15 = vadd.f32 0.05243302, %v4124_v41  ;;  %v4065_v40 = vadd.f32 %v5341_v28, %v4064_v50 }
 0x45e   : > { %v4158_v58 = vmul.f32 %v8188_v19, %v8188_v19  ;;  %v4095_v54 = vmul.f32 %v4094_v23, %v8151_v6  ;;  %v4126_v2 = vmul.f32 %v4125_v15, %v8172_v38  ;;  %v4069_v23 = vsel %vm4068_vm0, %v5341_v28, %v4065_v40 }
 0x460   : > { %v8201_v20 = vmin.f32 %v4158_v58, 16.0  ;;  %v4025_v58 = vadd.f32 %v5339_v62, %v4024_v21 }
 0x461   : > { %v3863_v25 = vpop.f32.mrf.mxu0 }
 0x462   : > { %v4160_v34 = vmul.f32 2.1237322e-06, %v8201_v20  ;;  %v8206_v47 = vadd.f32 %v8024_v37, %v3863_v25  ;;  %v4171_v43 = vmul.f32 3.8918573e-05, %v8201_v20  ;;  %v4029_v10 = vsel %vm4028_vm11, %v5339_v62, %v4025_v58 }
 0x463   : > { %v4050_v25 = vmul.f32 %v4049_v26, %v8111_v55  ;;  %v4034_v9 = vsel %vm4031_vm12, %v4033_v24, %v4029_v10 }
 0x464   : > { %v8213_v13 = vmul.f32 0.70710677, %v8206_v47  ;;  %v4161_v61 = vadd.f32 0.00028619796, %v4160_v34  ;;  %v4096_v34 = vadd.f32 0.112945676, %v4095_v54  ;;  %v4035_v14 = vmul.f32 %v4034_v9, %v4010_v4 }
 0x465   : > { %v4172_v33 = vadd.f32 0.001143296, %v4171_v43  ;;  %v3889_v54 = vmul.f32 0.5, %v8105_v52  ;;  %v4127_v4 = vadd.f32 0.18741608, %v4126_v2  ;;  %v4088_v52 = vmul.f32 %v8236_v17, %v8151_v6 }
 0x466   : > { %v4198_v32 = vmul.f32 %v8213_v13, %v8213_v13  ;;  %v4162_v22 = vmul.f32 %v4161_v61, %v8201_v20  ;;  %v4097_v60 = vmul.f32 %v4096_v34, %v8151_v6  ;;  %v5036_v21 = vclamps-f32 %v4035_v14, 1.0 }
 0x467   : > { %v4173_v18 = vmul.f32 %v4172_v33, %v8201_v20  ;;  %v4128_v9 = vmul.f32 %v4127_v4, %v8172_v38 }
 0x468   : > { %v8227_v49 = vmin.f32 %v4198_v32, 16.0  ;;  %v4163_v57 = vadd.f32 0.0036580483, %v4162_v22  ;;  %v4098_v61 = vadd.f32 0.4994258, %v4097_v60  ;;  %v4560_v30 = vadd.f32 1.0, %v5036_v21 }
 0x469   : > { %v4134_v32 = vadd.f32 0.014752088, %v4133_v45  ;;  %v4174_v58 = vadd.f32 0.014752088, %v4173_v18 }
 0x46a   : > { %v4200_v0 = vmul.f32 2.1237322e-06, %v8227_v49  ;;  %v4164_v55 = vmul.f32 %v4163_v57, %v8201_v20  ;;  %v4099_v63 = vmul.f32 %v4098_v61, %v8151_v6  ;;  %v4576_v17 = vmul.f32 %v4560_v30, %v8224_v48 }
 0x46b   : > { %v4135_v39 = vmul.f32 %v4134_v32, %v8172_v38  ;;  %v4175_v34 = vmul.f32 %v4174_v58, %v8201_v20  ;;  %v8303_v48 = vmul.f32 0.5, %v8154_v46 }
 0x46c   : > { %v4201_v59 = vadd.f32 0.00028619796, %v4200_v0  ;;  %v4165_v27 = vadd.f32 0.05243302, %v4164_v55  ;;  %v8266_v31 = vadd.f32 1.0, %v4099_v63 }
 0x46d   : > { %v4136_v41 = vadd.f32 0.112945676, %v4135_v39  ;;  %v4176_v33 = vadd.f32 0.112945676, %v4175_v34  ;;  %v4089_v39 = vadd.f32 1.1283791, %v4088_v52 }
 0x46e   : > { %v4202_v44 = vmul.f32 %v4201_v59, %v8227_v49  ;;  %v4074_v59 = vsel %vm4071_vm15, %v4073_v16, %v4069_v23  ;;  %5342 = vrcp.f32 %v8266_v31  ;;  %v4166_v42 = vmul.f32 %v4165_v27, %v8201_v20 }
 0x46f   : > { %v4075_v24 = vmul.f32 %v4074_v59, %v4050_v25  ;;  %v4137_v15 = vmul.f32 %v4136_v41, %v8172_v38  ;;  %v4177_v40 = vmul.f32 %v4176_v33, %v8201_v20  ;;  %v4112_v23 = vand.u32 2147483648, %v8266_v31 }
 0x470   : > { %v4203_v36 = vadd.f32 0.0036580483, %v4202_v44  ;;  %v8279_v44 = vmul.f32 0.5, %v8123_v5  ;;  %v4211_v5 = vmul.f32 3.8918573e-05, %v8227_v49  ;;  %vm4106_vm2 = vweird.f32 %v8266_v31 }
 0x471   : > { %v3866_v8 = vpop.f32.mrf.mxu0  ;;  %v5037_v10 = vclamps-f32 %v4075_v24, 1.0  ;;  %v4138_v7 = vadd.f32 0.4994258, %v4137_v15  ;;  %v4167_v35 = vadd.f32 0.18741608, %v4166_v42  ;;  %v4113_v15 = vor.u32 1.1754944e-38, %v4112_v23 }
 0x472   : > { %v8245_v11 = vadd.f32 %v8024_v37, %v3866_v8  ;;  %v4204_v26 = vmul.f32 %v4203_v36, %v8227_v49  ;;  %v4212_v14 = vadd.f32 0.001143296, %v4211_v5  ;;  %v4178_v41 = vadd.f32 0.4994258, %v4177_v40 }
 0x473   : > { %v4561_v29 = vadd.f32 1.0, %v5037_v10  ;;  %v4139_v36 = vmul.f32 %v4138_v7, %v8172_v38  ;;  %v4090_v5 = vmul.f32 %v4089_v39, %v8132_v53 }
 0x474   : > { %v8253_v62 = vmul.f32 0.70710677, %v8245_v11  ;;  %v4205_v43 = vadd.f32 0.05243302, %v4204_v26  ;;  %v5343_v6 = vpop.eup %5342  ;;  %v4213_v63 = vmul.f32 %v4212_v14, %v8227_v49  ;;  %v4129_v26 = vadd.f32 1.1283791, %v4128_v9 }
 0x475   : > { %v4577_v55 = vmul.f32 %v4561_v29, %v3889_v54  ;;  %v4102_v32 = vmul.f32 %v5343_v6, %v8266_v31  ;;  %v8298_v18 = vadd.f32 1.0, %v4139_v36  ;;  %vm4107_vm1 = vweird.f32 %v5343_v6 }
 0x476   : > { %v4238_v3 = vmul.f32 %v8253_v62, %v8253_v62  ;;  %v4206_v60 = vmul.f32 %v4205_v43, %v8227_v49  ;;  %v4214_v46 = vadd.f32 0.014752088, %v4213_v63  ;;  %v4179_v24 = vmul.f32 %v4178_v41, %v8201_v20  ;;  %vm4108_vm3 = vmor %vm4106_vm2, %vm4107_vm1 }
 0x477   : > { %v4103_v27 = vsub.f32 1.0, %v4102_v32  ;;  %5344 = vrcp.f32 %v8298_v18  ;;  %vm4146_vm6 = vweird.f32 %v8298_v18 }
 0x478   : > { %v8263_v22 = vmin.f32 %v4238_v3, 16.0  ;;  %v4591_v3 = vpack.c.bf16 %v4577_v55, %v4576_v17  ;;  %v4207_v16 = vadd.f32 0.18741608, %v4206_v60  ;;  %v4215_v43 = vmul.f32 %v4214_v46, %v8227_v49 }
 0x479   : > { %v3868_v0 = vpop.f32.mrf.mxu0  ;;  %v4104_v21 = vmul.f32 %v5343_v6, %v4103_v27  ;;  %v8317_v52 = vadd.f32 1.0, %v4179_v24  ;;  %v4150_v17 = vand.u32 2147483647, %v8298_v18  ;;  %v4152_v55 = vand.u32 2147483648, %v8298_v18 }
 0x47a   : > { %v4240_v56 = vmul.f32 2.1237322e-06, %v8263_v22  ;;  %v8270_v1 = vadd.f32 %v8024_v37, %v3868_v0  ;;  %v4251_v2 = vmul.f32 3.8918573e-05, %v8263_v22  ;;  %4679 = vmatmul.bf16.gmra.mxu1 %v4591_v3  ;;  %v4110_v0 = vand.u32 2147483647, %v8266_v31 }
 0x47b   : > { %v4105_v4 = vadd.f32 %v5343_v6, %v4104_v21  ;;  %v4208_v42 = vmul.f32 %v4207_v16, %v8227_v49  ;;  %v4216_v34 = vadd.f32 0.112945676, %v4215_v43  ;;  %5346 = vrcp.f32 %v8317_v52 }
 0x47c   : > { %v4241_v28 = vadd.f32 0.00028619796, %v4240_v56  ;;  %v8276_v57 = vmul.f32 0.70710677, %v8270_v1  ;;  %v4168_v56 = vmul.f32 %v4167_v35, %v8201_v20  ;;  %v4252_v58 = vadd.f32 0.001143296, %v4251_v2 }
 0x47d   : > { %v4109_v30 = vsel %vm4108_vm3, %v5343_v6, %v4105_v4  ;;  %vm4111_vm4 = vcmp.eq.f32.partialorder %v4110_v0, 8.507059e+37  ;;  %v4130_v35 = vmul.f32 %v4129_v26, %v8164_v51  ;;  %v8325_v33 = vadd.f32 1.1283791, %v4208_v42 }
 0x47e   : > { %v4242_v25 = vmul.f32 %v4241_v28, %v8263_v22  ;;  %v4278_v8 = vmul.f32 %v8276_v57, %v8276_v57  ;;  %v4253_v28 = vmul.f32 %v4252_v58, %v8263_v22  ;;  %v4114_v20 = vsel %vm4111_vm4, %v4113_v15, %v4109_v30 }
 0x47f   : > { %v8322_v60 = vadd.f32 1.1283791, %v4168_v56  ;;  %v4115_v14 = vmul.f32 %v4114_v20, %v4090_v5  ;;  %vm4151_vm7 = vcmp.eq.f32.partialorder %v4150_v17, 8.507059e+37  ;;  %vm4186_vm9 = vweird.f32 %v8317_v52 }
 0x480   : > { %v8291_v45 = vmin.f32 %v4278_v8, 16.0  ;;  %v4243_v50 = vadd.f32 0.0036580483, %v4242_v25  ;;  %v5345_v25 = vpop.eup %5344  ;;  %v4254_v31 = vadd.f32 0.014752088, %v4253_v28 }
 0x481   : > { %v4142_v29 = vmul.f32 %v5345_v25, %v8298_v18  ;;  %vm4147_vm5 = vweird.f32 %v5345_v25  ;;  %v5347_v26 = vpop.eup %5346  ;;  %v5038_v0 = vclamps-f32 %v4115_v14, 1.0 }
 0x482   : > { %v4280_v61 = vmul.f32 2.1237322e-06, %v8291_v45  ;;  %v4244_v59 = vmul.f32 %v4243_v50, %v8263_v22  ;;  %v4291_v10 = vmul.f32 3.8918573e-05, %v8291_v45  ;;  %v4217_v50 = vmul.f32 %v4216_v34, %v8227_v49  ;;  %vm4148_vm8 = vmor %vm4146_vm6, %vm4147_vm5 }
 0x483   : > { %v4143_v6 = vsub.f32 1.0, %v4142_v29  ;;  %v4255_v53 = vmul.f32 %v4254_v31, %v8263_v22  ;;  %v4182_v18 = vmul.f32 %v5347_v26, %v8317_v52  ;;  %v4562_v28 = vadd.f32 1.0, %v5038_v0 }
 0x484   : > { %v4281_v38 = vadd.f32 0.00028619796, %v4280_v61  ;;  %v4245_v8 = vadd.f32 0.05243302, %v4244_v59  ;;  %v4292_v7 = vadd.f32 0.001143296, %v4291_v10  ;;  %vm4187_vm10 = vweird.f32 %v5347_v26 }
 0x485   : > { %v4144_v32 = vmul.f32 %v5345_v25, %v4143_v6  ;;  %v4218_v40 = vadd.f32 0.4994258, %v4217_v50  ;;  %v4256_v63 = vadd.f32 0.112945676, %v4255_v53  ;;  %v4183_v42 = vsub.f32 1.0, %v4182_v18  ;;  %vm4188_vm11 = vmor %vm4186_vm9, %vm4187_vm10 }
 0x486   : > { %v4282_v54 = vmul.f32 %v4281_v38, %v8291_v45  ;;  %v4246_v36 = vmul.f32 %v4245_v8, %v8263_v22  ;;  %v4293_v2 = vmul.f32 %v4292_v7, %v8291_v45  ;;  %v4153_v38 = vor.u32 1.1754944e-38, %v4152_v55 }
 0x487   : > { %v3871_v61 = vpop.f32.mrf.mxu0  ;;  %v4145_v39 = vadd.f32 %v5345_v25, %v4144_v32  ;;  %v4219_v21 = vmul.f32 %v4218_v40, %v8227_v49  ;;  %v4257_v23 = vmul.f32 %v4256_v63, %v8263_v22  ;;  %v4192_v10 = vand.u32 2147483648, %v8317_v52 }
 0x488   : > { %v4283_v9 = vadd.f32 0.0036580483, %v4282_v54  ;;  %v8335_v3 = vadd.f32 %v8024_v37, %v3871_v61  ;;  %v4294_v27 = vadd.f32 0.014752088, %v4293_v2  ;;  %v4247_v41 = vadd.f32 0.18741608, %v4246_v36 }
 0x489   : > { %v4149_v59 = vsel %vm4148_vm8, %v5345_v25, %v4145_v39  ;;  %v8346_v54 = vadd.f32 1.0, %v4219_v21  ;;  %v4258_v4 = vadd.f32 0.4994258, %v4257_v23  ;;  %v4184_v25 = vmul.f32 %v5347_v26, %v4183_v42 }
 0x48a   : > { %v4284_v51 = vmul.f32 %v4283_v9, %v8291_v45  ;;  %v8339_v16 = vmul.f32 0.70710677, %v8335_v3  ;;  %v4154_v58 = vsel %vm4151_vm7, %v4153_v38, %v4149_v59  ;;  %v4295_v49 = vmul.f32 %v4294_v27, %v8291_v45 }
 0x48b   : > { %v4155_v24 = vmul.f32 %v4154_v58, %v4130_v35  ;;  %5348 = vrcp.f32 %v8346_v54  ;;  %v4259_v8 = vmul.f32 %v4258_v4, %v8263_v22  ;;  %v4190_v9 = vand.u32 2147483647, %v8317_v52 }
 0x48c   : > { %v4285_v56 = vadd.f32 0.05243302, %v4284_v51  ;;  %v4318_v46 = vmul.f32 %v8339_v16, %v8339_v16  ;;  %v4296_v20 = vadd.f32 0.112945676, %v4295_v49  ;;  %v4185_v5 = vadd.f32 %v5347_v26, %v4184_v25 }
 0x48d   : > { %v5039_v15 = vclamps-f32 %v4155_v24, 1.0  ;;  %v8361_v35 = vadd.f32 1.0, %v4259_v8  ;;  %v4578_v55 = vmul.f32 %v4562_v28, %v8279_v44  ;;  %v4170_v51 = vmul.f32 %v8322_v60, %v8188_v19 }
 0x48e   : > { %v8350_v43 = vmin.f32 %v4318_v46, 16.0  ;;  %v4286_v29 = vmul.f32 %v4285_v56, %v8291_v45  ;;  %v4189_v14 = vsel %vm4188_vm11, %v5347_v26, %v4185_v5  ;;  %v4297_v50 = vmul.f32 %v4296_v20, %v8291_v45 }
 0x48f   : > { %v3873_v30 = vpop.f32.mrf.mxu0  ;;  %v4563_v7 = vadd.f32 1.0, %v5039_v15  ;;  %5350 = vrcp.f32 %v8361_v35  ;;  %vm4191_vm12 = vcmp.eq.f32.partialorder %v4190_v9, 8.507059e+37  ;;  %v4210_v44 = vmul.f32 %v8325_v33, %v8213_v13 }
 0x490   : > { %v4320_v34 = vmul.f32 2.1237322e-06, %v8350_v43  ;;  %v8357_v31 = vadd.f32 %v8024_v37, %v3873_v30  ;;  %v4193_v37 = vor.u32 1.1754944e-38, %v4192_v10  ;;  %v4248_v2 = vmul.f32 %v4247_v41, %v8263_v22 }
 0x491   : > { %v4579_v36 = vmul.f32 %v4563_v7, %v8303_v48  ;;  %v5349_v53 = vpop.eup %5348  ;;  %v4287_v40 = vadd.f32 0.18741608, %v4286_v29  ;;  %v4232_v39 = vand.u32 2147483648, %v8346_v54  ;;  %v4298_v38 = vadd.f32 0.4994258, %v4297_v50 }
 0x492   : > { %v4321_v6 = vadd.f32 0.00028619796, %v4320_v34  ;;  %v8364_v17 = vmul.f32 0.70710677, %v8357_v31  ;;  %v4194_v32 = vsel %vm4191_vm12, %v4193_v37, %v4189_v14  ;;  %v4222_v48 = vmul.f32 %v5349_v53, %v8346_v54 }
 0x493   : > { %v4592_v52 = vpack.c.bf16 %v4579_v36, %v4578_v55  ;;  %v4331_v27 = vmul.f32 3.8918573e-05, %v8350_v43  ;;  %v4195_v33 = vmul.f32 %v4194_v32, %v4170_v51  ;;  %v4230_v26 = vand.u32 2147483647, %v8346_v54 }
 0x494   : > { %v4358_v61 = vmul.f32 %v8364_v17, %v8364_v17  ;;  %v4322_v19 = vmul.f32 %v4321_v6, %v8350_v43  ;;  %v4223_v60 = vsub.f32 1.0, %v4222_v48  ;;  %vm4227_vm13 = vweird.f32 %v5349_v53 }
 0x495   : > { %4684 = vmatmul.bf16.gmra.mxu1 %v4592_v52  ;;  %v5351_v22 = vpop.eup %5350  ;;  %v4299_v23 = vmul.f32 %v4298_v38, %v8291_v45  ;;  %v4332_v41 = vadd.f32 0.001143296, %v4331_v27  ;;  %vm4226_vm14 = vweird.f32 %v8346_v54  ;;  %v4233_v59 = vor.u32 1.1754944e-38, %v4232_v39 }
 0x496   : > { %v8380_v63 = vmin.f32 %v4358_v61, 16.0  ;;  %v4224_v21 = vmul.f32 %v5349_v53, %v4223_v60  ;;  %v4262_v18 = vmul.f32 %v5351_v22, %v8361_v35  ;;  %v4323_v46 = vadd.f32 0.0036580483, %v4322_v19  ;;  %vm4228_vm15 = vmor %vm4226_vm14, %vm4227_vm13 }
 0x497   : > { %v8391_v4 = vadd.f32 1.0, %v4299_v23  ;;  %v4333_v24 = vmul.f32 %v4332_v41, %v8350_v43  ;;  %v5040_v49 = vclamps-f32 %v4195_v33, 1.0  ;;  %vm4231_vm0 = vcmp.eq.f32.partialorder %v4230_v26, 8.507059e+37  ;;  %v8423_v41 = vld [vmem:[%s8656_s10] ss:$0 sm:$0xff] }
 0x498   : > { %v4360_v13 = vmul.f32 2.1237322e-06, %v8380_v63  ;;  %v4371_v0 = vmul.f32 3.8918573e-05, %v8380_v63  ;;  %v4225_v58 = vadd.f32 %v5349_v53, %v4224_v21  ;;  %v4263_v28 = vsub.f32 1.0, %v4262_v18 }
 0x499   : > { %vm4266_vm1 = vweird.f32 %v8361_v35  ;;  %5352 = vrcp.f32 %v8391_v4  ;;  %vm4267_vm2 = vweird.f32 %v5351_v22  ;;  %v4270_v25 = vand.u32 2147483647, %v8361_v35 }
 0x49a   : > { %v4361_v56 = vadd.f32 0.00028619796, %v4360_v13  ;;  %v4372_v10 = vadd.f32 0.001143296, %v4371_v0  ;;  %v4229_v30 = vsel %vm4228_vm15, %v5349_v53, %v4225_v58  ;;  %v4264_v15 = vmul.f32 %v5351_v22, %v4263_v28  ;;  %vm8405_vm3 = vmor %vm4266_vm1, %vm4267_vm2 }
 0x49b   : > { %v4234_v54 = vsel %vm4231_vm0, %v4233_v59, %v4229_v30  ;;  %v4324_v8 = vmul.f32 %v4323_v46, %v8350_v43  ;;  %v4272_v9 = vand.u32 2147483648, %v8361_v35  ;;  %v4334_v20 = vadd.f32 0.014752088, %v4333_v24 }
 0x49c   : > { %v4362_v42 = vmul.f32 %v4361_v56, %v8380_v63  ;;  %v4235_v34 = vmul.f32 %v4234_v54, %v4210_v44  ;;  %v4564_v7 = vadd.f32 1.0, %v5040_v49  ;;  %v4265_v5 = vadd.f32 %v5351_v22, %v4264_v15 }
 0x49d   : > { %v4373_v6 = vmul.f32 %v4372_v10, %v8380_v63  ;;  %v3892_v55 = vmul.f32 0.5, %v8181_v12  ;;  %v3893_v37 = vmul.f32 0.5, %v8206_v47  ;;  %v4335_v50 = vmul.f32 %v4334_v20, %v8350_v43 }
 0x49e   : > { %v4363_v29 = vadd.f32 0.0036580483, %v4362_v42  ;;  %v5041_v36 = vclamps-f32 %v4235_v34, 1.0  ;;  %v4249_v53 = vadd.f32 1.1283791, %v4248_v2  ;;  %v4288_v51 = vmul.f32 %v4287_v40, %v8291_v45 }
 0x49f   : > { %v4269_v61 = vsel %vm8405_vm3, %v5351_v22, %v4265_v5  ;;  %v4374_v44 = vadd.f32 0.014752088, %v4373_v6  ;;  %v5353_v52 = vpop.eup %5352  ;;  %vm4271_vm4 = vcmp.eq.f32.partialorder %v4270_v25, 8.507059e+37  ;;  %v4273_v47 = vor.u32 1.1754944e-38, %v4272_v9 }
 0x4a0   : > { %v4565_v12 = vadd.f32 1.0, %v5041_v36  ;;  %v4336_v32 = vadd.f32 0.112945676, %v4335_v50  ;;  %v4325_v48 = vadd.f32 0.05243302, %v4324_v8  ;;  %v4364_v35 = vmul.f32 %v4363_v29, %v8380_v63 }
 0x4a1   : > { %v4580_v39 = vmul.f32 %v4564_v7, %v3892_v55  ;;  %v4302_v19 = vmul.f32 %v5353_v52, %v8391_v4  ;;  %v4274_v38 = vsel %vm4271_vm4, %v4273_v47, %v4269_v61  ;;  %v4375_v45 = vmul.f32 %v4374_v44, %v8380_v63 }
 0x4a2   : > { %v4581_v60 = vmul.f32 %v4565_v12, %v3893_v37  ;;  %v4337_v2 = vmul.f32 %v4336_v32, %v8350_v43  ;;  %v4250_v40 = vmul.f32 %v4249_v53, %v8253_v62  ;;  %v4289_v27 = vadd.f32 1.1283791, %v4288_v51 }
 0x4a3   : > { %v4303_v13 = vsub.f32 1.0, %v4302_v19  ;;  %v4310_v33 = vand.u32 2147483647, %v8391_v4  ;;  %v4312_v22 = vand.u32 2147483648, %v8391_v4  ;;  %v4376_v23 = vadd.f32 0.112945676, %v4375_v45 }
 0x4a4   : > { %v4593_v0 = vpack.c.bf16 %v4581_v60, %v4580_v39  ;;  %v4338_v21 = vadd.f32 0.4994258, %v4337_v2  ;;  %v4275_v59 = vmul.f32 %v4274_v38, %v4250_v40  ;;  %vm4307_vm5 = vweird.f32 %v5353_v52 }
 0x4a5   : > { %v4304_v62 = vmul.f32 %v5353_v52, %v4303_v13  ;;  %v4326_v18 = vmul.f32 %v4325_v48, %v8350_v43  ;;  %v4365_v46 = vadd.f32 0.05243302, %v4364_v35  ;;  %v4377_v24 = vmul.f32 %v4376_v23, %v8380_v63 }
 0x4a6   : > { %v3876_v26 = vpop.f32.mrf.mxu0  ;;  %4689 = vmatmul.bf16.gmra.mxu1 %v4593_v0  ;;  %v4339_v58 = vmul.f32 %v4338_v21, %v8350_v43  ;;  %vm4306_vm6 = vweird.f32 %v8391_v4  ;;  %v4290_v28 = vmul.f32 %v4289_v27, %v8276_v57  ;;  %v4313_v10 = vor.u32 1.1754944e-38, %v4312_v22 }
 0x4a7   : > { %v8426_v56 = vadd.f32 %v8423_v41, %v3876_v26  ;;  %v4305_v49 = vadd.f32 %v5353_v52, %v4304_v62  ;;  %vm4308_vm7 = vmor %vm4306_vm6, %vm4307_vm5  ;;  %v4378_v54 = vadd.f32 0.4994258, %v4377_v24  ;;  %v5042_v25 = vclamps-f32 %v4275_v59, 1.0 }
 0x4a8   : > { %v4340_v30 = vadd.f32 1.0, %v4339_v58  ;;  %vm4311_vm8 = vcmp.eq.f32.partialorder %v4310_v33, 8.507059e+37  ;;  %v4327_v34 = vadd.f32 0.18741608, %v4326_v18  ;;  %v4366_v9 = vmul.f32 %v4365_v46, %v8380_v63 }
 0x4a9   : > { %v8432_v42 = vmul.f32 0.70710677, %v8426_v56  ;;  %v4309_v8 = vsel %vm4308_vm7, %v5353_v52, %v4305_v49  ;;  %v4379_v57 = vmul.f32 %v4378_v54, %v8380_v63  ;;  %v3894_v5 = vmul.f32 0.5, %v8245_v11 }
 0x4aa   : > { %v4314_v20 = vsel %vm4311_vm8, %v4313_v10, %v4309_v8  ;;  %5354 = vrcp.f32 %v4340_v30  ;;  %v4566_v37 = vadd.f32 1.0, %v5042_v25  ;;  %v4328_v36 = vmul.f32 %v4327_v34, %v8350_v43 }
 0x4ab   : > { %v4398_v15 = vmul.f32 %v8432_v42, %v8432_v42  ;;  %v4315_v4 = vmul.f32 %v4314_v20, %v4290_v28  ;;  %v4367_v14 = vadd.f32 0.18741608, %v4366_v9  ;;  %v8447_v50 = vadd.f32 1.0, %v4379_v57 }
 0x4ac   : > { %v3895_v51 = vmul.f32 0.5, %v8270_v1  ;;  %v4582_v43 = vmul.f32 %v4566_v37, %v3894_v5  ;;  %v4329_v48 = vadd.f32 1.1283791, %v4328_v36  ;;  %v4350_v39 = vand.u32 2147483647, %v4340_v30 }
 0x4ad   : > { %v8439_v29 = vmin.f32 %v4398_v15, 16.0  ;;  %v5043_v55 = vclamps-f32 %v4315_v4, 1.0  ;;  %5356 = vrcp.f32 %v8447_v50  ;;  %v4368_v35 = vmul.f32 %v4367_v14, %v8380_v63 }
 0x4ae   : > { %v3878_v7 = vpop.f32.mrf.mxu0  ;;  %v4352_v40 = vand.u32 2147483648, %v4340_v30  ;;  %v4330_v63 = vmul.f32 %v4329_v48, %v8339_v16  ;;  %vm4346_vm10 = vweird.f32 %v4340_v30  ;;  %vm4351_vm11 = vcmp.eq.f32.partialorder %v4350_v39, 8.507059e+37 }
 0x4af   : > { %v8444_v6 = vadd.f32 %v8423_v41, %v3878_v7  ;;  %v4411_v53 = vmul.f32 3.8918573e-05, %v8439_v29  ;;  %v4400_v61 = vmul.f32 2.1237322e-06, %v8439_v29  ;;  %v4567_v11 = vadd.f32 1.0, %v5043_v55 }
 0x4b0   : > { %v5355_v52 = vpop.eup %5354  ;;  %v4369_v22 = vadd.f32 1.1283791, %v4368_v35  ;;  %v4353_v46 = vor.u32 1.1754944e-38, %v4352_v40  ;;  %v4390_v28 = vand.u32 2147483647, %v8447_v50  ;;  %v4392_v34 = vand.u32 2147483648, %v8447_v50 }
 0x4b1   : > { %v8453_v44 = vmul.f32 0.70710677, %v8444_v6  ;;  %v4583_v47 = vmul.f32 %v4567_v11, %v3895_v51  ;;  %v4342_v32 = vmul.f32 %v5355_v52, %v4340_v30  ;;  %v4412_v1 = vadd.f32 0.001143296, %v4411_v53 }
 0x4b2   : > { %v4401_v19 = vadd.f32 0.00028619796, %v4400_v61  ;;  %vm4347_vm9 = vweird.f32 %v5355_v52  ;;  %v4370_v55 = vmul.f32 %v4369_v22, %v8364_v17  ;;  %vm4386_vm14 = vweird.f32 %v8447_v50 }
 0x4b3   : > { %v4438_v12 = vmul.f32 %v8453_v44, %v8453_v44  ;;  %v4594_v38 = vpack.c.bf16 %v4583_v47, %v4582_v43  ;;  %v4343_v2 = vsub.f32 1.0, %v4342_v32  ;;  %v4413_v27 = vmul.f32 %v4412_v1, %v8439_v29  ;;  %v5357_v0 = vpop.eup %5356  ;;  %vm4348_vm12 = vmor %vm4346_vm10, %vm4347_vm9 }
 0x4b4   : > { %v4402_v59 = vmul.f32 %v4401_v19, %v8439_v29  ;;  %v4382_v58 = vmul.f32 %v5357_v0, %v8447_v50  ;;  %vm4387_vm13 = vweird.f32 %v5357_v0  ;;  %vm4391_vm0 = vcmp.eq.f32.partialorder %v4390_v28, 8.507059e+37 }
 0x4b5   : > { %v8459_v60 = vmin.f32 %v4438_v12, 16.0  ;;  %v4344_v26 = vmul.f32 %v5355_v52, %v4343_v2  ;;  %v4414_v21 = vadd.f32 0.014752088, %v4413_v27  ;;  %vm4388_vm15 = vmor %vm4386_vm14, %vm4387_vm13  ;;  %v4393_v11 = vor.u32 1.1754944e-38, %v4392_v34 }
 0x4b6   : > { %v3881_v45 = vpop.f32.mrf.mxu0  ;;  %4694 = vmatmul.bf16.gmra.mxu1 %v4594_v38  ;;  %v4383_v30 = vsub.f32 1.0, %v4382_v58  ;;  %v4403_v8 = vadd.f32 0.0036580483, %v4402_v59  ;;  %v3896_v27 = vmul.f32 0.5, %v8335_v3 }
 0x4b7   : > { %v4440_v13 = vmul.f32 2.1237322e-06, %v8459_v60  ;;  %v8464_v33 = vadd.f32 %v8423_v41, %v3881_v45  ;;  %v4451_v23 = vmul.f32 3.8918573e-05, %v8459_v60  ;;  %v4345_v62 = vadd.f32 %v5355_v52, %v4344_v26 }
 0x4b8   : > { %v4415_v24 = vmul.f32 %v4414_v21, %v8439_v29  ;;  %v4384_v7 = vmul.f32 %v5357_v0, %v4383_v30  ;;  %v4404_v61 = vmul.f32 %v4403_v8, %v8439_v29 }
 0x4b9   : > { %v8470_v18 = vmul.f32 0.70710677, %v8464_v33  ;;  %v4441_v16 = vadd.f32 0.00028619796, %v4440_v13  ;;  %v4349_v49 = vsel %vm4348_vm12, %v5355_v52, %v4345_v62  ;;  %v4452_v10 = vadd.f32 0.001143296, %v4451_v23 }
 0x4ba   : > { %v4354_v15 = vsel %vm4351_vm11, %v4353_v46, %v4349_v49  ;;  %v4416_v25 = vadd.f32 0.112945676, %v4415_v24  ;;  %v4385_v53 = vadd.f32 %v5357_v0, %v4384_v7  ;;  %v4405_v1 = vadd.f32 0.05243302, %v4404_v61 }
 0x4bb   : > { %v4478_v54 = vmul.f32 %v8470_v18, %v8470_v18  ;;  %v4453_v9 = vmul.f32 %v4452_v10, %v8459_v60  ;;  %v4355_v57 = vmul.f32 %v4354_v15, %v4330_v63  ;;  %v4442_v37 = vmul.f32 %v4441_v16, %v8459_v60 }
 0x4bc   : > { %v4417_v5 = vmul.f32 %v4416_v25, %v8439_v29  ;;  %v4389_v43 = vsel %vm4388_vm15, %v5357_v0, %v4385_v53  ;;  %v3897_v13 = vmul.f32 0.5, %v8357_v31  ;;  %v4406_v23 = vmul.f32 %v4405_v1, %v8439_v29 }
 0x4bd   : > { %v8479_v20 = vmin.f32 %v4478_v54, 16.0  ;;  %v4454_v52 = vadd.f32 0.014752088, %v4453_v9  ;;  %v5044_v12 = vclamps-f32 %v4355_v57, 1.0  ;;  %v4443_v47 = vadd.f32 0.0036580483, %v4442_v37 }
 0x4be   : > { %v3883_v4 = vpop.f32.mrf.mxu0  ;;  %v4418_v51 = vadd.f32 0.4994258, %v4417_v5  ;;  %v4394_v32 = vsel %vm4391_vm0, %v4393_v11, %v4389_v43  ;;  %v4407_v34 = vadd.f32 0.18741608, %v4406_v23 }
 0x4bf   : > { %v8485_v36 = vadd.f32 %v8423_v41, %v3883_v4  ;;  %v4480_v14 = vmul.f32 2.1237322e-06, %v8479_v20  ;;  %v4395_v35 = vmul.f32 %v4394_v32, %v4370_v55  ;;  %v4455_v19 = vmul.f32 %v4454_v52, %v8459_v60 }
 0x4c0   : > { %v4419_v41 = vmul.f32 %v4418_v51, %v8439_v29  ;;  %v4491_v38 = vmul.f32 3.8918573e-05, %v8479_v20  ;;  %v4568_v40 = vadd.f32 1.0, %v5044_v12  ;;  %v4444_v26 = vmul.f32 %v4443_v47, %v8459_v60 }
 0x4c1   : > { %v8492_v17 = vmul.f32 0.70710677, %v8485_v36  ;;  %v4481_v48 = vadd.f32 0.00028619796, %v4480_v14  ;;  %v5045_v45 = vclamps-f32 %v4395_v35, 1.0  ;;  %v4408_v11 = vmul.f32 %v4407_v34, %v8439_v29 }
 0x4c2   : > { %v8497_v39 = vadd.f32 1.0, %v4419_v41  ;;  %v4456_v21 = vadd.f32 0.112945676, %v4455_v19  ;;  %v4492_v59 = vadd.f32 0.001143296, %v4491_v38  ;;  %v4584_v46 = vmul.f32 %v4568_v40, %v3896_v27 }
 0x4c3   : > { %v4518_v50 = vmul.f32 %v8492_v17, %v8492_v17  ;;  %v4482_v0 = vmul.f32 %v4481_v48, %v8479_v20  ;;  %v4569_v22 = vadd.f32 1.0, %v5045_v45  ;;  %v4445_v16 = vadd.f32 0.05243302, %v4444_v26 }
 0x4c4   : > { %5358 = vrcp.f32 %v8497_v39  ;;  %v4457_v24 = vmul.f32 %v4456_v21, %v8459_v60  ;;  %v4493_v3 = vmul.f32 %v4492_v59, %v8479_v20  ;;  %v4432_v32 = vand.u32 2147483648, %v8497_v39 }
 0x4c5   : > { %v8501_v2 = vmin.f32 %v4518_v50, 16.0  ;;  %v4585_v58 = vmul.f32 %v4569_v22, %v3897_v13  ;;  %v4483_v28 = vadd.f32 0.0036580483, %v4482_v0  ;;  %v4446_v4 = vmul.f32 %v4445_v16, %v8459_v60 }
 0x4c6   : > { %v4458_v15 = vadd.f32 0.4994258, %v4457_v24  ;;  %v4494_v25 = vadd.f32 0.014752088, %v4493_v3  ;;  %vm4426_vm2 = vweird.f32 %v8497_v39  ;;  %v4430_v50 = vand.u32 2147483647, %v8497_v39 }
 0x4c7   : > { %v4520_v63 = vmul.f32 2.1237322e-06, %v8501_v2  ;;  %v4531_v31 = vmul.f32 3.8918573e-05, %v8501_v2  ;;  %v4595_v54 = vpack.c.bf16 %v4585_v58, %v4584_v46  ;;  %v4484_v55 = vmul.f32 %v4483_v28, %v8479_v20 }
 0x4c8   : > { %v4459_v9 = vmul.f32 %v4458_v15, %v8459_v60  ;;  %v4495_v7 = vmul.f32 %v4494_v25, %v8479_v20  ;;  %v4447_v52 = vadd.f32 0.18741608, %v4446_v4  ;;  %v4409_v19 = vadd.f32 1.1283791, %v4408_v11 }
 0x4c9   : > { %v4521_v62 = vadd.f32 0.00028619796, %v4520_v63  ;;  %v4532_v8 = vadd.f32 0.001143296, %v4531_v31  ;;  %4699 = vmatmul.bf16.gmra.mxu1 %v4595_v54  ;;  %v4485_v41 = vadd.f32 0.05243302, %v4484_v55 }
 0x4ca   : > { %v5359_v49 = vpop.eup %5358  ;;  %v8520_v14 = vadd.f32 1.0, %v4459_v9  ;;  %v4496_v51 = vadd.f32 0.112945676, %v4495_v7  ;;  %v4448_v38 = vmul.f32 %v4447_v52, %v8459_v60  ;;  %vm4431_vm4 = vcmp.eq.f32.partialorder %v4430_v50, 8.507059e+37 }
 0x4cb   : > { %v4522_v10 = vmul.f32 %v4521_v62, %v8501_v2  ;;  %v4422_v30 = vmul.f32 %v5359_v49, %v8497_v39  ;;  %v4533_v5 = vmul.f32 %v4532_v8, %v8501_v2  ;;  %vm4427_vm1 = vweird.f32 %v5359_v49 }
 0x4cc   : > { %5360 = vrcp.f32 %v8520_v14  ;;  %v4497_v43 = vmul.f32 %v4496_v51, %v8479_v20  ;;  %vm8530_vm3 = vmor %vm4426_vm2, %vm4427_vm1  ;;  %v4486_v13 = vmul.f32 %v4485_v41, %v8479_v20  ;;  %v4433_v39 = vor.u32 1.1754944e-38, %v4432_v32 }
 0x4cd   : > { %v4423_v57 = vsub.f32 1.0, %v4422_v30  ;;  %v4523_v37 = vadd.f32 0.0036580483, %v4522_v10  ;;  %v4534_v61 = vadd.f32 0.014752088, %v4533_v5  ;;  %v4410_v23 = vmul.f32 %v4409_v19, %v8432_v42 }
 0x4ce   : > { %v4498_v29 = vadd.f32 0.4994258, %v4497_v43  ;;  %v4449_v59 = vadd.f32 1.1283791, %v4448_v38  ;;  %v4487_v46 = vadd.f32 0.18741608, %v4486_v13  ;;  %vm4466_vm6 = vweird.f32 %v8520_v14 }
 0x4cf   : > { %v4424_v53 = vmul.f32 %v5359_v49, %v4423_v57  ;;  %v4524_v47 = vmul.f32 %v4523_v37, %v8501_v2  ;;  %v4535_v48 = vmul.f32 %v4534_v61, %v8501_v2  ;;  %v4472_v24 = vand.u32 2147483648, %v8520_v14  ;;  %v8555_v42 = vld [vmem:[%s8658_s12] ss:$0 sm:$0xff] }
 0x4d0   : > { %v4499_v40 = vmul.f32 %v4498_v29, %v8479_v20  ;;  %v4488_v30 = vmul.f32 %v4487_v46, %v8479_v20  ;;  %v4450_v9 = vmul.f32 %v4449_v59, %v8453_v44  ;;  %v3898_v11 = vmul.f32 0.5, %v8426_v56 }
 0x4d1   : > { %v4425_v12 = vadd.f32 %v5359_v49, %v4424_v53  ;;  %v4536_v1 = vadd.f32 0.112945676, %v4535_v48  ;;  %v4525_v26 = vadd.f32 0.05243302, %v4524_v47  ;;  %v4675_v10 = vpop.f32.mrf.mxu1  ;;  %v4473_v8 = vor.u32 1.1754944e-38, %v4472_v24 }
 0x4d2   : > { %v5361_v27 = vpop.eup %5360  ;;  %v8542_v22 = vadd.f32 1.0, %v4499_v40  ;;  %v4676_v15 = vadd.f32 %v8555_v42, %v4675_v10  ;;  %v4489_v20 = vadd.f32 1.1283791, %v4488_v30  ;;  %v3899_v41 = vmul.f32 0.5, %v8444_v6 }
 0x4d3   : > { %v4429_v45 = vsel %vm8530_vm3, %v5359_v49, %v4425_v12  ;;  %v4537_v0 = vmul.f32 %v4536_v1, %v8501_v2  ;;  %v4462_v63 = vmul.f32 %v5361_v27, %v8520_v14  ;;  %v4526_v58 = vmul.f32 %v4525_v26, %v8501_v2 }
 0x4d4   : > { %v4434_v60 = vsel %vm4431_vm4, %v4433_v39, %v4429_v45  ;;  %5362 = vrcp.f32 %v8542_v22  ;;  %vm4467_vm5 = vweird.f32 %v5361_v27  ;;  %v4470_v49 = vand.u32 2147483647, %v8520_v14  ;;  %4715 = vst [vmem:[%s8564_s30] sm:$0xff] %v4676_v15 }
 0x4d5   : > { %v4538_v21 = vadd.f32 0.4994258, %v4537_v0  ;;  %v4463_v62 = vsub.f32 1.0, %v4462_v63  ;;  %v4435_v3 = vmul.f32 %v4434_v60, %v4410_v23  ;;  %v4527_v25 = vadd.f32 0.18741608, %v4526_v58  ;;  %vm4468_vm7 = vmor %vm4466_vm6, %vm4467_vm5 }
 0x4d6   : > { %vm4471_vm8 = vcmp.eq.f32.partialorder %v4470_v49, 8.507059e+37  ;;  %v4512_v61 = vand.u32 2147483648, %v8542_v22  ;;  %v4510_v12 = vand.u32 2147483647, %v8542_v22  ;;  %v4490_v48 = vmul.f32 %v4489_v20, %v8470_v18 }
 0x4d7   : > { %v4539_v16 = vmul.f32 %v4538_v21, %v8501_v2  ;;  %v4464_v31 = vmul.f32 %v5361_v27, %v4463_v62  ;;  %v5046_v4 = vclamps-f32 %v4435_v3, 1.0  ;;  %v4528_v37 = vmul.f32 %v4527_v25, %v8501_v2 }
 0x4d8   : > { %vm4506_vm10 = vweird.f32 %v8542_v22  ;;  %v4513_v1 = vor.u32 1.1754944e-38, %v4512_v61  ;;  %vm4511_vm12 = vcmp.eq.f32.partialorder %v4510_v12, 8.507059e+37  ;;  %v3900_v62 = vmul.f32 0.5, %v8464_v33 }
 0x4d9   : > { %v8557_v28 = vadd.f32 1.0, %v4539_v16  ;;  %v4465_v54 = vadd.f32 %v5361_v27, %v4464_v31  ;;  %v4570_v51 = vadd.f32 1.0, %v5046_v4  ;;  %v4677_v43 = vpop.f32.mrf.mxu1  ;;  %v4529_v50 = vadd.f32 1.1283791, %v4528_v37 }
 0x4da   : > { %v5363_v34 = vpop.eup %5362  ;;  %v4678_v2 = vadd.f32 %v8555_v42, %v4677_v43  ;;  %v3901_v46 = vmul.f32 0.5, %v8485_v36 }
 0x4db   : > { %5364 = vrcp.f32 %v8557_v28  ;;  %v4469_v57 = vsel %vm4468_vm7, %v5361_v27, %v4465_v54  ;;  %v4502_v5 = vmul.f32 %v5363_v34, %v8542_v22  ;;  %vm4507_vm9 = vweird.f32 %v5363_v34 }
 0x4dc   : > { %v4474_v7 = vsel %vm4471_vm8, %v4473_v8, %v4469_v57  ;;  %v4586_v56 = vmul.f32 %v4570_v51, %v3898_v11  ;;  %vm4508_vm11 = vmor %vm4506_vm10, %vm4507_vm9  ;;  %4716 = vst [vmem:[%s8564_s30 + $0x8] sm:$0xff] %v4678_v2  ;;  %v4550_v6 = vand.u32 2147483647, %v8557_v28  ;;  %v4552_v45 = vand.u32 2147483648, %v8557_v28 }
 0x4dd   : > { %v4475_v55 = vmul.f32 %v4474_v7, %v4450_v9  ;;  %v4503_v14 = vsub.f32 1.0, %v4502_v5  ;;  %vm4546_vm14 = vweird.f32 %v8557_v28  ;;  %v4530_v0 = vmul.f32 %v4529_v50, %v8492_v17 }
 0x4de   : > { %v4553_v39 = vor.u32 1.1754944e-38, %v4552_v45  ;;  %vm4551_vm0 = vcmp.eq.f32.partialorder %v4550_v6, 8.507059e+37 }
 0x4df   : > { %v5047_v53 = vclamps-f32 %v4475_v55, 1.0  ;;  %v4504_v52 = vmul.f32 %v5363_v34, %v4503_v14 }
 0x4e1   : > { %v5365_v44 = vpop.eup %5364  ;;  %v4571_v47 = vadd.f32 1.0, %v5047_v53  ;;  %v4505_v29 = vadd.f32 %v5363_v34, %v4504_v52 }
 0x4e2   : > { %v4542_v32 = vmul.f32 %v5365_v44, %v8557_v28  ;;  %vm4547_vm13 = vweird.f32 %v5365_v44 }
 0x4e3   : > { %v4587_v35 = vmul.f32 %v4571_v47, %v3899_v41  ;;  %v4509_v38 = vsel %vm4508_vm11, %v5363_v34, %v4505_v29  ;;  %vm4548_vm15 = vmor %vm4546_vm14, %vm4547_vm13 }
 0x4e4   : > { %v4543_v19 = vsub.f32 1.0, %v4542_v32  ;;  %v4514_v27 = vsel %vm4511_vm12, %v4513_v1, %v4509_v38 }
 0x4e5   : > { %v4596_v40 = vpack.c.bf16 %v4587_v35, %v4586_v56  ;;  %v4515_v18 = vmul.f32 %v4514_v27, %v4490_v48 }
 0x4e6   : > { %v4544_v13 = vmul.f32 %v5365_v44, %v4543_v19 }
 0x4e7   : > { %4704 = vmatmul.bf16.gmra.mxu1 %v4596_v40  ;;  %v5048_v63 = vclamps-f32 %v4515_v18, 1.0 }
 0x4e8   : > { %v4545_v26 = vadd.f32 %v5365_v44, %v4544_v13 }
 0x4e9   : > { %v4572_v59 = vadd.f32 1.0, %v5048_v63 }
 0x4ea   : > { %v4549_v22 = vsel %vm4548_vm15, %v5365_v44, %v4545_v26 }
 0x4eb   : > { %v4554_v60 = vsel %vm4551_vm0, %v4553_v39, %v4549_v22  ;;  %v4588_v24 = vmul.f32 %v4572_v59, %v3900_v62 }
 0x4ec   : > { %v4555_v21 = vmul.f32 %v4554_v60, %v4530_v0 }
 0x4ee   : > { %v5049_v23 = vclamps-f32 %v4555_v21, 1.0 }
 0x4f0   : > { %v4573_v58 = vadd.f32 1.0, %v5049_v23 }
 0x4f2   : > { %v4589_v16 = vmul.f32 %v4573_v58, %v3901_v46 }
 0x4f4   : > { %v4597_v17 = vpack.c.bf16 %v4589_v16, %v4588_v24 }
 0x4f7   : > { %v4680_v3 = vpop.f32.mrf.mxu1  ;;  %4709 = vmatmul.bf16.gmra.mxu1 %v4597_v17 }
 0x4f8   : > { %v4681_v31 = vadd.f32 %v8555_v42, %v4680_v3 }
 0x4fa   : > { %4717 = vst [vmem:[%s8564_s30 + $0x10] sm:$0xff] %v4681_v31 }
 0x4ff   : > { %v4682_v49 = vpop.f32.mrf.mxu1 }
 0x500   : > { %v4683_v28 = vadd.f32 %v8555_v42, %v4682_v49 }
 0x502   : > { %4718 = vst [vmem:[%s8564_s30 + $0x18] sm:$0xff] %v4683_v28 }
 0x512   : > { %v4685_v33 = vpop.f32.mrf.mxu1 }
 0x513   : > { %v4686_v36 = vadd.f32 %v8555_v42, %v4685_v33 }
 0x515   : > { %4719 = vst [vmem:[%s8564_s30 + $0x20] sm:$0xff] %v4686_v36 }
 0x51a   : > { %v4687_v10 = vpop.f32.mrf.mxu1 }
 0x51b   : > { %v4688_v54 = vadd.f32 %v8555_v42, %v4687_v10 }
 0x51d   : > { %4720 = vst [vmem:[%s8564_s30 + $0x28] sm:$0xff] %v4688_v54 }
 0x523   : > { %v4690_v15 = vpop.f32.mrf.mxu1 }
 0x524   : > { %v4691_v30 = vadd.f32 %v8555_v42, %v4690_v15 }
 0x526   : > { %4721 = vst [vmem:[%s8564_s30 + $0x30] sm:$0xff] %v4691_v30 }
 0x52b   : > { %v4692_v25 = vpop.f32.mrf.mxu1 }
 0x52c   : > { %v4693_v8 = vadd.f32 %v8555_v42, %v4692_v25 }
 0x52e   : > { %4722 = vst [vmem:[%s8564_s30 + $0x38] sm:$0xff] %v4693_v8 }
 0x533   : > { %v4695_v34 = vpop.f32.mrf.mxu1 }
 0x534   : > { %v4696_v9 = vadd.f32 %v8555_v42, %v4695_v34 }
 0x536   : > { %4723 = vst [vmem:[%s8564_s30 + $0x40] sm:$0xff] %v4696_v9 }
 0x53b   : > { %v4697_v4 = vpop.f32.mrf.mxu1 }
 0x53c   : > { %v4698_v57 = vadd.f32 %v8555_v42, %v4697_v4 }
 0x53e   : > { %4724 = vst [vmem:[%s8564_s30 + $0x48] sm:$0xff] %v4698_v57 }
 0x546   : > { %v4700_v7 = vpop.f32.mrf.mxu1 }
 0x547   : > { %v4701_v5 = vadd.f32 %v8555_v42, %v4700_v7 }
 0x549   : > { %4725 = vst [vmem:[%s8564_s30 + $0x50] sm:$0xff] %v4701_v5 }
 0x54e   : > { %v4702_v55 = vpop.f32.mrf.mxu1 }
 0x54f   : > { %v4703_v20 = vadd.f32 %v8555_v42, %v4702_v55 }
 0x551   : > { %4726 = vst [vmem:[%s8564_s30 + $0x58] sm:$0xff] %v4703_v20 }
 0x564   : > { %v4705_v37 = vpop.f32.mrf.mxu1 }
 0x565   : > { %v4706_v14 = vadd.f32 %v8555_v42, %v4705_v37 }
 0x567   : > { %4727 = vst [vmem:[%s8564_s30 + $0x60] sm:$0xff] %v4706_v14 }
 0x56c   : > { %v4707_v53 = vpop.f32.mrf.mxu1 }
 0x56d   : > { %v4708_v51 = vadd.f32 %v8555_v42, %v4707_v53 }
 0x56f   : > { %4728 = vst [vmem:[%s8564_s30 + $0x68] sm:$0xff] %v4708_v51 }
 0x574   : > { %v4710_v61 = vpop.f32.mrf.mxu1 }
 0x575   : > { %v4711_v44 = vadd.f32 %v8555_v42, %v4710_v61 }
 0x577   : > { %4729 = vst [vmem:[%s8564_s30 + $0x70] sm:$0xff] %v4711_v44 }
 0x57c   : > { %v4712_v11 = vpop.f32.mrf.mxu1 }
 0x57d   : > { %v4713_v52 = vadd.f32 %v8555_v42, %v4712_v11 }
 0x57f   : > { %4730 = vst [vmem:[%s8564_s30 + $0x78] sm:$0xff] %v4713_v52 }
 0x580   : > { %5425 = shalt.err (!%p5422_p8)
}
 0x581   : > { %s5469_s17 = smov 128   ;;  %s5470_s30 = smov 8  }
 0x582   : > { %5150 = dma.vmem_to_hbm [thread:$0]  (%p5579_p5), %s4745_s23, 2048, %s4747_s27, %s4732_s11, %s5469_s17, %s5469_s17, %s5470_s30  }
 0x583 PF: > { %p5162_p9 = scmp.ge.s32.totalorder %s5464_s28, 2  ;;  %s4761_s24 = sand.u32 1, %s5452_s25  }
 0x584   : > { %s4762_s15 = scalar_lea.sflag [#allocation4], %s4761_s24 }
 0x585   : > { %p5157_p10 = pnand %p5162_p9, %p5583_p6 }
 0x587   : > { %p5158_p11 = pneg %p5157_p10 }
 0x589   : > { %5447 = dma.done.wait (%p5158_p11), %s4762_s15, 2048  }
 0x58a   : > { %5449 = vsyncadd (%p5158_p11), %s4762_s15, 4294965248  ;;  %s8781_s29 = sld [smem:[#allocation8_spill]]  ;;  %p24_p12 = scmp.ge.s32.totalorder %s5566_s14, 4  }
 0x58b   : > { %s8782_s27 = sld [smem:[#allocation9_spill]]  ;;  %s8783_s25 = smov %s5456_s26 }
 0x58c   : > { %s8785_s28 = smov %s5566_s14  ;;  %26 = sbr.rel (!%p24_p12) target bundleno = 6 (0x6), region = 112 }
 0x590   : > { %s8784_s26 = smov %s8781_s29 }
 0x591   :  { %4768 = vsyncpa [#allocation3], 1 }
 0x592   :  { %4770 = vsyncpa [#allocation3 + $0x1], 1 }
 0x593   :  { %4771 = vsyncpa [#allocation4], 1 }
 0x594   :  { %4773 = vsyncpa [#allocation4 + $0x1], 1 }

</bundles_post_ra>
